<compile_context>
chip_gen: v7x
topology: tpu7x:2x2x1
jax: 0.10.0
libtpu: 0.0.40
codegen_flags: <defaults>
</compile_context>

<pallas_src>
import functools

import jax
import jax.numpy as jnp
from jax.experimental import pallas as pl
from jax.experimental.pallas import tpu as pltpu


def _mha_kernel(lens_ref, x_ref, wq_ref, wk_ref, wv_ref, proj_ref,
                gamma_ref, beta_ref, o_ref, attn_ref):
    b = pl.program_id(0)
    seq_len = lens_ref[b]                       # valid tokens for this sequence

    x = x_ref[0]                                # [T, D] f32
    T, D = x.shape
    n_head = wq_ref.shape[0]
    inv_temper = 1.0 / (float(D) ** 0.5)        # ScaledDotProductAttention temper

    x_bf = x.astype(jnp.bfloat16)

    # key-position validity mask (same mask for every query row, like torch)
    key_idx = jax.lax.broadcasted_iota(jnp.int32, (T, T), 1)
    key_valid = key_idx < seq_len

    comb = jnp.zeros((T, D), jnp.float32)
    for h in range(n_head):                     # static unroll over heads
        # fused block-diagonal projections (content + positional partitions)
        q_h = jnp.dot(x_bf, wq_ref[h], preferred_element_type=jnp.float32)
        k_h = jnp.dot(x_bf, wk_ref[h], preferred_element_type=jnp.float32)
        v_h = jnp.dot(x_bf, wv_ref[h], preferred_element_type=jnp.float32)

        # scores: q @ k^T (NT matmul, no explicit transpose materialized)
        s = jax.lax.dot_general(
            q_h.astype(jnp.bfloat16), k_h.astype(jnp.bfloat16),
            dimension_numbers=(((1,), (1,)), ((), ())),
            preferred_element_type=jnp.float32) * inv_temper
        s = jnp.where(key_valid, s, -jnp.inf)

        # stable softmax (attention dropout = identity in eval)
        m = jnp.max(s, axis=-1, keepdims=True)
        e = jnp.exp(s - m)
        denom = jnp.sum(e, axis=-1, keepdims=True)
        attn = e * pl.reciprocal(denom, approx=False)
        attn_ref[0, h] = attn

        o_h = jnp.dot(attn.astype(jnp.bfloat16), v_h.astype(jnp.bfloat16),
                      preferred_element_type=jnp.float32)
        # fused proj1/proj2 output projection (block-structured), accumulated
        comb = comb + jnp.dot(o_h.astype(jnp.bfloat16), proj_ref[h],
                              preferred_element_type=jnp.float32)

    # residual (residual FeatureDropout = identity in eval)
    out = comb + x

    # LayerNormalization: unbiased std, eps added to sigma (torch semantics)
    mu = jnp.mean(out, axis=-1, keepdims=True)
    diff = out - mu
    var_unbiased = jnp.sum(diff * diff, axis=-1, keepdims=True) / (D - 1)
    sigma = jnp.sqrt(var_unbiased)
    ln = diff * pl.reciprocal(sigma + 1e-3, approx=False)
    ln = ln * gamma_ref[...] + beta_ref[...]

    # zero out padded (invalid) query rows
    row_idx = jax.lax.broadcasted_iota(jnp.int32, (T, 1), 0)
    o_ref[0] = jnp.where(row_idx < seq_len, ln, 0.0)


def multi_head_attention(x, lens, params):
    """x: [B, T, d_model] f32 (padded), lens: [B] int32 valid lengths (>=1)."""
    B, T, D = x.shape
    n_head, _, d_k = params["wq"].shape
    d_v = params["wv"].shape[-1]

    grid_spec = pltpu.PrefetchScalarGridSpec(
        num_scalar_prefetch=1,                   # lens -> SMEM
        grid=(B,),
        in_specs=[
            pl.BlockSpec((1, T, D), lambda b, l: (b, 0, 0)),           # x tile
            pl.BlockSpec((n_head, D, d_k), lambda b, l: (0, 0, 0)),    # wq (resident)
            pl.BlockSpec((n_head, D, d_k), lambda b, l: (0, 0, 0)),    # wk
            pl.BlockSpec((n_head, D, d_v), lambda b, l: (0, 0, 0)),    # wv
            pl.BlockSpec((n_head, d_v, D), lambda b, l: (0, 0, 0)),    # proj
            pl.BlockSpec((1, D), lambda b, l: (0, 0)),                 # gamma
            pl.BlockSpec((1, D), lambda b, l: (0, 0)),                 # beta
        ],
        out_specs=[
            pl.BlockSpec((1, T, D), lambda b, l: (b, 0, 0)),
            pl.BlockSpec((1, n_head, T, T), lambda b, l: (b, 0, 0, 0)),
        ],
    )

    weight_bytes = sum(int(params[k].size) * params[k].dtype.itemsize
                       for k in ("wq", "wk", "wv", "proj", "gamma", "beta"))
    flops = B * (2 * T * D * n_head * (2 * d_k + d_v)      # qkv projections
                 + 2 * n_head * T * T * (d_k + d_v)        # scores + attn@v
                 + 2 * T * n_head * d_v * D)               # output projection
    bytes_accessed = (int(x.size) * 4 + weight_bytes
                      + B * T * D * 4 + B * n_head * T * T * 4 + int(lens.size) * 4)

    out, attn = pl.pallas_call(
        _mha_kernel,
        grid_spec=grid_spec,
        out_shape=(jax.ShapeDtypeStruct((B, T, D), jnp.float32),
                   jax.ShapeDtypeStruct((B, n_head, T, T), jnp.float32)),
        compiler_params=pltpu.CompilerParams(
            dimension_semantics=("parallel",)),
        cost_estimate=pl.CostEstimate(
            flops=flops,
            transcendentals=B * n_head * T * T,
            bytes_accessed=bytes_accessed),
    )(lens, x, params["wq"], params["wk"], params["wv"], params["proj"],
      params["gamma"], params["beta"])
    return out, attn


def make_params(key, n_head, d_model, d_k, d_v, d_positional):
    """Builds raw (torch-layout) partitioned weights and fused kernel weights."""
    d_content = d_model - d_positional
    dk2, dv2 = d_k // 2, d_v // 2
    ks = jax.random.split(key, 10)

    def xavier(k, shape, fan_in, fan_out):
        std = (2.0 / (fan_in + fan_out)) ** 0.5
        return (std * jax.random.normal(k, shape, jnp.float32)).astype(jnp.bfloat16)

    raw = {
        "w_qs1": xavier(ks[0], (n_head, d_content, dk2), d_content, dk2),
        "w_ks1": xavier(ks[1], (n_head, d_content, dk2), d_content, dk2),
        "w_vs1": xavier(ks[2], (n_head, d_content, dv2), d_content, dv2),
        "w_qs2": xavier(ks[3], (n_head, d_positional, dk2), d_positional, dk2),
        "w_ks2": xavier(ks[4], (n_head, d_positional, dk2), d_positional, dk2),
        "w_vs2": xavier(ks[5], (n_head, d_positional, dv2), d_positional, dv2),
        # nn.Linear weight layout: [out_features, in_features]
        "proj1_w": xavier(ks[6], (d_content, n_head * dv2), n_head * dv2, d_content),
        "proj2_w": xavier(ks[7], (d_positional, n_head * dv2), n_head * dv2, d_positional),
        "gamma": 1.0 + 0.1 * jax.random.normal(ks[8], (d_model,), jnp.float32),
        "beta": 0.1 * jax.random.normal(ks[9], (d_model,), jnp.float32),
    }

    # Fused per-head block-diagonal QKV weights: [n_head, d_model, d_k/d_v]
    wq = jnp.zeros((n_head, d_model, d_k), jnp.bfloat16)
    wq = wq.at[:, :d_content, :dk2].set(raw["w_qs1"])
    wq = wq.at[:, d_content:, dk2:].set(raw["w_qs2"])
    wk = jnp.zeros((n_head, d_model, d_k), jnp.bfloat16)
    wk = wk.at[:, :d_content, :dk2].set(raw["w_ks1"])
    wk = wk.at[:, d_content:, dk2:].set(raw["w_ks2"])
    wv = jnp.zeros((n_head, d_model, d_v), jnp.bfloat16)
    wv = wv.at[:, :d_content, :dv2].set(raw["w_vs1"])
    wv = wv.at[:, d_content:, dv2:].set(raw["w_vs2"])

    # Fused per-head output projection: [n_head, d_v, d_model]
    p1 = jnp.transpose(raw["proj1_w"].reshape(d_content, n_head, dv2), (1, 2, 0))
    p2 = jnp.transpose(raw["proj2_w"].reshape(d_positional, n_head, dv2), (1, 2, 0))
    proj = jnp.zeros((n_head, d_v, d_model), jnp.bfloat16)
    proj = proj.at[:, :dv2, :d_content].set(p1)
    proj = proj.at[:, dv2:, d_content:].set(p2)

    params = {
        "wq": wq, "wk": wk, "wv": wv, "proj": proj,
        "gamma": raw["gamma"].reshape(1, d_model),
        "beta": raw["beta"].reshape(1, d_model),
    }
    return raw, params


def _reference(x, lens, raw, n_head, d_k, d_v, d_positional):
    """Pure-JAX emulation of the torch MultiHeadAttention forward (eval mode)."""
    B, T, D = x.shape
    d_content = D - d_positional
    dv2 = d_v // 2
    bf = jnp.bfloat16

    xc = x[..., :d_content].astype(bf)
    xp = x[..., d_content:].astype(bf)

    def project(w1, w2):
        a = jnp.einsum('btc,hck->bhtk', xc, w1, preferred_element_type=jnp.float32)
        b = jnp.einsum('btp,hpk->bhtk', xp, w2, preferred_element_type=jnp.float32)
        return jnp.concatenate([a, b], axis=-1)

    q = project(raw["w_qs1"], raw["w_qs2"])
    k = project(raw["w_ks1"], raw["w_ks2"])
    v = project(raw["w_vs1"], raw["w_vs2"])

    temper = float(D) ** 0.5
    s = jnp.einsum('bhtk,bhsk->bhts', q.astype(bf), k.astype(bf),
                   preferred_element_type=jnp.float32) * (1.0 / temper)
    key_valid = jnp.arange(T)[None, :] < lens[:, None]          # [B, T]
    s = jnp.where(key_valid[:, None, None, :], s, -jnp.inf)
    attn = jax.nn.softmax(s, axis=-1)

    o = jnp.einsum('bhts,bhsv->bhtv', attn.astype(bf), v.astype(bf),
                   preferred_element_type=jnp.float32)
    o1 = jnp.transpose(o[..., :dv2], (0, 2, 1, 3)).reshape(B, T, n_head * dv2)
    o2 = jnp.transpose(o[..., dv2:], (0, 2, 1, 3)).reshape(B, T, n_head * dv2)
    out1 = jnp.einsum('btk,ck->btc', o1.astype(bf), raw["proj1_w"],
                      preferred_element_type=jnp.float32)
    out2 = jnp.einsum('btk,pk->btp', o2.astype(bf), raw["proj2_w"],
                      preferred_element_type=jnp.float32)
    out = jnp.concatenate([out1, out2], axis=-1) + x

    mu = jnp.mean(out, axis=-1, keepdims=True)
    sigma = jnp.std(out, axis=-1, keepdims=True, ddof=1)
    ln = (out - mu) / (sigma + 1e-3) * raw["gamma"] + raw["beta"]
    ln = jnp.where(key_valid[..., None], ln, 0.0)
    return ln, attn


if __name__ == "__main__":
    # small, TPU-friendly config: lane-dense d_model, partitioned projections
    n_head, d_model, d_k, d_v, d_positional = 4, 128, 32, 32, 32
    B, T = 2, 128

    key = jax.random.PRNGKey(0)
    kx, kp = jax.random.split(key)
    x = jax.random.normal(kx, (B, T, d_model), jnp.float32)
    lens = jnp.array([T, 96], dtype=jnp.int32)          # ragged sequence lengths
    raw, params = make_params(kp, n_head, d_model, d_k, d_v, d_positional)

    out, attn = multi_head_attention(x, lens, params)
    out = jax.block_until_ready(out)
    attn = jax.block_until_ready(attn)

    ref_out, ref_attn = _reference(x, lens, raw, n_head, d_k, d_v, d_positional)
    assert jnp.allclose(out, ref_out, atol=2e-3, rtol=2e-3), "output mismatch vs reference"
    assert jnp.allclose(attn, ref_attn, atol=2e-3, rtol=2e-3), "attention mismatch vs reference"
    print("KERNEL_OK")
</pallas_src>

<mosaic_0001>
module attributes {stable_mosaic.version = 11 : i64} {
  func.func @_mha_kernel(%arg0: i32, %arg1: memref<2xi32, #tpu.memory_space<smem>>, %arg2: memref<1x128x128xf32, #tpu.memory_space<vmem>>, %arg3: memref<4x128x32xbf16, #tpu.memory_space<vmem>>, %arg4: memref<4x128x32xbf16, #tpu.memory_space<vmem>>, %arg5: memref<4x128x32xbf16, #tpu.memory_space<vmem>>, %arg6: memref<4x32x128xbf16, #tpu.memory_space<vmem>>, %arg7: memref<1x128xf32, #tpu.memory_space<vmem>>, %arg8: memref<1x128xf32, #tpu.memory_space<vmem>>, %arg9: memref<1x128x128xf32, #tpu.memory_space<vmem>>, %arg10: memref<1x4x128x128xf32, #tpu.memory_space<vmem>>) attributes {dimension_semantics = [#tpu.dimension_semantics<parallel>], iteration_bounds = array<i64: 2>, scalar_prefetch = 1 : i64, scratch_operands = 0 : i64, tpu.core_type = #tpu.core_type<tc>, window_params = [{transform_indices = @transform_0, window_bounds = array<i64: 1, 128, 128>}, {pipeline_mode = #tpu.pipeline_mode<synchronous>, transform_indices = @transform_1, window_bounds = array<i64: 4, 128, 32>}, {pipeline_mode = #tpu.pipeline_mode<synchronous>, transform_indices = @transform_2, window_bounds = array<i64: 4, 128, 32>}, {pipeline_mode = #tpu.pipeline_mode<synchronous>, transform_indices = @transform_3, window_bounds = array<i64: 4, 128, 32>}, {pipeline_mode = #tpu.pipeline_mode<synchronous>, transform_indices = @transform_4, window_bounds = array<i64: 4, 32, 128>}, {pipeline_mode = #tpu.pipeline_mode<synchronous>, transform_indices = @transform_5, window_bounds = array<i64: 1, 128>}, {pipeline_mode = #tpu.pipeline_mode<synchronous>, transform_indices = @transform_6, window_bounds = array<i64: 1, 128>}, {transform_indices = @transform_7, window_bounds = array<i64: 1, 128, 128>}, {transform_indices = @transform_8, window_bounds = array<i64: 1, 4, 128, 128>}]} {
    %0 = arith.index_cast %arg0 : i32 to index
    %1 = memref.load %arg1[%0] : memref<2xi32, #tpu.memory_space<smem>>
    %c0 = arith.constant 0 : index
    %c0_0 = arith.constant 0 : index
    %c0_1 = arith.constant 0 : index
    %2 = vector.load %arg2[%c0, %c0_0, %c0_1] : memref<1x128x128xf32, #tpu.memory_space<vmem>>, vector<1x128x128xf32>
    %3 = vector.shape_cast %2 : vector<1x128x128xf32> to vector<128x128xf32>
    %4 = arith.truncf %3 : vector<128x128xf32> to vector<128x128xbf16>
    %5 = tpu.iota {dimensions = array<i32: 1>} : vector<128x128xi32>
    %6 = vector.broadcast %1 : i32 to vector<128x128xi32>
    %7 = arith.cmpi slt, %5, %6 : vector<128x128xi32>
    %cst = arith.constant 0.000000e+00 : f32
    %8 = vector.broadcast %cst : f32 to vector<128x128xf32>
    %c0_2 = arith.constant 0 : index
    %c0_3 = arith.constant 0 : index
    %c0_4 = arith.constant 0 : index
    %9 = vector.load %arg3[%c0_2, %c0_3, %c0_4] : memref<4x128x32xbf16, #tpu.memory_space<vmem>>, vector<1x128x32xbf16>
    %10 = vector.shape_cast %9 : vector<1x128x32xbf16> to vector<128x32xbf16>
    %cst_5 = arith.constant dense<0.000000e+00> : vector<128x32xf32>
    %11 = tpu.matmul %4, %10, %cst_5 {dimension_numbers = #tpu.dot_dimension_numbers<[1], [0], [0], [1], [0, 0, 1, 1], [], []>} : vector<128x128xbf16>, vector<128x32xbf16>, vector<128x32xf32> -> vector<128x32xf32>
    %c0_6 = arith.constant 0 : index
    %c0_7 = arith.constant 0 : index
    %c0_8 = arith.constant 0 : index
    %12 = vector.load %arg4[%c0_6, %c0_7, %c0_8] : memref<4x128x32xbf16, #tpu.memory_space<vmem>>, vector<1x128x32xbf16>
    %13 = vector.shape_cast %12 : vector<1x128x32xbf16> to vector<128x32xbf16>
    %cst_9 = arith.constant dense<0.000000e+00> : vector<128x32xf32>
    %14 = tpu.matmul %4, %13, %cst_9 {dimension_numbers = #tpu.dot_dimension_numbers<[1], [0], [0], [1], [0, 0, 1, 1], [], []>} : vector<128x128xbf16>, vector<128x32xbf16>, vector<128x32xf32> -> vector<128x32xf32>
    %c0_10 = arith.constant 0 : index
    %c0_11 = arith.constant 0 : index
    %c0_12 = arith.constant 0 : index
    %15 = vector.load %arg5[%c0_10, %c0_11, %c0_12] : memref<4x128x32xbf16, #tpu.memory_space<vmem>>, vector<1x128x32xbf16>
    %16 = vector.shape_cast %15 : vector<1x128x32xbf16> to vector<128x32xbf16>
    %cst_13 = arith.constant dense<0.000000e+00> : vector<128x32xf32>
    %17 = tpu.matmul %4, %16, %cst_13 {dimension_numbers = #tpu.dot_dimension_numbers<[1], [0], [0], [1], [0, 0, 1, 1], [], []>} : vector<128x128xbf16>, vector<128x32xbf16>, vector<128x32xf32> -> vector<128x32xf32>
    %18 = arith.truncf %11 : vector<128x32xf32> to vector<128x32xbf16>
    %19 = arith.truncf %14 : vector<128x32xf32> to vector<128x32xbf16>
    %cst_14 = arith.constant dense<0.000000e+00> : vector<128x128xf32>
    %20 = tpu.matmul %18, %19, %cst_14 {dimension_numbers = #tpu.dot_dimension_numbers<[1], [1], [0], [0], [0, 0, 1, 0], [], []>} : vector<128x32xbf16>, vector<128x32xbf16>, vector<128x128xf32> -> vector<128x128xf32>
    %cst_15 = arith.constant 0.0883883461 : f32
    %21 = vector.broadcast %cst_15 : f32 to vector<128x128xf32>
    %22 = arith.mulf %20, %21 : vector<128x128xf32>
    %cst_16 = arith.constant 0xFF800000 : f32
    %23 = vector.broadcast %cst_16 : f32 to vector<128x128xf32>
    %24 = arith.select %7, %22, %23 : vector<128x128xi1>, vector<128x128xf32>
    %cst_17 = arith.constant dense<0xFF800000> : vector<128xf32>
    %25 = vector.multi_reduction <maximumf>, %24, %cst_17 [1] : vector<128x128xf32> to vector<128xf32>
    %26 = vector.shape_cast %25 : vector<128xf32> to vector<128x1xf32>
    %27 = vector.broadcast %26 : vector<128x1xf32> to vector<128x128xf32>
    %28 = arith.subf %24, %27 : vector<128x128xf32>
    %29 = math.exp %28 : vector<128x128xf32>
    %cst_18 = arith.constant dense<0.000000e+00> : vector<128xf32>
    %30 = vector.multi_reduction <add>, %29, %cst_18 [1] : vector<128x128xf32> to vector<128xf32>
    %31 = vector.shape_cast %30 : vector<128xf32> to vector<128x1xf32>
    %32 = tpu.reciprocal %31 : vector<128x1xf32> -> vector<128x1xf32>
    %33 = vector.broadcast %32 : vector<128x1xf32> to vector<128x128xf32>
    %34 = arith.mulf %29, %33 : vector<128x128xf32>
    %c0_19 = arith.constant 0 : index
    %c0_20 = arith.constant 0 : index
    %c0_21 = arith.constant 0 : index
    %c0_22 = arith.constant 0 : index
    %35 = vector.load %arg10[%c0_19, %c0_20, %c0_21, %c0_22] : memref<1x4x128x128xf32, #tpu.memory_space<vmem>>, vector<1x1x128x128xf32>
    %36 = vector.shape_cast %35 : vector<1x1x128x128xf32> to vector<128x128xf32>
    %37 = vector.shape_cast %34 : vector<128x128xf32> to vector<1x1x128x128xf32>
    tpu.vector_store %arg10[%c0_19, %c0_20, %c0_21, %c0_22], %37 {strides = array<i32>} : memref<1x4x128x128xf32, #tpu.memory_space<vmem>>, vector<1x1x128x128xf32>,
    %38 = arith.truncf %34 : vector<128x128xf32> to vector<128x128xbf16>
    %39 = arith.truncf %17 : vector<128x32xf32> to vector<128x32xbf16>
    %cst_23 = arith.constant dense<0.000000e+00> : vector<128x32xf32>
    %40 = tpu.matmul %38, %39, %cst_23 {dimension_numbers = #tpu.dot_dimension_numbers<[1], [0], [0], [1], [0, 0, 1, 1], [], []>} : vector<128x128xbf16>, vector<128x32xbf16>, vector<128x32xf32> -> vector<128x32xf32>
    %41 = arith.truncf %40 : vector<128x32xf32> to vector<128x32xbf16>
    %c0_24 = arith.constant 0 : index
    %c0_25 = arith.constant 0 : index
    %c0_26 = arith.constant 0 : index
    %42 = vector.load %arg6[%c0_24, %c0_25, %c0_26] : memref<4x32x128xbf16, #tpu.memory_space<vmem>>, vector<1x32x128xbf16>
    %43 = vector.shape_cast %42 : vector<1x32x128xbf16> to vector<32x128xbf16>
    %cst_27 = arith.constant dense<0.000000e+00> : vector<128x128xf32>
    %44 = tpu.matmul %41, %43, %cst_27 {dimension_numbers = #tpu.dot_dimension_numbers<[1], [0], [0], [1], [0, 0, 1, 1], [], []>} : vector<128x32xbf16>, vector<32x128xbf16>, vector<128x128xf32> -> vector<128x128xf32>
    %45 = arith.addf %8, %44 : vector<128x128xf32>
    %c1 = arith.constant 1 : index
    %c0_28 = arith.constant 0 : index
    %c0_29 = arith.constant 0 : index
    %46 = vector.load %arg3[%c1, %c0_28, %c0_29] : memref<4x128x32xbf16, #tpu.memory_space<vmem>>, vector<1x128x32xbf16>
    %47 = vector.shape_cast %46 : vector<1x128x32xbf16> to vector<128x32xbf16>
    %cst_30 = arith.constant dense<0.000000e+00> : vector<128x32xf32>
    %48 = tpu.matmul %4, %47, %cst_30 {dimension_numbers = #tpu.dot_dimension_numbers<[1], [0], [0], [1], [0, 0, 1, 1], [], []>} : vector<128x128xbf16>, vector<128x32xbf16>, vector<128x32xf32> -> vector<128x32xf32>
    %c1_31 = arith.constant 1 : index
    %c0_32 = arith.constant 0 : index
    %c0_33 = arith.constant 0 : index
    %49 = vector.load %arg4[%c1_31, %c0_32, %c0_33] : memref<4x128x32xbf16, #tpu.memory_space<vmem>>, vector<1x128x32xbf16>
    %50 = vector.shape_cast %49 : vector<1x128x32xbf16> to vector<128x32xbf16>
    %cst_34 = arith.constant dense<0.000000e+00> : vector<128x32xf32>
    %51 = tpu.matmul %4, %50, %cst_34 {dimension_numbers = #tpu.dot_dimension_numbers<[1], [0], [0], [1], [0, 0, 1, 1], [], []>} : vector<128x128xbf16>, vector<128x32xbf16>, vector<128x32xf32> -> vector<128x32xf32>
    %c1_35 = arith.constant 1 : index
    %c0_36 = arith.constant 0 : index
    %c0_37 = arith.constant 0 : index
    %52 = vector.load %arg5[%c1_35, %c0_36, %c0_37] : memref<4x128x32xbf16, #tpu.memory_space<vmem>>, vector<1x128x32xbf16>
    %53 = vector.shape_cast %52 : vector<1x128x32xbf16> to vector<128x32xbf16>
    %cst_38 = arith.constant dense<0.000000e+00> : vector<128x32xf32>
    %54 = tpu.matmul %4, %53, %cst_38 {dimension_numbers = #tpu.dot_dimension_numbers<[1], [0], [0], [1], [0, 0, 1, 1], [], []>} : vector<128x128xbf16>, vector<128x32xbf16>, vector<128x32xf32> -> vector<128x32xf32>
    %55 = arith.truncf %48 : vector<128x32xf32> to vector<128x32xbf16>
    %56 = arith.truncf %51 : vector<128x32xf32> to vector<128x32xbf16>
    %cst_39 = arith.constant dense<0.000000e+00> : vector<128x128xf32>
    %57 = tpu.matmul %55, %56, %cst_39 {dimension_numbers = #tpu.dot_dimension_numbers<[1], [1], [0], [0], [0, 0, 1, 0], [], []>} : vector<128x32xbf16>, vector<128x32xbf16>, vector<128x128xf32> -> vector<128x128xf32>
    %cst_40 = arith.constant 0.0883883461 : f32
    %58 = vector.broadcast %cst_40 : f32 to vector<128x128xf32>
    %59 = arith.mulf %57, %58 : vector<128x128xf32>
    %cst_41 = arith.constant 0xFF800000 : f32
    %60 = vector.broadcast %cst_41 : f32 to vector<128x128xf32>
    %61 = arith.select %7, %59, %60 : vector<128x128xi1>, vector<128x128xf32>
    %cst_42 = arith.constant dense<0xFF800000> : vector<128xf32>
    %62 = vector.multi_reduction <maximumf>, %61, %cst_42 [1] : vector<128x128xf32> to vector<128xf32>
    %63 = vector.shape_cast %62 : vector<128xf32> to vector<128x1xf32>
    %64 = vector.broadcast %63 : vector<128x1xf32> to vector<128x128xf32>
    %65 = arith.subf %61, %64 : vector<128x128xf32>
    %66 = math.exp %65 : vector<128x128xf32>
    %cst_43 = arith.constant dense<0.000000e+00> : vector<128xf32>
    %67 = vector.multi_reduction <add>, %66, %cst_43 [1] : vector<128x128xf32> to vector<128xf32>
    %68 = vector.shape_cast %67 : vector<128xf32> to vector<128x1xf32>
    %69 = tpu.reciprocal %68 : vector<128x1xf32> -> vector<128x1xf32>
    %70 = vector.broadcast %69 : vector<128x1xf32> to vector<128x128xf32>
    %71 = arith.mulf %66, %70 : vector<128x128xf32>
    %c0_44 = arith.constant 0 : index
    %c1_45 = arith.constant 1 : index
    %c0_46 = arith.constant 0 : index
    %c0_47 = arith.constant 0 : index
    %72 = vector.load %arg10[%c0_44, %c1_45, %c0_46, %c0_47] : memref<1x4x128x128xf32, #tpu.memory_space<vmem>>, vector<1x1x128x128xf32>
    %73 = vector.shape_cast %72 : vector<1x1x128x128xf32> to vector<128x128xf32>
    %74 = vector.shape_cast %71 : vector<128x128xf32> to vector<1x1x128x128xf32>
    tpu.vector_store %arg10[%c0_44, %c1_45, %c0_46, %c0_47], %74 {strides = array<i32>} : memref<1x4x128x128xf32, #tpu.memory_space<vmem>>, vector<1x1x128x128xf32>,
    %75 = arith.truncf %71 : vector<128x128xf32> to vector<128x128xbf16>
    %76 = arith.truncf %54 : vector<128x32xf32> to vector<128x32xbf16>
    %cst_48 = arith.constant dense<0.000000e+00> : vector<128x32xf32>
    %77 = tpu.matmul %75, %76, %cst_48 {dimension_numbers = #tpu.dot_dimension_numbers<[1], [0], [0], [1], [0, 0, 1, 1], [], []>} : vector<128x128xbf16>, vector<128x32xbf16>, vector<128x32xf32> -> vector<128x32xf32>
    %78 = arith.truncf %77 : vector<128x32xf32> to vector<128x32xbf16>
    %c1_49 = arith.constant 1 : index
    %c0_50 = arith.constant 0 : index
    %c0_51 = arith.constant 0 : index
    %79 = vector.load %arg6[%c1_49, %c0_50, %c0_51] : memref<4x32x128xbf16, #tpu.memory_space<vmem>>, vector<1x32x128xbf16>
    %80 = vector.shape_cast %79 : vector<1x32x128xbf16> to vector<32x128xbf16>
    %cst_52 = arith.constant dense<0.000000e+00> : vector<128x128xf32>
    %81 = tpu.matmul %78, %80, %cst_52 {dimension_numbers = #tpu.dot_dimension_numbers<[1], [0], [0], [1], [0, 0, 1, 1], [], []>} : vector<128x32xbf16>, vector<32x128xbf16>, vector<128x128xf32> -> vector<128x128xf32>
    %82 = arith.addf %45, %81 : vector<128x128xf32>
    %c2 = arith.constant 2 : index
    %c0_53 = arith.constant 0 : index
    %c0_54 = arith.constant 0 : index
    %83 = vector.load %arg3[%c2, %c0_53, %c0_54] : memref<4x128x32xbf16, #tpu.memory_space<vmem>>, vector<1x128x32xbf16>
    %84 = vector.shape_cast %83 : vector<1x128x32xbf16> to vector<128x32xbf16>
    %cst_55 = arith.constant dense<0.000000e+00> : vector<128x32xf32>
    %85 = tpu.matmul %4, %84, %cst_55 {dimension_numbers = #tpu.dot_dimension_numbers<[1], [0], [0], [1], [0, 0, 1, 1], [], []>} : vector<128x128xbf16>, vector<128x32xbf16>, vector<128x32xf32> -> vector<128x32xf32>
    %c2_56 = arith.constant 2 : index
    %c0_57 = arith.constant 0 : index
    %c0_58 = arith.constant 0 : index
    %86 = vector.load %arg4[%c2_56, %c0_57, %c0_58] : memref<4x128x32xbf16, #tpu.memory_space<vmem>>, vector<1x128x32xbf16>
    %87 = vector.shape_cast %86 : vector<1x128x32xbf16> to vector<128x32xbf16>
    %cst_59 = arith.constant dense<0.000000e+00> : vector<128x32xf32>
    %88 = tpu.matmul %4, %87, %cst_59 {dimension_numbers = #tpu.dot_dimension_numbers<[1], [0], [0], [1], [0, 0, 1, 1], [], []>} : vector<128x128xbf16>, vector<128x32xbf16>, vector<128x32xf32> -> vector<128x32xf32>
    %c2_60 = arith.constant 2 : index
    %c0_61 = arith.constant 0 : index
    %c0_62 = arith.constant 0 : index
    %89 = vector.load %arg5[%c2_60, %c0_61, %c0_62] : memref<4x128x32xbf16, #tpu.memory_space<vmem>>, vector<1x128x32xbf16>
    %90 = vector.shape_cast %89 : vector<1x128x32xbf16> to vector<128x32xbf16>
    %cst_63 = arith.constant dense<0.000000e+00> : vector<128x32xf32>
    %91 = tpu.matmul %4, %90, %cst_63 {dimension_numbers = #tpu.dot_dimension_numbers<[1], [0], [0], [1], [0, 0, 1, 1], [], []>} : vector<128x128xbf16>, vector<128x32xbf16>, vector<128x32xf32> -> vector<128x32xf32>
    %92 = arith.truncf %85 : vector<128x32xf32> to vector<128x32xbf16>
    %93 = arith.truncf %88 : vector<128x32xf32> to vector<128x32xbf16>
    %cst_64 = arith.constant dense<0.000000e+00> : vector<128x128xf32>
    %94 = tpu.matmul %92, %93, %cst_64 {dimension_numbers = #tpu.dot_dimension_numbers<[1], [1], [0], [0], [0, 0, 1, 0], [], []>} : vector<128x32xbf16>, vector<128x32xbf16>, vector<128x128xf32> -> vector<128x128xf32>
    %cst_65 = arith.constant 0.0883883461 : f32
    %95 = vector.broadcast %cst_65 : f32 to vector<128x128xf32>
    %96 = arith.mulf %94, %95 : vector<128x128xf32>
    %cst_66 = arith.constant 0xFF800000 : f32
    %97 = vector.broadcast %cst_66 : f32 to vector<128x128xf32>
    %98 = arith.select %7, %96, %97 : vector<128x128xi1>, vector<128x128xf32>
    %cst_67 = arith.constant dense<0xFF800000> : vector<128xf32>
    %99 = vector.multi_reduction <maximumf>, %98, %cst_67 [1] : vector<128x128xf32> to vector<128xf32>
    %100 = vector.shape_cast %99 : vector<128xf32> to vector<128x1xf32>
    %101 = vector.broadcast %100 : vector<128x1xf32> to vector<128x128xf32>
    %102 = arith.subf %98, %101 : vector<128x128xf32>
    %103 = math.exp %102 : vector<128x128xf32>
    %cst_68 = arith.constant dense<0.000000e+00> : vector<128xf32>
    %104 = vector.multi_reduction <add>, %103, %cst_68 [1] : vector<128x128xf32> to vector<128xf32>
    %105 = vector.shape_cast %104 : vector<128xf32> to vector<128x1xf32>
    %106 = tpu.reciprocal %105 : vector<128x1xf32> -> vector<128x1xf32>
    %107 = vector.broadcast %106 : vector<128x1xf32> to vector<128x128xf32>
    %108 = arith.mulf %103, %107 : vector<128x128xf32>
    %c0_69 = arith.constant 0 : index
    %c2_70 = arith.constant 2 : index
    %c0_71 = arith.constant 0 : index
    %c0_72 = arith.constant 0 : index
    %109 = vector.load %arg10[%c0_69, %c2_70, %c0_71, %c0_72] : memref<1x4x128x128xf32, #tpu.memory_space<vmem>>, vector<1x1x128x128xf32>
    %110 = vector.shape_cast %109 : vector<1x1x128x128xf32> to vector<128x128xf32>
    %111 = vector.shape_cast %108 : vector<128x128xf32> to vector<1x1x128x128xf32>
    tpu.vector_store %arg10[%c0_69, %c2_70, %c0_71, %c0_72], %111 {strides = array<i32>} : memref<1x4x128x128xf32, #tpu.memory_space<vmem>>, vector<1x1x128x128xf32>,
    %112 = arith.truncf %108 : vector<128x128xf32> to vector<128x128xbf16>
    %113 = arith.truncf %91 : vector<128x32xf32> to vector<128x32xbf16>
    %cst_73 = arith.constant dense<0.000000e+00> : vector<128x32xf32>
    %114 = tpu.matmul %112, %113, %cst_73 {dimension_numbers = #tpu.dot_dimension_numbers<[1], [0], [0], [1], [0, 0, 1, 1], [], []>} : vector<128x128xbf16>, vector<128x32xbf16>, vector<128x32xf32> -> vector<128x32xf32>
    %115 = arith.truncf %114 : vector<128x32xf32> to vector<128x32xbf16>
    %c2_74 = arith.constant 2 : index
    %c0_75 = arith.constant 0 : index
    %c0_76 = arith.constant 0 : index
    %116 = vector.load %arg6[%c2_74, %c0_75, %c0_76] : memref<4x32x128xbf16, #tpu.memory_space<vmem>>, vector<1x32x128xbf16>
    %117 = vector.shape_cast %116 : vector<1x32x128xbf16> to vector<32x128xbf16>
    %cst_77 = arith.constant dense<0.000000e+00> : vector<128x128xf32>
    %118 = tpu.matmul %115, %117, %cst_77 {dimension_numbers = #tpu.dot_dimension_numbers<[1], [0], [0], [1], [0, 0, 1, 1], [], []>} : vector<128x32xbf16>, vector<32x128xbf16>, vector<128x128xf32> -> vector<128x128xf32>
    %119 = arith.addf %82, %118 : vector<128x128xf32>
    %c3 = arith.constant 3 : index
    %c0_78 = arith.constant 0 : index
    %c0_79 = arith.constant 0 : index
    %120 = vector.load %arg3[%c3, %c0_78, %c0_79] : memref<4x128x32xbf16, #tpu.memory_space<vmem>>, vector<1x128x32xbf16>
    %121 = vector.shape_cast %120 : vector<1x128x32xbf16> to vector<128x32xbf16>
    %cst_80 = arith.constant dense<0.000000e+00> : vector<128x32xf32>
    %122 = tpu.matmul %4, %121, %cst_80 {dimension_numbers = #tpu.dot_dimension_numbers<[1], [0], [0], [1], [0, 0, 1, 1], [], []>} : vector<128x128xbf16>, vector<128x32xbf16>, vector<128x32xf32> -> vector<128x32xf32>
    %c3_81 = arith.constant 3 : index
    %c0_82 = arith.constant 0 : index
    %c0_83 = arith.constant 0 : index
    %123 = vector.load %arg4[%c3_81, %c0_82, %c0_83] : memref<4x128x32xbf16, #tpu.memory_space<vmem>>, vector<1x128x32xbf16>
    %124 = vector.shape_cast %123 : vector<1x128x32xbf16> to vector<128x32xbf16>
    %cst_84 = arith.constant dense<0.000000e+00> : vector<128x32xf32>
    %125 = tpu.matmul %4, %124, %cst_84 {dimension_numbers = #tpu.dot_dimension_numbers<[1], [0], [0], [1], [0, 0, 1, 1], [], []>} : vector<128x128xbf16>, vector<128x32xbf16>, vector<128x32xf32> -> vector<128x32xf32>
    %c3_85 = arith.constant 3 : index
    %c0_86 = arith.constant 0 : index
    %c0_87 = arith.constant 0 : index
    %126 = vector.load %arg5[%c3_85, %c0_86, %c0_87] : memref<4x128x32xbf16, #tpu.memory_space<vmem>>, vector<1x128x32xbf16>
    %127 = vector.shape_cast %126 : vector<1x128x32xbf16> to vector<128x32xbf16>
    %cst_88 = arith.constant dense<0.000000e+00> : vector<128x32xf32>
    %128 = tpu.matmul %4, %127, %cst_88 {dimension_numbers = #tpu.dot_dimension_numbers<[1], [0], [0], [1], [0, 0, 1, 1], [], []>} : vector<128x128xbf16>, vector<128x32xbf16>, vector<128x32xf32> -> vector<128x32xf32>
    %129 = arith.truncf %122 : vector<128x32xf32> to vector<128x32xbf16>
    %130 = arith.truncf %125 : vector<128x32xf32> to vector<128x32xbf16>
    %cst_89 = arith.constant dense<0.000000e+00> : vector<128x128xf32>
    %131 = tpu.matmul %129, %130, %cst_89 {dimension_numbers = #tpu.dot_dimension_numbers<[1], [1], [0], [0], [0, 0, 1, 0], [], []>} : vector<128x32xbf16>, vector<128x32xbf16>, vector<128x128xf32> -> vector<128x128xf32>
    %cst_90 = arith.constant 0.0883883461 : f32
    %132 = vector.broadcast %cst_90 : f32 to vector<128x128xf32>
    %133 = arith.mulf %131, %132 : vector<128x128xf32>
    %cst_91 = arith.constant 0xFF800000 : f32
    %134 = vector.broadcast %cst_91 : f32 to vector<128x128xf32>
    %135 = arith.select %7, %133, %134 : vector<128x128xi1>, vector<128x128xf32>
    %cst_92 = arith.constant dense<0xFF800000> : vector<128xf32>
    %136 = vector.multi_reduction <maximumf>, %135, %cst_92 [1] : vector<128x128xf32> to vector<128xf32>
    %137 = vector.shape_cast %136 : vector<128xf32> to vector<128x1xf32>
    %138 = vector.broadcast %137 : vector<128x1xf32> to vector<128x128xf32>
    %139 = arith.subf %135, %138 : vector<128x128xf32>
    %140 = math.exp %139 : vector<128x128xf32>
    %cst_93 = arith.constant dense<0.000000e+00> : vector<128xf32>
    %141 = vector.multi_reduction <add>, %140, %cst_93 [1] : vector<128x128xf32> to vector<128xf32>
    %142 = vector.shape_cast %141 : vector<128xf32> to vector<128x1xf32>
    %143 = tpu.reciprocal %142 : vector<128x1xf32> -> vector<128x1xf32>
    %144 = vector.broadcast %143 : vector<128x1xf32> to vector<128x128xf32>
    %145 = arith.mulf %140, %144 : vector<128x128xf32>
    %c0_94 = arith.constant 0 : index
    %c3_95 = arith.constant 3 : index
    %c0_96 = arith.constant 0 : index
    %c0_97 = arith.constant 0 : index
    %146 = vector.load %arg10[%c0_94, %c3_95, %c0_96, %c0_97] : memref<1x4x128x128xf32, #tpu.memory_space<vmem>>, vector<1x1x128x128xf32>
    %147 = vector.shape_cast %146 : vector<1x1x128x128xf32> to vector<128x128xf32>
    %148 = vector.shape_cast %145 : vector<128x128xf32> to vector<1x1x128x128xf32>
    tpu.vector_store %arg10[%c0_94, %c3_95, %c0_96, %c0_97], %148 {strides = array<i32>} : memref<1x4x128x128xf32, #tpu.memory_space<vmem>>, vector<1x1x128x128xf32>,
    %149 = arith.truncf %145 : vector<128x128xf32> to vector<128x128xbf16>
    %150 = arith.truncf %128 : vector<128x32xf32> to vector<128x32xbf16>
    %cst_98 = arith.constant dense<0.000000e+00> : vector<128x32xf32>
    %151 = tpu.matmul %149, %150, %cst_98 {dimension_numbers = #tpu.dot_dimension_numbers<[1], [0], [0], [1], [0, 0, 1, 1], [], []>} : vector<128x128xbf16>, vector<128x32xbf16>, vector<128x32xf32> -> vector<128x32xf32>
    %152 = arith.truncf %151 : vector<128x32xf32> to vector<128x32xbf16>
    %c3_99 = arith.constant 3 : index
    %c0_100 = arith.constant 0 : index
    %c0_101 = arith.constant 0 : index
    %153 = vector.load %arg6[%c3_99, %c0_100, %c0_101] : memref<4x32x128xbf16, #tpu.memory_space<vmem>>, vector<1x32x128xbf16>
    %154 = vector.shape_cast %153 : vector<1x32x128xbf16> to vector<32x128xbf16>
    %cst_102 = arith.constant dense<0.000000e+00> : vector<128x128xf32>
    %155 = tpu.matmul %152, %154, %cst_102 {dimension_numbers = #tpu.dot_dimension_numbers<[1], [0], [0], [1], [0, 0, 1, 1], [], []>} : vector<128x32xbf16>, vector<32x128xbf16>, vector<128x128xf32> -> vector<128x128xf32>
    %156 = arith.addf %119, %155 : vector<128x128xf32>
    %157 = arith.addf %156, %3 : vector<128x128xf32>
    %cst_103 = arith.constant dense<0.000000e+00> : vector<128xf32>
    %158 = vector.multi_reduction <add>, %157, %cst_103 [1] : vector<128x128xf32> to vector<128xf32>
    %159 = vector.shape_cast %158 : vector<128xf32> to vector<128x1xf32>
    %cst_104 = arith.constant 1.280000e+02 : f32
    %160 = vector.broadcast %cst_104 : f32 to vector<128x1xf32>
    %161 = arith.divf %159, %160 : vector<128x1xf32>
    %162 = vector.broadcast %161 : vector<128x1xf32> to vector<128x128xf32>
    %163 = arith.subf %157, %162 : vector<128x128xf32>
    %164 = arith.mulf %163, %163 : vector<128x128xf32>
    %cst_105 = arith.constant dense<0.000000e+00> : vector<128xf32>
    %165 = vector.multi_reduction <add>, %164, %cst_105 [1] : vector<128x128xf32> to vector<128xf32>
    %166 = vector.shape_cast %165 : vector<128xf32> to vector<128x1xf32>
    %cst_106 = arith.constant 1.270000e+02 : f32
    %167 = vector.broadcast %cst_106 : f32 to vector<128x1xf32>
    %168 = arith.divf %166, %167 : vector<128x1xf32>
    %169 = math.sqrt %168 : vector<128x1xf32>
    %cst_107 = arith.constant 1.000000e-03 : f32
    %170 = vector.broadcast %cst_107 : f32 to vector<128x1xf32>
    %171 = arith.addf %169, %170 : vector<128x1xf32>
    %172 = tpu.reciprocal %171 : vector<128x1xf32> -> vector<128x1xf32>
    %173 = vector.broadcast %172 : vector<128x1xf32> to vector<128x128xf32>
    %174 = arith.mulf %163, %173 : vector<128x128xf32>
    %c0_108 = arith.constant 0 : index
    %c0_109 = arith.constant 0 : index
    %175 = vector.load %arg7[%c0_108, %c0_109] : memref<1x128xf32, #tpu.memory_space<vmem>>, vector<1x128xf32>
    %176 = vector.broadcast %175 : vector<1x128xf32> to vector<128x128xf32>
    %177 = arith.mulf %174, %176 : vector<128x128xf32>
    %c0_110 = arith.constant 0 : index
    %c0_111 = arith.constant 0 : index
    %178 = vector.load %arg8[%c0_110, %c0_111] : memref<1x128xf32, #tpu.memory_space<vmem>>, vector<1x128xf32>
    %179 = vector.broadcast %178 : vector<1x128xf32> to vector<128x128xf32>
    %180 = arith.addf %177, %179 : vector<128x128xf32>
    %181 = tpu.iota {dimensions = array<i32: 0>} : vector<128x1xi32>
    %182 = vector.broadcast %1 : i32 to vector<128x1xi32>
    %183 = arith.cmpi slt, %181, %182 : vector<128x1xi32>
    %cst_112 = arith.constant 0.000000e+00 : f32
    %184 = vector.shape_cast %183 : vector<128x1xi1> to vector<128x1xi1>
    %185 = vector.broadcast %184 : vector<128x1xi1> to vector<128x128xi1>
    %186 = vector.broadcast %cst_112 : f32 to vector<128x128xf32>
    %187 = arith.select %185, %180, %186 : vector<128x128xi1>, vector<128x128xf32>
    %c0_113 = arith.constant 0 : index
    %c0_114 = arith.constant 0 : index
    %c0_115 = arith.constant 0 : index
    %188 = vector.load %arg9[%c0_113, %c0_114, %c0_115] : memref<1x128x128xf32, #tpu.memory_space<vmem>>, vector<1x128x128xf32>
    %189 = vector.shape_cast %188 : vector<1x128x128xf32> to vector<128x128xf32>
    %190 = vector.shape_cast %187 : vector<128x128xf32> to vector<1x128x128xf32>
    tpu.vector_store %arg9[%c0_113, %c0_114, %c0_115], %190 {strides = array<i32>} : memref<1x128x128xf32, #tpu.memory_space<vmem>>, vector<1x128x128xf32>,
    return
  }
  func.func @transform_0(%arg0: i32, %arg1: memref<2xi32, #tpu.memory_space<smem>>) -> (i32, i32, i32) {
    %c0_i32 = arith.constant 0 : i32
    %c0_i32_0 = arith.constant 0 : i32
    %c0_i32_1 = arith.constant 0 : i32
    return %arg0, %c0_i32, %c0_i32_0 : i32, i32, i32
  }
  func.func @transform_1(%arg0: i32, %arg1: memref<2xi32, #tpu.memory_space<smem>>) -> (i32, i32, i32) {
    %c0_i32 = arith.constant 0 : i32
    %c0_i32_0 = arith.constant 0 : i32
    %c0_i32_1 = arith.constant 0 : i32
    %c0_i32_2 = arith.constant 0 : i32
    return %c0_i32, %c0_i32_0, %c0_i32_1 : i32, i32, i32
  }
  func.func @transform_2(%arg0: i32, %arg1: memref<2xi32, #tpu.memory_space<smem>>) -> (i32, i32, i32) {
    %c0_i32 = arith.constant 0 : i32
    %c0_i32_0 = arith.constant 0 : i32
    %c0_i32_1 = arith.constant 0 : i32
    %c0_i32_2 = arith.constant 0 : i32
    return %c0_i32, %c0_i32_0, %c0_i32_1 : i32, i32, i32
  }
  func.func @transform_3(%arg0: i32, %arg1: memref<2xi32, #tpu.memory_space<smem>>) -> (i32, i32, i32) {
    %c0_i32 = arith.constant 0 : i32
    %c0_i32_0 = arith.constant 0 : i32
    %c0_i32_1 = arith.constant 0 : i32
    %c0_i32_2 = arith.constant 0 : i32
    return %c0_i32, %c0_i32_0, %c0_i32_1 : i32, i32, i32
  }
  func.func @transform_4(%arg0: i32, %arg1: memref<2xi32, #tpu.memory_space<smem>>) -> (i32, i32, i32) {
    %c0_i32 = arith.constant 0 : i32
    %c0_i32_0 = arith.constant 0 : i32
    %c0_i32_1 = arith.constant 0 : i32
    %c0_i32_2 = arith.constant 0 : i32
    return %c0_i32, %c0_i32_0, %c0_i32_1 : i32, i32, i32
  }
  func.func @transform_5(%arg0: i32, %arg1: memref<2xi32, #tpu.memory_space<smem>>) -> (i32, i32) {
    %c0_i32 = arith.constant 0 : i32
    %c0_i32_0 = arith.constant 0 : i32
    %c0_i32_1 = arith.constant 0 : i32
    return %c0_i32, %c0_i32_0 : i32, i32
  }
  func.func @transform_6(%arg0: i32, %arg1: memref<2xi32, #tpu.memory_space<smem>>) -> (i32, i32) {
    %c0_i32 = arith.constant 0 : i32
    %c0_i32_0 = arith.constant 0 : i32
    %c0_i32_1 = arith.constant 0 : i32
    return %c0_i32, %c0_i32_0 : i32, i32
  }
  func.func @transform_7(%arg0: i32, %arg1: memref<2xi32, #tpu.memory_space<smem>>) -> (i32, i32, i32) {
    %c0_i32 = arith.constant 0 : i32
    %c0_i32_0 = arith.constant 0 : i32
    %c0_i32_1 = arith.constant 0 : i32
    return %arg0, %c0_i32, %c0_i32_0 : i32, i32, i32
  }
  func.func @transform_8(%arg0: i32, %arg1: memref<2xi32, #tpu.memory_space<smem>>) -> (i32, i32, i32, i32) {
    %c0_i32 = arith.constant 0 : i32
    %c0_i32_0 = arith.constant 0 : i32
    %c0_i32_1 = arith.constant 0 : i32
    %c0_i32_2 = arith.constant 0 : i32
    return %arg0, %c0_i32, %c0_i32_0, %c0_i32_1 : i32, i32, i32, i32
  }
}

</mosaic_0001>

<bundles_post_ra>
// kernel: tpu_custom_call.1
= control target key start
LH: loop header
LB: loop body
LE: loop exit
PB: predicated region body
PF: predicated region fallthrough
CT: control target
= control target key end

     0   :  { %s9726_s0 = inlined_call_operand.vmem [shape: s32[2], index: 0, kind: input, shape index: {}]   ;;  %s9727_s1 = inlined_call_operand.vmem [shape: f32[2,128,128], index: 1, kind: input, shape index: {}]   ;;  %s9728_s2 = inlined_call_operand.vmem [shape: bf16[4,128,32], index: 2, kind: input, shape index: {}]   ;;  %s9729_s3 = inlined_call_operand.vmem [shape: bf16[4,128,32], index: 3, kind: input, shape index: {}]   ;;  %s9730_s4 = inlined_call_operand.vmem [shape: bf16[4,128,32], index: 4, kind: input, shape index: {}]   ;;  %s9731_s5 = inlined_call_operand.vmem [shape: bf16[4,32,128], index: 5, kind: input, shape index: {}]   ;;  %s9732_s6 = inlined_call_operand.vmem [shape: f32[1,128], index: 6, kind: input, shape index: {}]   ;;  %s9733_s7 = inlined_call_operand.vmem [shape: f32[1,128], index: 7, kind: input, shape index: {}]   ;;  %s9734_s8 = inlined_call_operand.hbm [shape: f32[2,128,128], index: 8, kind: output, shape index: {0}]   ;;  %s9735_s9 = inlined_call_operand.hbm [shape: f32[2,4,128,128], index: 9, kind: output, shape index: {1}]  }
   0x1   :  { %s15_s11 = sshll.u32 %s9726_s0, 4  ;;  %s16_s11 = int_to_ptr.vmem [resolvable:$true] %s15_s11 }
   0x2   :  { %s7394_s12 = scalar_lea.vmem %s16_s11, 16  ;;  %p7399_p1 = scmp.lt.s32.totalorder %s16_s11, %s16_s11 }
   0x3   :  { %p7395_p0 = scmp.ne.s32.totalorder %s16_s11, %s7394_s12  ;;  %p7400_p2 = scmp.lt.s32.totalorder %s7394_s12, %s7394_s12 }
   0x5   :  { %p7401_p3 = por %p7400_p2, %p7399_p1 }
   0x7   :  { %p7402_p4 = pnand %p7401_p3, %p7395_p0 }
   0x9   :  { %7405 = shalt.err (!%p7402_p4)  }
   0xa   :  { %s7504_s13 = smov [#allocation3]  }
   0xb   :  { %18 = dma.vmem_to_smem %s16_s11, 16, %s7504_s13, [#allocation2] }
   0xc   :  { %7478 = dma.done.wait [#allocation2], 16 }
   0xd   :  { %7479 = vsyncadd [#allocation2], 4294967280 }
   0xe   :  { %20 = sfence }
   0xf   :  { %21 = vsyncpa [#allocation5], 0 }
  0x10   :  { %23 = vsyncpa [#allocation5 + $0x1], 0 }
  0x11   :  { %24 = vsyncpa [#allocation7], 0 }
  0x12   :  { %26 = vsyncpa [#allocation7 + $0x1], 0  ;;  %s7562_s14 = smov 0   ;;  %s7564_s0 = smov 0  }
  0x13   :  { %s7566_s15 = smov 0   ;;  %s7568_s16 = smov 0  }
  0x14 LB: > { %s7583_s17 = sadd.s32 4294967295, %s7502_s16   ;;  %s5354_s18 = sadd.s32 4294967294, %s7502_s16   ;;  %s7502_s16 = sphi %s7568_s16, %s9786_s16   ;;  %s7498_s15 = sphi %s7566_s15, %s9785_s15   ;;  %s7494_s0 = sphi %s7564_s0, %s9784_s0   ;;  %s7490_s14 = sphi %s7562_s14, %s9783_s14  }
  0x15   : > { %s7587_s19 = sadd.s32 1, %s7502_s16   ;;  %s191_s20 = sadd.s32 1, %s7498_s15 }
  0x16   : > { %s188_s21 = ssub.s32 %s7502_s16, %s7587_s19  ;;  %p201_p5 = scmp.ne.s32.totalorder %s7498_s15, %s7494_s0 }
  0x17   : > { %p189_p6 = scmp.eq.s32.totalorder %s188_s21, 0  ;;  %p202_p7 = scmp.eq.s32.totalorder %s7583_s17, 1 }
  0x18   : > { %p207_p8 = scmp.ne.s32.totalorder %s7494_s0, %s7490_s14  ;;  %p208_p9 = scmp.eq.s32.totalorder %s5354_s18, 1 }
  0x19   : > { %s7598_s22 = scalar_select %p189_p6, %s7498_s15, %s191_s20  }
  0x1a   : > { %p7600_p10 = por %p202_p7, %p201_p5  ;;  %p7604_p11 = por %p208_p9, %p207_p8 }
  0x1b   : > { %p5357_p12 = scmp.ge.s32.totalorder %s7502_s16, 1  ;;  %p278_p13 = scmp.lt.s32.totalorder %s7502_s16, 3 }
  0x1d   : > { %p279_p0 = pnand %p5357_p12, %p278_p13 }
  0x1f   : > { %282 = sbr.rel (%p279_p0) target bundleno = 4130 (0x1022), region = 48 }
  0x26   : > { %v6954_v0 = vld [vmem:[%s9728_s2] sm:$0xff]   ;;  %p317_p1 = scmp.lt.s32.totalorder %s7583_s17, 1  ;;  %v6955_v1 = vld [vmem:[%s9728_s2 + $0x8] sm:$0xff]   ;;  %v6956_v2 = vld [vmem:[%s9728_s2 + $0x10] sm:$0xff]   ;;  %vm851_vm0 = vcmask 261120   ;;  %s7994_s21 = sand.u32 1, %s7494_s0  }
  0x27   : > { %6107 = vmatprep.subr.bf16.mxu1 %v6954_v0  ;;  %v6957_v3 = vld [vmem:[%s9728_s2 + $0x18] sm:$0xff]   ;;  %v6958_v7 = vld [vmem:[%s9728_s2 + $0x20] sm:$0xff]   ;;  %v6959_v8 = vld [vmem:[%s9728_s2 + $0x28] sm:$0xff]   ;;  %s5359_s25 = sshll.u32 %s7994_s21, 9  ;;  %s5231_s12 = scalar_lea.sflag [#allocation7], %s7994_s21 }
  0x28   : > { %s318_s29 = scalar_select %p317_p1, %s7583_s17, 1  ;;  %6108 = vmatpush3.bf16.msra.mxu1 %v6954_v0  ;;  %v6960_v9 = vld [vmem:[%s9728_s2 + $0x30] sm:$0xff]   ;;  %v6961_v10 = vld [vmem:[%s9728_s2 + $0x38] sm:$0xff]   ;;  %v6962_v13 = vld [vmem:[%s9729_s3] sm:$0xff]  }
  0x29   : > { %6109 = vmatprep.subr.bf16.mxu1 %v6955_v1  ;;  %v6963_v17 = vld [vmem:[%s9729_s3 + $0x8] sm:$0xff]   ;;  %v6964_v21 = vld [vmem:[%s9729_s3 + $0x10] sm:$0xff]   ;;  %v6965_v25 = vld [vmem:[%s9729_s3 + $0x18] sm:$0xff]   ;;  %s7998_s26 = scalar_lea.vmem [#allocation6], %s5359_s25  ;;  %s7505_s20 = smov [#allocation6]  }
  0x2a   : > { %s5744_s11 = sshll.u32 %s318_s29, 7  ;;  %v6966_v29 = vld [vmem:[%s9729_s3 + $0x20] sm:$0xff]   ;;  %v6967_v33 = vld [vmem:[%s9729_s3 + $0x28] sm:$0xff]   ;;  %v6968_v37 = vld [vmem:[%s9729_s3 + $0x30] sm:$0xff]   ;;  %s323_s29 = sld [smem:[#allocation3 + %s7583_s17]] }
  0x2b   : > { %s7624_s18 = scalar_lea.vmem %s9727_s1, %s5744_s11  ;;  %v6969_v39 = vld [vmem:[%s9729_s3 + $0x38] sm:$0xff]   ;;  %s5260_s11 = sshll.u32 %s7998_s26, 4  ;;  %s9314_s11 = int_to_ptr.vmem [resolvable:$true] %s5260_s11 }
  0x2c   : > { %6110 = vmatpush3.bf16.msra.mxu1 %v6955_v1  ;;  %v324_v4 = vld [vmem:[%s7624_s18] sm:$0xff]  ;;  %v325_v5 = vld [vmem:[%s7624_s18 + $0x8] sm:$0xff]  ;;  %v326_v11 = vld [vmem:[%s7624_s18 + $0x10] sm:$0xff]  ;;  %s7406_s13 = scalar_lea.vmem %s9314_s11, 8192  ;;  %s7410_s25 = sshll.u32 %s7505_s20, 4  ;;  %s7411_s25 = int_to_ptr.vmem [resolvable:$false] %s7410_s25 }
  0x2d   : > { %6111 = vmatprep.subr.bf16.mxu1 %v6956_v2  ;;  %v7631_v6 = vpack.c.bf16 %v325_v5, %v324_v4  ;;  %v327_v12 = vld [vmem:[%s7624_s18 + $0x18] sm:$0xff]  ;;  %v328_v14 = vld [vmem:[%s7624_s18 + $0x20] sm:$0xff]  ;;  %v329_v15 = vld [vmem:[%s7624_s18 + $0x28] sm:$0xff]  ;;  %p7407_p2 = scmp.ne.s32.totalorder %s9314_s11, %s7406_s13  ;;  %s7412_s27 = scalar_lea.vmem %s7411_s25, 16384 }
  0x2e   : > { %v7654_v16 = vpack.c.bf16 %v327_v12, %v326_v11  ;;  %v7659_v18 = vpack.c.bf16 %v329_v15, %v328_v14  ;;  %v330_v19 = vld [vmem:[%s7624_s18 + $0x30] sm:$0xff]  ;;  %v331_v20 = vld [vmem:[%s7624_s18 + $0x38] sm:$0xff]  ;;  %v332_v22 = vld [vmem:[%s7624_s18 + $0x40] sm:$0xff]  ;;  %p7413_p5 = scmp.lt.s32.totalorder %s9314_s11, %s7411_s25  ;;  %p7414_p6 = scmp.lt.s32.totalorder %s7412_s27, %s7406_s13 }
  0x2f   : > { %6123 = vmatprep.mubr.bf16.mxu1 %v7631_v6  ;;  %6187 = vmatprep.mubr.bf16.mxu0 %v7631_v6  ;;  %v333_v23 = vld [vmem:[%s7624_s18 + $0x48] sm:$0xff]  ;;  %v7670_v24 = vpack.c.bf16 %v331_v20, %v330_v19  ;;  %v334_v27 = vld [vmem:[%s7624_s18 + $0x50] sm:$0xff]  ;;  %v335_v28 = vld [vmem:[%s7624_s18 + $0x58] sm:$0xff]  ;;  %p7408_p3 = pnand %p7407_p2, %p7600_p10 }
  0x30   : > { %6112 = vmatpush3.bf16.msra.mxu1 %v6956_v2  ;;  %9753 = vst [vmem:[#allocation11_spill] sm:$0xff] %v7659_v18  ;;  %v7675_v26 = vpack.c.bf16 %v333_v23, %v332_v22  ;;  %v336_v30 = vld [vmem:[%s7624_s18 + $0x60] sm:$0xff]  ;;  %v337_v31 = vld [vmem:[%s7624_s18 + $0x68] sm:$0xff]  ;;  %v7686_v32 = vpack.c.bf16 %v335_v28, %v334_v27  ;;  %v338_v35 = vld [vmem:[%s7624_s18 + $0x70] sm:$0xff]  ;;  %p7415_p7 = por %p7414_p6, %p7413_p5 }
  0x31   : > { %6113 = vmatprep.subr.bf16.mxu1 %v6957_v3  ;;  %9754 = vst [vmem:[#allocation12_spill] sm:$0xff] %v7670_v24  ;;  %v7691_v34 = vpack.c.bf16 %v337_v31, %v336_v30  ;;  %v339_v36 = vld [vmem:[%s7624_s18 + $0x78] sm:$0xff]  ;;  %p7409_p4 = pneg %p7408_p3 }
  0x32   : > { %9755 = vst [vmem:[#allocation13_spill] sm:$0xff] %v7675_v26  ;;  %9756 = vst [vmem:[#allocation14_spill] sm:$0xff] %v7686_v32  ;;  %v7700_v38 = vpack.c.bf16 %v339_v36, %v338_v35 }
  0x33   : > { %9757 = vst [vmem:[#allocation15_spill] sm:$0xff] %v7691_v34  ;;  %p7416_p8 = pnand %p7415_p7, %p7409_p4 }
  0x34   : > { %6114 = vmatpush3.bf16.msra.mxu1 %v6957_v3  ;;  %9758 = vst [vmem:[#allocation16_spill] sm:$0xff] %v7700_v38 }
  0x35   : > { %6115 = vmatprep.subr.bf16.mxu1 %v6958_v7 }
  0x38   : > { %6116 = vmatpush3.bf16.msra.mxu1 %v6958_v7 }
  0x39   : > { %6117 = vmatprep.subr.bf16.mxu1 %v6959_v8 }
  0x3c   : > { %6118 = vmatpush3.bf16.msra.mxu1 %v6959_v8 }
  0x3d   : > { %6119 = vmatprep.subr.bf16.mxu1 %v6960_v9 }
  0x40   : > { %6120 = vmatpush3.bf16.msra.mxu1 %v6960_v9 }
  0x41   : > { %6121 = vmatprep.subr.bf16.mxu1 %v6961_v10 }
  0x44   : > { %6122 = vmatpush3.bf16.msra.mxu1 %v6961_v10 }
  0x45   : > { %6139 = vmatprep.subr.bf16.mxu1 %v6962_v13 }
  0x47   : > { %6124 = vmatmul.mubr.bf16.vlgmr.msra.gmra.mrb[0].mxu1 %v7654_v16 }
  0x48   : > { %6140 = vmatpush3.bf16.msra.mxu1 %v6962_v13  ;;  %6127 = vmatprep.mubr.bf16.mxu1 %v7659_v18 }
  0x49   : > { %6141 = vmatprep.subr.bf16.mxu1 %v6963_v17 }
  0x4c   : > { %6142 = vmatpush3.bf16.msra.mxu1 %v6963_v17 }
  0x4d   : > { %6143 = vmatprep.subr.bf16.mxu1 %v6964_v21 }
  0x4f   : > { %6128 = vmatmul.mubr.bf16.gmra.mrb[4].mxu1 %v7670_v24 }
  0x50   : > { %6144 = vmatpush3.bf16.msra.mxu1 %v6964_v21  ;;  %6131 = vmatprep.mubr.bf16.mxu1 %v7675_v26 }
  0x51   : > { %6145 = vmatprep.subr.bf16.mxu1 %v6965_v25 }
  0x54   : > { %6146 = vmatpush3.bf16.msra.mxu1 %v6965_v25 }
  0x55   : > { %6147 = vmatprep.subr.bf16.mxu1 %v6966_v29 }
  0x57   : > { %6132 = vmatmul.mubr.bf16.gmra.mrb[8].mxu1 %v7686_v32 }
  0x58   : > { %6148 = vmatpush3.bf16.msra.mxu1 %v6966_v29  ;;  %6135 = vmatprep.mubr.bf16.mxu1 %v7691_v34 }
  0x59   : > { %6149 = vmatprep.subr.bf16.mxu1 %v6967_v33 }
  0x5c   : > { %6150 = vmatpush3.bf16.msra.mxu1 %v6967_v33 }
  0x5d   : > { %6151 = vmatprep.subr.bf16.mxu1 %v6968_v37 }
  0x5f   : > { %6136 = vmatmul.mubr.bf16.gmra.mrb[12].mxu1 %v7700_v38 }
  0x60   : > { %6152 = vmatpush3.bf16.msra.mxu1 %v6968_v37  ;;  %6155 = vmatprep.mubr.bf16.mxu1 %v7631_v6 }
  0x61   : > { %6153 = vmatprep.subr.bf16.mxu1 %v6969_v39 }
  0x64   : > { %6154 = vmatpush3.bf16.msra.mxu1 %v6969_v39 }
  0x67   : > { %6156 = vmatmul.mubr.bf16.vlgmr.msra.gmra.mrb[16].mxu1 %v7654_v16 }
  0x68   : > { %6159 = vmatprep.mubr.bf16.mxu1 %v7659_v18 }
  0x6f   : > { %6160 = vmatmul.mubr.bf16.gmra.mrb[20].mxu1 %v7670_v24 }
  0x70   : > { %6163 = vmatprep.mubr.bf16.mxu1 %v7675_v26 }
  0x77   : > { %6164 = vmatmul.mubr.bf16.gmra.mrb[24].mxu1 %v7686_v32 }
  0x78   : > { %6167 = vmatprep.mubr.bf16.mxu1 %v7691_v34 }
  0x7f   : > { %6168 = vmatmul.mubr.bf16.gmra.mrb[28].mxu1 %v7700_v38 }
 0x11a   : > { %v7714_v40 = vpop.f32.mrb[0].mxu1 }
 0x11b   : > { %v450_v41 = vpop.f32.mrb[1].mxu1 }
 0x11c   : > { %v7716_v42 = vpop.f32.mrb[2].mxu1 }
 0x11d   : > { %v836_v43 = vpack.c.bf16 %v7716_v42, %v7714_v40  ;;  %v453_v44 = vpop.f32.mrb[3].mxu1  ;;  %v6970_v40 = vld [vmem:[%s9730_s4] sm:$0xff]   ;;  %v6972_v42 = vld [vmem:[%s9730_s4 + $0x10] sm:$0xff]  }
 0x11e   : > { %v835_v45 = vpack.c.bf16 %v453_v44, %v450_v41  ;;  %v6971_v41 = vld [vmem:[%s9730_s4 + $0x8] sm:$0xff]   ;;  %6171 = vmatprep.subr.bf16.mxu0 %v6970_v40  ;;  %v6974_v44 = vld [vmem:[%s9730_s4 + $0x20] sm:$0xff]  }
 0x11f   : > { %6172 = vmatpush3.bf16.msra.mxu0 %v6970_v40 }
 0x120   : > { %6219 = vmatprep.mubr.msk.bf16.mxu1 %vm851_vm0, %v835_v45  ;;  %6173 = vmatprep.subr.bf16.mxu0 %v6971_v41  ;;  %v6975_v45 = vld [vmem:[%s9730_s4 + $0x28] sm:$0xff]  }
 0x122   : > { %v7721_v46 = vpop.f32.mrb[4].mxu1 }
 0x123   : > { %v7723_v47 = vpop.f32.mrb[5].mxu1  ;;  %6174 = vmatpush3.bf16.msra.mxu0 %v6971_v41 }
 0x124   : > { %v7725_v48 = vpop.f32.mrb[6].mxu1  ;;  %6175 = vmatprep.subr.bf16.mxu0 %v6972_v42 }
 0x125   : > { %v838_v49 = vpack.c.bf16 %v7725_v48, %v7721_v46  ;;  %v7729_v50 = vpop.f32.mrb[7].mxu1  ;;  %v6976_v46 = vld [vmem:[%s9730_s4 + $0x30] sm:$0xff]   ;;  %v9736_v48 = vlaneseq }
 0x126   : > { %v837_v51 = vpack.c.bf16 %v7729_v50, %v7723_v47  ;;  %v6977_v47 = vld [vmem:[%s9730_s4 + $0x38] sm:$0xff]   ;;  %v7805_v50 = vstv %s323_s29 }
 0x127   : > { %6176 = vmatpush3.bf16.msra.mxu0 %v6972_v42  ;;  %9759 = vst [vmem:[#allocation17_spill] sm:$0xff] %v7805_v50 }
 0x12a   : > { %v7733_v52 = vpop.f32.mrb[8].mxu1 }
 0x12b   : > { %v7735_v53 = vpop.f32.mrb[9].mxu1 }
 0x12c   : > { %v7737_v54 = vpop.f32.mrb[10].mxu1 }
 0x12d   : > { %v840_v55 = vpack.c.bf16 %v7737_v54, %v7733_v52  ;;  %v485_v56 = vpop.f32.mrb[11].mxu1 }
 0x12e   : > { %v839_v57 = vpack.c.bf16 %v485_v56, %v7735_v53 }
 0x132   : > { %v6137_v58 = vpop.f32.mrb[12].mxu1 }
 0x133   : > { %v498_v59 = vpop.f32.mrb[13].mxu1 }
 0x134   : > { %v6138_v60 = vpop.f32.mrb[14].mxu1 }
 0x135   : > { %v842_v61 = vpack.c.bf16 %v6138_v60, %v6137_v58  ;;  %v501_v62 = vpop.f32.mrb[15].mxu1 }
 0x136   : > { %v841_v63 = vpack.c.bf16 %v501_v62, %v498_v59 }
 0x13a   : > { %v6157_v0 = vpop.f32.mrb[16].mxu1 }
 0x13b   : > { %v611_v1 = vpop.f32.mrb[17].mxu1 }
 0x13c   : > { %v6158_v2 = vpop.f32.mrb[18].mxu1 }
 0x13d   : > { %v844_v3 = vpack.c.bf16 %v6158_v2, %v6157_v0  ;;  %v614_v4 = vpop.f32.mrb[19].mxu1 }
 0x13e   : > { %v843_v5 = vpack.c.bf16 %v614_v4, %v611_v1 }
 0x13f   : > { %v880_v14 = vsel %vm851_vm0, %v844_v3, 0 }
 0x140   : > { %v877_v7 = vsel %vm851_vm0, %v843_v5, 0  ;;  %6875 = vmatprep.subr.msk.bf16.mxu1 %vm851_vm0, %v843_v5 }
 0x141   : > { %6204 = vmatpush3.bf16.xpose.msra.mxu1 %v877_v7 }
 0x142   : > { %6876 = vmatprep.subr.msk.bf16.mxu1 %vm851_vm0, %v844_v3  ;;  %v6161_v8 = vpop.f32.mrb[20].mxu1 }
 0x143   : > { %v627_v9 = vpop.f32.mrb[21].mxu1 }
 0x144   : > { %v6162_v10 = vpop.f32.mrb[22].mxu1 }
 0x145   : > { %v846_v11 = vpack.c.bf16 %v6162_v10, %v6161_v8  ;;  %v630_v12 = vpop.f32.mrb[23].mxu1 }
 0x146   : > { %v845_v13 = vpack.c.bf16 %v630_v12, %v627_v9 }
 0x147   : > { %v886_v33 = vsel %vm851_vm0, %v846_v11, 0 }
 0x148   : > { %v883_v23 = vsel %vm851_vm0, %v845_v13, 0 }
 0x149   : > { %6206 = vmatpush3.bf16.xpose.msra.mxu1 %v880_v14 }
 0x14a   : > { %6877 = vmatprep.subr.msk.bf16.mxu1 %vm851_vm0, %v845_v13  ;;  %v6165_v15 = vpop.f32.mrb[24].mxu1 }
 0x14b   : > { %v643_v17 = vpop.f32.mrb[25].mxu1 }
 0x14c   : > { %v6166_v19 = vpop.f32.mrb[26].mxu1 }
 0x14d   : > { %v848_v20 = vpack.c.bf16 %v6166_v19, %v6165_v15  ;;  %v646_v21 = vpop.f32.mrb[27].mxu1 }
 0x14e   : > { %v847_v22 = vpack.c.bf16 %v646_v21, %v643_v17 }
 0x14f   : > { %v892_v36 = vsel %vm851_vm0, %v848_v20, 0 }
 0x150   : > { %v889_v35 = vsel %vm851_vm0, %v847_v22, 0 }
 0x151   : > { %6208 = vmatpush3.bf16.xpose.msra.mxu1 %v883_v23 }
 0x152   : > { %6878 = vmatprep.subr.msk.bf16.mxu1 %vm851_vm0, %v846_v11  ;;  %v6169_v25 = vpop.f32.mrb[28].mxu1 }
 0x153   : > { %v659_v27 = vpop.f32.mrb[29].mxu1 }
 0x154   : > { %v6170_v28 = vpop.f32.mrb[30].mxu1 }
 0x155   : > { %v850_v29 = vpack.c.bf16 %v6170_v28, %v6169_v25  ;;  %v662_v30 = vpop.f32.mrb[31].mxu1 }
 0x156   : > { %v849_v31 = vpack.c.bf16 %v662_v30, %v659_v27 }
 0x157   : > { %v898_v39 = vsel %vm851_vm0, %v850_v29, 0 }
 0x158   : > { %v895_v37 = vsel %vm851_vm0, %v849_v31, 0 }
 0x159   : > { %6210 = vmatpush3.bf16.xpose.msra.mxu1 %v886_v33 }
 0x15a   : > { %6879 = vmatprep.subr.msk.bf16.mxu1 %vm851_vm0, %v847_v22 }
 0x161   : > { %6212 = vmatpush3.bf16.xpose.msra.mxu1 %v889_v35 }
 0x162   : > { %6880 = vmatprep.subr.msk.bf16.mxu1 %vm851_vm0, %v848_v20 }
 0x169   : > { %6214 = vmatpush3.bf16.xpose.msra.mxu1 %v892_v36 }
 0x16a   : > { %6881 = vmatprep.subr.msk.bf16.mxu1 %vm851_vm0, %v849_v31 }
 0x171   : > { %6216 = vmatpush3.bf16.xpose.msra.mxu1 %v895_v37 }
 0x172   : > { %6882 = vmatprep.subr.msk.bf16.mxu1 %vm851_vm0, %v850_v29 }
 0x179   : > { %6218 = vmatpush3.bf16.xpose.msra.mxu1 %v898_v39 }
 0x180   : > { %6220 = vmatmul.mubr.msk.bf16.vlgmr.msra.gmra.mrb[32].mxu1 %vm851_vm0, %v836_v43  ;;  %v6973_v43 = vld [vmem:[%s9730_s4 + $0x18] sm:$0xff]  }
 0x181   : > { %6223 = vmatprep.mubr.msk.bf16.mxu1 %vm851_vm0, %v837_v51  ;;  %6177 = vmatprep.subr.bf16.mxu0 %v6973_v43 }
 0x182   : > { %6178 = vmatpush3.bf16.msra.mxu0 %v6973_v43 }
 0x183   : > { %6179 = vmatprep.subr.bf16.mxu0 %v6974_v44 }
 0x186   : > { %6180 = vmatpush3.bf16.msra.mxu0 %v6974_v44  ;;  %v6978_v44 = vld [vmem:[%s9729_s3 + $0x40] sm:$0xff]  }
 0x187   : > { %6181 = vmatprep.subr.bf16.mxu0 %v6975_v45  ;;  %6299 = vmatprep.subr.bf16.mxu1 %v6978_v44 }
 0x188   : > { %6224 = vmatmul.mubr.msk.bf16.gmra.mrb[36].mxu1 %vm851_vm0, %v838_v49  ;;  %v349_v49 = vand.u32 127, %v9736_v48 }
 0x189   : > { %6227 = vmatprep.mubr.msk.bf16.mxu1 %vm851_vm0, %v839_v57  ;;  %6300 = vmatpush3.bf16.msra.mxu1 %v6978_v44 }
 0x18a   : > { %6182 = vmatpush3.bf16.msra.mxu0 %v6975_v45  ;;  %vm7808_vm1 = vcmp.lt.s32.totalorder %v349_v49, %v7805_v50  ;;  %v6979_v45 = vld [vmem:[%s9729_s3 + $0x48] sm:$0xff]   ;;  %v6982_v49 = vld [vmem:[%s9729_s3 + $0x60] sm:$0xff]  }
 0x18b   : > { %6183 = vmatprep.subr.bf16.mxu0 %v6976_v46  ;;  %6301 = vmatprep.subr.bf16.mxu1 %v6979_v45 }
 0x18d   : > { %6302 = vmatpush3.bf16.msra.mxu1 %v6979_v45 }
 0x18e   : > { %6184 = vmatpush3.bf16.msra.mxu0 %v6976_v46  ;;  %v6980_v46 = vld [vmem:[%s9729_s3 + $0x50] sm:$0xff]  }
 0x18f   : > { %6185 = vmatprep.subr.bf16.mxu0 %v6977_v47  ;;  %6303 = vmatprep.subr.bf16.mxu1 %v6980_v46 }
 0x190   : > { %6228 = vmatmul.mubr.msk.bf16.gmra.mrb[40].mxu1 %vm851_vm0, %v840_v55 }
 0x191   : > { %6231 = vmatprep.mubr.msk.bf16.mxu1 %vm851_vm0, %v841_v63  ;;  %6304 = vmatpush3.bf16.msra.mxu1 %v6980_v46 }
 0x192   : > { %6186 = vmatpush3.bf16.msra.mxu0 %v6977_v47  ;;  %v6981_v47 = vld [vmem:[%s9729_s3 + $0x58] sm:$0xff]  }
 0x193   : > { %6305 = vmatprep.subr.bf16.mxu1 %v6981_v47 }
 0x195   : > { %6188 = vmatmul.mubr.bf16.vlgmr.msra.gmra.mrb[0].mxu0 %v7654_v16  ;;  %6306 = vmatpush3.bf16.msra.mxu1 %v6981_v47 }
 0x196   : > { %6191 = vmatprep.mubr.bf16.mxu0 %v7659_v18  ;;  %6307 = vmatprep.subr.bf16.mxu1 %v6982_v49 }
 0x198   : > { %6232 = vmatmul.mubr.msk.bf16.gmra.mrb[44].mxu1 %vm851_vm0, %v842_v61 }
 0x199   : > { %6315 = vmatprep.mubr.bf16.mxu1 %v7631_v6  ;;  %6308 = vmatpush3.bf16.msra.mxu1 %v6982_v49 }
 0x19d   : > { %6192 = vmatmul.mubr.bf16.gmra.mrb[4].mxu0 %v7670_v24 }
 0x19e   : > { %6195 = vmatprep.mubr.bf16.mxu0 %v7675_v26 }
 0x1a5   : > { %6196 = vmatmul.mubr.bf16.gmra.mrb[8].mxu0 %v7686_v32 }
 0x1a6   : > { %6199 = vmatprep.mubr.bf16.mxu0 %v7691_v34 }
 0x1ad   : > { %6200 = vmatmul.mubr.bf16.gmra.mrb[12].mxu0 %v7700_v38 }
 0x253   : > { %v6221_v51 = vpop.f32.mrb[32].mxu1 }
 0x254   : > { %v999_v53 = vmul.f32 0.088388346, %v6221_v51  ;;  %v934_v54 = vpop.f32.mrb[33].mxu1  ;;  %v6983_v51 = vld [vmem:[%s9729_s3 + $0x68] sm:$0xff]  }
 0x255   : > { %v997_v55 = vmul.f32 0.088388346, %v934_v54  ;;  %v6222_v56 = vpop.f32.mrb[34].mxu1  ;;  %6309 = vmatprep.subr.bf16.mxu1 %v6983_v51  ;;  %v6985_v54 = vld [vmem:[%s9729_s3 + $0x78] sm:$0xff]  }
 0x256   : > { %v1000_v57 = vmul.f32 0.088388346, %v6222_v56  ;;  %v937_v58 = vpop.f32.mrb[35].mxu1  ;;  %v7814_v59 = vsel %vm7808_vm1, %v999_v53, -inf  ;;  %v6984_v53 = vld [vmem:[%s9729_s3 + $0x70] sm:$0xff]   ;;  %6310 = vmatpush3.bf16.msra.mxu1 %v6983_v51 }
 0x257   : > { %v998_v60 = vmul.f32 0.088388346, %v937_v58  ;;  %1033 = vmax.xlane.f32.xlu1 %v7814_v59  ;;  %v7819_v61 = vsel %vm7808_vm1, %v997_v55, -inf  ;;  %6311 = vmatprep.subr.bf16.mxu1 %v6984_v53 }
 0x258   : > { %1029 = vmax.xlane.f32.xlu0 %v7819_v61  ;;  %v7824_v62 = vsel %vm7808_vm1, %v1000_v57, -inf }
 0x259   : > { %v7829_v0 = vsel %vm7808_vm1, %v998_v60, -inf }
 0x25a   : > { %6312 = vmatpush3.bf16.msra.mxu1 %v6984_v53 }
 0x25b   : > { %1035 = vmax.xlane.f32.xlu1 %v7824_v62  ;;  %v6225_v63 = vpop.f32.mrb[36].mxu1  ;;  %6313 = vmatprep.subr.bf16.mxu1 %v6985_v54 }
 0x25c   : > { %1031 = vmax.xlane.f32.xlu0 %v7829_v0  ;;  %v950_v1 = vpop.f32.mrb[37].mxu1  ;;  %v1003_v5 = vmul.f32 0.088388346, %v6225_v63 }
 0x25d   : > { %v1001_v2 = vmul.f32 0.088388346, %v950_v1  ;;  %v6226_v3 = vpop.f32.mrb[38].mxu1 }
 0x25e   : > { %v953_v4 = vpop.f32.mrb[39].mxu1  ;;  %v1004_v9 = vmul.f32 0.088388346, %v6226_v3  ;;  %v7844_v12 = vsel %vm7808_vm1, %v1003_v5, -inf  ;;  %6314 = vmatpush3.bf16.msra.mxu1 %v6985_v54 }
 0x25f   : > { %v1002_v7 = vmul.f32 0.088388346, %v953_v4  ;;  %v7834_v8 = vsel %vm7808_vm1, %v1001_v2, -inf }
 0x260   : > { %1037 = vmax.xlane.f32.xlu0 %v7834_v8  ;;  %v7849_v17 = vsel %vm7808_vm1, %v1004_v9, -inf }
 0x261   : > { %v7839_v10 = vsel %vm7808_vm1, %v1002_v7, -inf  ;;  %6316 = vmatmul.mubr.bf16.vlgmr.msra.gmra.mrb[48].mxu1 %v7654_v16 }
 0x262   : > { %1039 = vmax.xlane.f32.xlu1 %v7839_v10  ;;  %6319 = vmatprep.mubr.bf16.mxu1 %v7659_v18 }
 0x263   : > { %v6229_v11 = vpop.f32.mrb[40].mxu1 }
 0x264   : > { %1041 = vmax.xlane.f32.xlu0 %v7844_v12  ;;  %v966_v13 = vpop.f32.mrb[41].mxu1  ;;  %v1007_v20 = vmul.f32 0.088388346, %v6229_v11 }
 0x265   : > { %v1005_v14 = vmul.f32 0.088388346, %v966_v13  ;;  %v6230_v15 = vpop.f32.mrb[42].mxu1 }
 0x266   : > { %1043 = vmax.xlane.f32.xlu1 %v7849_v17  ;;  %v969_v19 = vpop.f32.mrb[43].mxu1  ;;  %v1008_v23 = vmul.f32 0.088388346, %v6230_v15  ;;  %v7864_v28 = vsel %vm7808_vm1, %v1007_v20, -inf }
 0x267   : > { %v1006_v21 = vmul.f32 0.088388346, %v969_v19  ;;  %v7854_v22 = vsel %vm7808_vm1, %v1005_v14, -inf }
 0x268   : > { %1045 = vmax.xlane.f32.xlu0 %v7854_v22  ;;  %v7869_v33 = vsel %vm7808_vm1, %v1008_v23, -inf  ;;  %v6189_v5 = vpop.f32.mrb[0].mxu0 }
 0x269   : > { %v7859_v25 = vsel %vm7808_vm1, %v1006_v21, -inf  ;;  %6320 = vmatmul.mubr.bf16.gmra.mrb[52].mxu1 %v7670_v24  ;;  %v772_v9 = vpop.f32.mrb[1].mxu0 }
 0x26a   : > { %1047 = vmax.xlane.f32.xlu1 %v7859_v25  ;;  %6323 = vmatprep.mubr.bf16.mxu1 %v7675_v26  ;;  %v6190_v14 = vpop.f32.mrb[2].mxu0 }
 0x26b   : > { %v6233_v27 = vpop.f32.mrb[44].mxu1  ;;  %v775_v15 = vpop.f32.mrb[3].mxu0 }
 0x26c   : > { %1049 = vmax.xlane.f32.xlu0 %v7864_v28  ;;  %v982_v29 = vpop.f32.mrb[45].mxu1  ;;  %v1011_v36 = vmul.f32 0.088388346, %v6233_v27  ;;  %v1197_v20 = vpack.c.bf16 %v775_v15, %v772_v9 }
 0x26d   : > { %v1009_v30 = vmul.f32 0.088388346, %v982_v29  ;;  %v6234_v31 = vpop.f32.mrb[46].mxu1 }
 0x26e   : > { %1051 = vmax.xlane.f32.xlu1 %v7869_v33  ;;  %v985_v35 = vpop.f32.mrb[47].mxu1  ;;  %v1012_v40 = vmul.f32 0.088388346, %v6234_v31  ;;  %v7884_v42 = vsel %vm7808_vm1, %v1011_v36, -inf  ;;  %6235 = vmatprep.subr.bf16.mxu0 %v1197_v20 }
 0x26f   : > { %v1010_v37 = vmul.f32 0.088388346, %v985_v35  ;;  %v7874_v39 = vsel %vm7808_vm1, %v1009_v30, -inf  ;;  %6236 = vmatpush3.bf16.msra.mxu0 %v1197_v20 }
 0x270   : > { %1053 = vmax.xlane.f32.xlu0 %v7874_v39  ;;  %v7889_v43 = vsel %vm7808_vm1, %v1012_v40, -inf  ;;  %v6193_v30 = vpop.f32.mrb[4].mxu0 }
 0x271   : > { %v7879_v41 = vsel %vm7808_vm1, %v1010_v37, -inf  ;;  %6324 = vmatmul.mubr.bf16.gmra.mrb[56].mxu1 %v7686_v32  ;;  %v788_v36 = vpop.f32.mrb[5].mxu0 }
 0x272   : > { %1055 = vmax.xlane.f32.xlu1 %v7879_v41  ;;  %6327 = vmatprep.mubr.bf16.mxu1 %v7691_v34 }
 0x274   : > { %1057 = vmax.xlane.f32.xlu0 %v7884_v42 }
 0x276   : > { %1059 = vmax.xlane.f32.xlu1 %v7889_v43 }
 0x279   : > { %6328 = vmatmul.mubr.bf16.gmra.mrb[60].mxu1 %v7700_v38 }
 0x2e4   : > { %v1034_v55 = vpop.xlane.xlu1 %1033 }
 0x2e5   : > { %v1063_v56 = vsub.f32 %v7814_v59, %v1034_v55  ;;  %v1030_v57 = vpop.xlane.xlu0 %1029 }
 0x2e6   : > { %v1061_v58 = vsub.f32 %v7819_v61, %v1030_v57  ;;  %v1198_v61 = vpack.c.bf16 %v6190_v14, %v6189_v5 }
 0x2e7   : > { %v1081_v1 = vmul.f32 1.442695, %v1063_v56 }
 0x2e8   : > { %v1077_v60 = vmul.f32 1.442695, %v1061_v58  ;;  %v1036_v63 = vpop.xlane.xlu1 %1035  ;;  %6237 = vmatprep.subr.bf16.mxu0 %v1198_v61 }
 0x2e9   : > { %v1064_v2 = vsub.f32 %v7824_v62, %v1036_v63  ;;  %v1032_v3 = vpop.xlane.xlu0 %1031  ;;  %6238 = vmatpush3.bf16.msra.mxu0 %v1198_v61 }
 0x2ea   : > { %7058 = vpow2.f32 %v1077_v60  ;;  %v1062_v4 = vsub.f32 %v7829_v0, %v1032_v3 }
 0x2eb   : > { %7060 = vpow2.f32 %v1081_v1  ;;  %v1083_v11 = vmul.f32 1.442695, %v1064_v2 }
 0x2ec   : > { %v1079_v7 = vmul.f32 1.442695, %v1062_v4 }
 0x2ed   : > { %v1038_v13 = vpop.xlane.xlu0 %1037 }
 0x2ee   : > { %7062 = vpow2.f32 %v1079_v7  ;;  %v1065_v59 = vsub.f32 %v7834_v8, %v1038_v13 }
 0x2ef   : > { %v1040_v19 = vpop.xlane.xlu1 %1039  ;;  %7064 = vpow2.f32 %v1083_v11 }
 0x2f0   : > { %v1085_v21 = vmul.f32 1.442695, %v1065_v59  ;;  %v1066_v62 = vsub.f32 %v7839_v10, %v1040_v19  ;;  %v6194_v10 = vpop.f32.mrb[6].mxu0 }
 0x2f1   : > { %v1042_v23 = vpop.xlane.xlu0 %1041  ;;  %v791_v45 = vpop.f32.mrb[7].mxu0 }
 0x2f2   : > { %7066 = vpow2.f32 %v1085_v21  ;;  %v1087_v0 = vmul.f32 1.442695, %v1066_v62  ;;  %v1067_v27 = vsub.f32 %v7844_v12, %v1042_v23  ;;  %v1200_v12 = vpack.c.bf16 %v6194_v10, %v6193_v30  ;;  %v6197_v58 = vpop.f32.mrb[8].mxu0 }
 0x2f3   : > { %v1044_v29 = vpop.xlane.xlu1 %1043  ;;  %v1199_v49 = vpack.c.bf16 %v791_v45, %v788_v36  ;;  %v804_v1 = vpop.f32.mrb[9].mxu0 }
 0x2f4   : > { %v7930_v31 = vpop.eup %7058  ;;  %v1089_v8 = vmul.f32 1.442695, %v1067_v27  ;;  %v1068_v35 = vsub.f32 %v7849_v17, %v1044_v29  ;;  %7068 = vpow2.f32 %v1087_v0 }
 0x2f5   : > { %v1046_v37 = vpop.xlane.xlu0 %1045  ;;  %1109 = vadd.xlane.f32.xlu0 %v7930_v31  ;;  %v7935_v46 = vpop.eup %7060  ;;  %6239 = vmatprep.subr.bf16.mxu0 %v1199_v49 }
 0x2f6   : > { %7070 = vpow2.f32 %v1089_v8  ;;  %v1091_v40 = vmul.f32 1.442695, %v1068_v35  ;;  %v1069_v44 = vsub.f32 %v7854_v22, %v1046_v37  ;;  %6240 = vmatpush3.bf16.msra.mxu0 %v1199_v49 }
 0x2f7   : > { %v1048_v47 = vpop.xlane.xlu1 %1047  ;;  %6241 = vmatprep.subr.bf16.mxu0 %v1200_v12 }
 0x2f8   : > { %v7937_v51 = vpop.eup %7062  ;;  %v1093_v17 = vmul.f32 1.442695, %v1069_v44  ;;  %v1070_v53 = vsub.f32 %v7859_v25, %v1048_v47  ;;  %7072 = vpow2.f32 %v1091_v40 }
 0x2f9   : > { %v1050_v54 = vpop.xlane.xlu0 %1049  ;;  %1113 = vadd.xlane.f32.xlu0 %v7935_v46  ;;  %1111 = vadd.xlane.f32.xlu1 %v7937_v51  ;;  %v7943_v56 = vpop.eup %7064 }
 0x2fa   : > { %7074 = vpow2.f32 %v1093_v17  ;;  %v1095_v22 = vmul.f32 1.442695, %v1070_v53  ;;  %v1071_v55 = vsub.f32 %v7864_v28, %v1050_v54  ;;  %v6198_v28 = vpop.f32.mrb[10].mxu0  ;;  %6242 = vmatpush3.bf16.msra.mxu0 %v1200_v12  ;;  %v7990_v12 = vld [vmem:[%s9728_s2 + $0x40] sm:$0xff]  }
 0x2fb   : > { %v1052_v57 = vpop.xlane.xlu1 %1051  ;;  %v1202_v5 = vpack.c.bf16 %v6198_v28, %v6197_v58  ;;  %v807_v7 = vpop.f32.mrb[11].mxu0 }
 0x2fc   : > { %v7945_v60 = vpop.eup %7066  ;;  %v1097_v63 = vmul.f32 1.442695, %v1071_v55  ;;  %v1072_v25 = vsub.f32 %v7869_v33, %v1052_v57  ;;  %7076 = vpow2.f32 %v1095_v22  ;;  %v1201_v13 = vpack.c.bf16 %v807_v7, %v804_v1  ;;  %v6201_v21 = vpop.f32.mrb[12].mxu0 }
 0x2fd   : > { %1117 = vadd.xlane.f32.xlu0 %v7945_v60  ;;  %v1054_v2 = vpop.xlane.xlu0 %1053  ;;  %1115 = vadd.xlane.f32.xlu1 %v7943_v56  ;;  %v820_v0 = vpop.f32.mrb[13].mxu0 }
 0x2fe   : > { %7078 = vpow2.f32 %v1097_v63  ;;  %v1099_v3 = vmul.f32 1.442695, %v1072_v25  ;;  %v1073_v4 = vsub.f32 %v7874_v39, %v1054_v2  ;;  %v7951_v9 = vpop.eup %7068  ;;  %6243 = vmatprep.subr.bf16.mxu0 %v1201_v13  ;;  %v6202_v27 = vpop.f32.mrb[14].mxu0 }
 0x2ff   : > { %v1056_v11 = vpop.xlane.xlu1 %1055  ;;  %6244 = vmatpush3.bf16.msra.mxu0 %v1201_v13  ;;  %v1204_v29 = vpack.c.bf16 %v6202_v27, %v6201_v21  ;;  %v823_v35 = vpop.f32.mrb[15].mxu0 }
 0x300   : > { %v7953_v33 = vpop.eup %7070  ;;  %v1101_v14 = vmul.f32 1.442695, %v1073_v4  ;;  %v1074_v59 = vsub.f32 %v7879_v41, %v1056_v11  ;;  %7080 = vpow2.f32 %v1099_v3  ;;  %6245 = vmatprep.subr.bf16.mxu0 %v1202_v5 }
 0x301   : > { %1121 = vadd.xlane.f32.xlu0 %v7953_v33  ;;  %v1058_v61 = vpop.xlane.xlu0 %1057  ;;  %1119 = vadd.xlane.f32.xlu1 %v7951_v9 }
 0x302   : > { %7082 = vpow2.f32 %v1101_v14  ;;  %v1103_v39 = vmul.f32 1.442695, %v1074_v59  ;;  %v1075_v15 = vsub.f32 %v7884_v42, %v1058_v61  ;;  %v7959_v19 = vpop.eup %7072 }
 0x303   : > { %v1060_v20 = vpop.xlane.xlu1 %1059  ;;  %6246 = vmatpush3.bf16.msra.mxu0 %v1202_v5 }
 0x304   : > { %v7961_v62 = vpop.eup %7074  ;;  %v1105_v23 = vmul.f32 1.442695, %v1075_v15  ;;  %v1076_v41 = vsub.f32 %v7889_v43, %v1060_v20  ;;  %7084 = vpow2.f32 %v1103_v39  ;;  %v1203_v43 = vpack.c.bf16 %v823_v35, %v820_v0 }
 0x305   : > { %1125 = vadd.xlane.f32.xlu0 %v7961_v62  ;;  %1123 = vadd.xlane.f32.xlu1 %v7959_v19 }
 0x306   : > { %7086 = vpow2.f32 %v1105_v23  ;;  %v1107_v42 = vmul.f32 1.442695, %v1076_v41  ;;  %v7966_v30 = vpop.eup %7076  ;;  %6247 = vmatprep.subr.bf16.mxu0 %v1203_v43 }
 0x307   : > { %6248 = vmatpush3.bf16.msra.mxu0 %v1203_v43 }
 0x308   : > { %v7968_v8 = vpop.eup %7078  ;;  %7088 = vpow2.f32 %v1107_v42  ;;  %6249 = vmatprep.subr.bf16.mxu0 %v1204_v29 }
 0x309   : > { %1129 = vadd.xlane.f32.xlu0 %v7968_v8  ;;  %1127 = vadd.xlane.f32.xlu1 %v7966_v30 }
 0x30a   : > { %v7972_v36 = vpop.eup %7080 }
 0x30b   : > { %6250 = vmatpush3.bf16.msra.mxu0 %v1204_v29 }
 0x30c   : > { %v7974_v37 = vpop.eup %7082  ;;  %6267 = vmatprep.subr.bf16.mxu0 %v7990_v12 }
 0x30d   : > { %1133 = vadd.xlane.f32.xlu0 %v7974_v37  ;;  %1131 = vadd.xlane.f32.xlu1 %v7972_v36 }
 0x30e   : > { %v7978_v10 = vpop.eup %7084 }
 0x310   : > { %v7980_v40 = vpop.eup %7086 }
 0x311   : > { %1137 = vadd.xlane.f32.xlu0 %v7980_v40  ;;  %1135 = vadd.xlane.f32.xlu1 %v7978_v10 }
 0x312   : > { %v7984_v44 = vpop.eup %7088 }
 0x315   : > { %1139 = vadd.xlane.f32.xlu1 %v7984_v44 }
 0x334   : > { %v6317_v54 = vpop.f32.mrb[48].mxu1 }
 0x335   : > { %v1575_v22 = vpop.f32.mrb[49].mxu1 }
 0x336   : > { %v6318_v57 = vpop.f32.mrb[50].mxu1 }
 0x337   : > { %v1809_v1 = vpack.c.bf16 %v6318_v57, %v6317_v54  ;;  %v1578_v2 = vpop.f32.mrb[51].mxu1 }
 0x338   : > { %v1808_v28 = vpack.c.bf16 %v1578_v2, %v1575_v22 }
 0x339   : > { %v1844_v27 = vsel %vm851_vm0, %v1809_v1, 0 }
 0x33a   : > { %v1841_v13 = vsel %vm851_vm0, %v1808_v28, 0  ;;  %6883 = vmatprep.subr.msk.bf16.mxu1 %vm851_vm0, %v1808_v28 }
 0x33b   : > { %6364 = vmatpush3.bf16.xpose.msra.mxu1 %v1841_v13 }
 0x33c   : > { %v6321_v14 = vpop.f32.mrb[52].mxu1  ;;  %6884 = vmatprep.subr.msk.bf16.mxu1 %vm851_vm0, %v1809_v1 }
 0x33d   : > { %v1591_v59 = vpop.f32.mrb[53].mxu1 }
 0x33e   : > { %v6322_v39 = vpop.f32.mrb[54].mxu1 }
 0x33f   : > { %v8009_v41 = vpack.c.bf16 %v6322_v39, %v6321_v14  ;;  %v1594_v0 = vpop.f32.mrb[55].mxu1 }
 0x340   : > { %v1810_v42 = vpack.c.bf16 %v1594_v0, %v1591_v59  ;;  %v6993_v0 = vld [vmem:[%s9728_s2 + $0x78] sm:$0xff]  }
 0x342   : > { %v1847_v2 = vsel %vm851_vm0, %v1810_v42, 0 }
 0x343   : > { %6366 = vmatpush3.bf16.xpose.msra.mxu1 %v1844_v27 }
 0x344   : > { %6885 = vmatprep.subr.msk.bf16.mxu1 %vm851_vm0, %v1810_v42 }
 0x34b   : > { %6368 = vmatpush3.bf16.xpose.msra.mxu1 %v1847_v2 }
 0x34c   : > { %6886 = vmatprep.subr.msk.bf16.mxu1 %vm851_vm0, %v8009_v41 }
 0x382   : > { %v1110_v45 = vpop.xlane.xlu0 %1109 }
 0x383   : > { %7090 = vrcp.f32 %v1110_v45 }
 0x386   : > { %v1114_v47 = vpop.xlane.xlu0 %1113  ;;  %v1112_v49 = vpop.xlane.xlu1 %1111 }
 0x387   : > { %7092 = vrcp.f32 %v1114_v47 }
 0x388   : > { %7094 = vrcp.f32 %v1112_v49 }
 0x38a   : > { %v1118_v17 = vpop.xlane.xlu0 %1117  ;;  %v1116_v53 = vpop.xlane.xlu1 %1115 }
 0x38b   : > { %7096 = vrcp.f32 %v1118_v17  ;;  %v6325_v17 = vpop.f32.mrb[56].mxu1 }
 0x38c   : > { %7098 = vrcp.f32 %v1116_v53  ;;  %v1607_v53 = vpop.f32.mrb[57].mxu1 }
 0x38d   : > { %v7091_v55 = vpop.eup %7090 }
 0x38e   : > { %v1122_v58 = vpop.xlane.xlu0 %1121  ;;  %v1120_v63 = vpop.xlane.xlu1 %1119  ;;  %v1157_v25 = vmul.f32 %v7091_v55, %v7930_v31 }
 0x38f   : > { %7100 = vrcp.f32 %v1122_v58  ;;  %v6326_v55 = vpop.f32.mrb[58].mxu1 }
 0x390   : > { %7102 = vrcp.f32 %v1120_v63  ;;  %1173 = vst [vmem:[%s7998_s26] sm:$0xff] %v1157_v25  ;;  %v8028_v63 = vpack.c.bf16 %v6326_v55, %v6325_v17  ;;  %v1610_v1 = vpop.f32.mrb[59].mxu1 }
 0x391   : > { %v7093_v3 = vpop.eup %7092  ;;  %v1812_v28 = vpack.c.bf16 %v1610_v1, %v1607_v53  ;;  %v6329_v27 = vpop.f32.mrb[60].mxu1 }
 0x392   : > { %v7095_v4 = vpop.eup %7094  ;;  %v1159_v5 = vmul.f32 %v7093_v3, %v7935_v46  ;;  %v1126_v7 = vpop.xlane.xlu0 %1125 }
 0x393   : > { %v1124_v11 = vpop.xlane.xlu1 %1123  ;;  %7104 = vrcp.f32 %v1126_v7  ;;  %v1158_v31 = vmul.f32 %v7095_v4, %v7937_v51  ;;  %v1623_v42 = vpop.f32.mrb[61].mxu1 }
 0x394   : > { %1175 = vst [vmem:[%s7998_s26 + $0x10] sm:$0xff] %v1159_v5  ;;  %7106 = vrcp.f32 %v1124_v11 }
 0x395   : > { %v7097_v61 = vpop.eup %7096  ;;  %1174 = vst [vmem:[%s7998_s26 + $0x8] sm:$0xff] %v1158_v31  ;;  %v1189_v46 = vpack.c.bf16 %v1158_v31, %v1157_v25 }
 0x396   : > { %v7099_v15 = vpop.eup %7098  ;;  %v1130_v20 = vpop.xlane.xlu0 %1129  ;;  %v1161_v23 = vmul.f32 %v7097_v61, %v7945_v60  ;;  %v6987_v60 = vld [vmem:[%s9728_s2 + $0x48] sm:$0xff]   ;;  %v1850_v61 = vsel %vm851_vm0, %v8009_v41, 0  ;;  %v6992_v41 = vld [vmem:[%s9728_s2 + $0x70] sm:$0xff]  }
 0x397   : > { %v1128_v21 = vpop.xlane.xlu1 %1127  ;;  %v1160_v51 = vmul.f32 %v7099_v15, %v7943_v56  ;;  %7108 = vrcp.f32 %v1130_v20  ;;  %6251 = vmatprep.mubr.bf16.mxu0 %v1189_v46  ;;  %v6991_v15 = vld [vmem:[%s9728_s2 + $0x68] sm:$0xff]   ;;  %6370 = vmatpush3.bf16.xpose.msra.mxu1 %v1850_v61 }
 0x398   : > { %7110 = vrcp.f32 %v1128_v21  ;;  %1177 = vst [vmem:[%s7998_s26 + $0x20] sm:$0xff] %v1161_v23  ;;  %6887 = vmatprep.subr.msk.bf16.mxu1 %vm851_vm0, %v1812_v28 }
 0x399   : > { %v7101_v29 = vpop.eup %7100  ;;  %1176 = vst [vmem:[%s7998_s26 + $0x18] sm:$0xff] %v1160_v51  ;;  %v1190_v35 = vpack.c.bf16 %v1160_v51, %v1159_v5 }
 0x39a   : > { %v7103_v43 = vpop.eup %7102  ;;  %v1134_v45 = vpop.xlane.xlu0 %1133  ;;  %v1163_v47 = vmul.f32 %v7101_v29, %v7953_v33  ;;  %v6988_v33 = vld [vmem:[%s9728_s2 + $0x50] sm:$0xff]  }
 0x39b   : > { %v1132_v56 = vpop.xlane.xlu1 %1131  ;;  %7112 = vrcp.f32 %v1134_v45  ;;  %6252 = vmatmul.mubr.bf16.vlgmr.msra.gmra.mrb[16].mxu0 %v1190_v35  ;;  %v1162_v49 = vmul.f32 %v7103_v43, %v7951_v9  ;;  %v6330_v29 = vpop.f32.mrb[62].mxu1 }
 0x39c   : > { %7114 = vrcp.f32 %v1132_v56  ;;  %6268 = vmatpush3.bf16.msra.mxu0 %v7990_v12  ;;  %1179 = vst [vmem:[%s7998_s26 + $0x30] sm:$0xff] %v1163_v47  ;;  %v1815_v35 = vpack.c.bf16 %v6330_v29, %v6329_v27  ;;  %v6999_v29 = vld [vmem:[%s9728_s2 + $0xa8] sm:$0xff]  }
 0x39d   : > { %v7105_v54 = vpop.eup %7104  ;;  %1178 = vst [vmem:[%s7998_s26 + $0x28] sm:$0xff] %v1162_v49  ;;  %v1191_v22 = vpack.c.bf16 %v1162_v49, %v1161_v23  ;;  %6269 = vmatprep.subr.bf16.mxu0 %v6987_v60 }
 0x39e   : > { %v7107_v9 = vpop.eup %7106  ;;  %v1138_v57 = vpop.xlane.xlu0 %1137  ;;  %v1165_v12 = vmul.f32 %v7105_v54, %v7961_v62  ;;  %v6989_v62 = vld [vmem:[%s9728_s2 + $0x58] sm:$0xff]   ;;  %v1862_v56 = vsel %vm851_vm0, %v1815_v35, 0 }
 0x39f   : > { %v1136_v58 = vpop.xlane.xlu1 %1135  ;;  %7116 = vrcp.f32 %v1138_v57  ;;  %6255 = vmatprep.mubr.bf16.mxu0 %v1191_v22  ;;  %v1164_v25 = vmul.f32 %v7107_v9, %v7959_v19 }
 0x3a0   : > { %7118 = vrcp.f32 %v1136_v58  ;;  %6270 = vmatpush3.bf16.msra.mxu0 %v6987_v60  ;;  %1181 = vst [vmem:[%s7998_s26 + $0x40] sm:$0xff] %v1165_v12  ;;  %v1626_v60 = vpop.f32.mrb[63].mxu1 }
 0x3a1   : > { %v7109_v3 = vpop.eup %7108  ;;  %1180 = vst [vmem:[%s7998_s26 + $0x38] sm:$0xff] %v1164_v25  ;;  %v1192_v4 = vpack.c.bf16 %v1164_v25, %v1163_v47  ;;  %6271 = vmatprep.subr.bf16.mxu0 %v6988_v33  ;;  %v1814_v43 = vpack.c.bf16 %v1626_v60, %v1623_v42  ;;  %v6994_v47 = vld [vmem:[%s9728_s2 + $0x80] sm:$0xff]  }
 0x3a2   : > { %v7111_v5 = vpop.eup %7110  ;;  %v1167_v19 = vmul.f32 %v7109_v3, %v7968_v8  ;;  %v6990_v8 = vld [vmem:[%s9728_s2 + $0x60] sm:$0xff]  }
 0x3a3   : > { %v1140_v7 = vpop.xlane.xlu1 %1139  ;;  %6256 = vmatmul.mubr.bf16.gmra.mrb[20].mxu0 %v1192_v4  ;;  %v1166_v11 = vmul.f32 %v7111_v5, %v7966_v30  ;;  %v1859_v45 = vsel %vm851_vm0, %v1814_v43, 0 }
 0x3a4   : > { %7120 = vrcp.f32 %v1140_v7  ;;  %6272 = vmatpush3.bf16.msra.mxu0 %v6988_v33  ;;  %1183 = vst [vmem:[%s7998_s26 + $0x50] sm:$0xff] %v1167_v19 }
 0x3a5   : > { %v7113_v13 = vpop.eup %7112  ;;  %1182 = vst [vmem:[%s7998_s26 + $0x48] sm:$0xff] %v1166_v11  ;;  %v1193_v31 = vpack.c.bf16 %v1166_v11, %v1165_v12  ;;  %6273 = vmatprep.subr.bf16.mxu0 %v6989_v62 }
 0x3a6   : > { %v7115_v14 = vpop.eup %7114  ;;  %v1169_v59 = vmul.f32 %v7113_v13, %v7974_v37 }
 0x3a7   : > { %6259 = vmatprep.mubr.bf16.mxu0 %v1193_v31  ;;  %v1168_v30 = vmul.f32 %v7115_v14, %v7972_v36 }
 0x3a8   : > { %6274 = vmatpush3.bf16.msra.mxu0 %v6989_v62  ;;  %1185 = vst [vmem:[%s7998_s26 + $0x60] sm:$0xff] %v1169_v59 }
 0x3a9   : > { %v7117_v46 = vpop.eup %7116  ;;  %1184 = vst [vmem:[%s7998_s26 + $0x58] sm:$0xff] %v1168_v30  ;;  %v1194_v39 = vpack.c.bf16 %v1168_v30, %v1167_v19  ;;  %6275 = vmatprep.subr.bf16.mxu0 %v6990_v8 }
 0x3aa   : > { %v7119_v20 = vpop.eup %7118  ;;  %v1171_v37 = vmul.f32 %v7117_v46, %v7980_v40  ;;  %v6995_v46 = vld [vmem:[%s9728_s2 + $0x88] sm:$0xff]  }
 0x3ab   : > { %6260 = vmatmul.mubr.bf16.gmra.mrb[24].mxu0 %v1194_v39  ;;  %v1170_v36 = vmul.f32 %v7119_v20, %v7978_v10  ;;  %v1853_v10 = vsel %vm851_vm0, %v1812_v28, 0  ;;  %v6996_v20 = vld [vmem:[%s9728_s2 + $0x90] sm:$0xff]  }
 0x3ac   : > { %6276 = vmatpush3.bf16.msra.mxu0 %v6990_v8  ;;  %1187 = vst [vmem:[%s7998_s26 + $0x70] sm:$0xff] %v1171_v37  ;;  %6372 = vmatpush3.bf16.xpose.msra.mxu1 %v1853_v10  ;;  %v6998_v10 = vld [vmem:[%s9728_s2 + $0xa0] sm:$0xff]  }
 0x3ad   : > { %1186 = vst [vmem:[%s7998_s26 + $0x68] sm:$0xff] %v1170_v36  ;;  %v1195_v23 = vpack.c.bf16 %v1170_v36, %v1169_v59  ;;  %6277 = vmatprep.subr.bf16.mxu0 %v6991_v15  ;;  %6888 = vmatprep.subr.msk.bf16.mxu1 %vm851_vm0, %v8028_v63 }
 0x3ae   : > { %v7121_v21 = vpop.eup %7120 }
 0x3af   : > { %v1172_v51 = vmul.f32 %v7121_v21, %v7984_v44  ;;  %6263 = vmatprep.mubr.bf16.mxu0 %v1195_v23  ;;  %v1856_v44 = vsel %vm851_vm0, %v8028_v63, 0 }
 0x3b0   : > { %6278 = vmatpush3.bf16.msra.mxu0 %v6991_v15 }
 0x3b1   : > { %1188 = vst [vmem:[%s7998_s26 + $0x78] sm:$0xff] %v1172_v51  ;;  %v1196_v40 = vpack.c.bf16 %v1172_v51, %v1171_v37  ;;  %6279 = vmatprep.subr.bf16.mxu0 %v6992_v41 }
 0x3b3   : > { %6264 = vmatmul.mubr.bf16.gmra.mrb[28].mxu0 %v1196_v40 }
 0x3b4   : > { %6280 = vmatpush3.bf16.msra.mxu0 %v6992_v41  ;;  %6283 = vmatprep.mubr.bf16.mxu0 %v7631_v6  ;;  %v6997_v41 = vld [vmem:[%s9728_s2 + $0x98] sm:$0xff]  }
 0x3b5   : > { %6281 = vmatprep.subr.bf16.mxu0 %v6993_v0  ;;  %6374 = vmatpush3.bf16.xpose.msra.mxu1 %v1856_v44 }
 0x3b6   : > { %6889 = vmatprep.subr.msk.bf16.mxu1 %vm851_vm0, %v1814_v43  ;;  %v7000_v43 = vld [vmem:[%s9728_s2 + $0xb0] sm:$0xff]  }
 0x3b8   : > { %6282 = vmatpush3.bf16.msra.mxu0 %v6993_v0 }
 0x3bb   : > { %6284 = vmatmul.mubr.bf16.vlgmr.msra.gmra.mrb[32].mxu0 %v7654_v16 }
 0x3bc   : > { %6287 = vmatprep.mubr.bf16.mxu0 %v7659_v18 }
 0x3bd   : > { %6376 = vmatpush3.bf16.xpose.msra.mxu1 %v1859_v45 }
 0x3be   : > { %6890 = vmatprep.subr.msk.bf16.mxu1 %vm851_vm0, %v1815_v35 }
 0x3c3   : > { %6288 = vmatmul.mubr.bf16.gmra.mrb[36].mxu0 %v7670_v24 }
 0x3c4   : > { %6291 = vmatprep.mubr.bf16.mxu0 %v7675_v26 }
 0x3c5   : > { %6378 = vmatpush3.bf16.xpose.msra.mxu1 %v1862_v56 }
 0x3c6   : > { %6467 = vmatprep.subr.bf16.mxu1 %v6994_v47 }
 0x3cb   : > { %6292 = vmatmul.mubr.bf16.gmra.mrb[40].mxu0 %v7686_v32 }
 0x3cc   : > { %6295 = vmatprep.mubr.bf16.mxu0 %v7691_v34 }
 0x3d3   : > { %6296 = vmatmul.mubr.bf16.gmra.mrb[44].mxu0 %v7700_v38 }
 0x3d4   : > { %6347 = vmatprep.mubr.bf16.mxu0 %v7631_v6 }
 0x46e   : > { %v8089_v49 = vpop.f32.mrb[16].mxu0 }
 0x46f   : > { %v8091_v17 = vpop.f32.mrb[17].mxu0 }
 0x470   : > { %v8093_v53 = vpop.f32.mrb[18].mxu0 }
 0x471   : > { %v8097_v22 = vpop.f32.mrb[19].mxu0 }
 0x476   : > { %v8101_v55 = vpop.f32.mrb[20].mxu0 }
 0x477   : > { %v8103_v9 = vpop.f32.mrb[21].mxu0 }
 0x478   : > { %v8105_v57 = vpop.f32.mrb[22].mxu0 }
 0x479   : > { %v8109_v12 = vpop.f32.mrb[23].mxu0 }
 0x47e   : > { %v8113_v25 = vpop.f32.mrb[24].mxu0 }
 0x47f   : > { %v8115_v1 = vpop.f32.mrb[25].mxu0 }
 0x480   : > { %v8117_v2 = vpop.f32.mrb[26].mxu0 }
 0x481   : > { %v8121_v3 = vpop.f32.mrb[27].mxu0 }
 0x486   : > { %v8125_v62 = vpop.f32.mrb[28].mxu0 }
 0x487   : > { %v8127_v5 = vpop.f32.mrb[29].mxu0 }
 0x488   : > { %v8129_v7 = vpop.f32.mrb[30].mxu0 }
 0x489   : > { %v8133_v11 = vpop.f32.mrb[31].mxu0 }
 0x48e   : > { %v6285_v31 = vpop.f32.mrb[32].mxu0 }
 0x48f   : > { %v1413_v8 = vpop.f32.mrb[33].mxu0 }
 0x490   : > { %v6286_v14 = vpop.f32.mrb[34].mxu0 }
 0x491   : > { %v1801_v59 = vpack.c.bf16 %v6286_v14, %v6285_v31  ;;  %v1416_v30 = vpop.f32.mrb[35].mxu0  ;;  %v7002_v14 = vld [vmem:[%s9729_s3 + $0x80] sm:$0xff]  }
 0x492   : > { %v1800_v61 = vpack.c.bf16 %v1416_v30, %v1413_v8  ;;  %v7001_v8 = vld [vmem:[%s9728_s2 + $0xb8] sm:$0xff]   ;;  %v7004_v30 = vld [vmem:[%s9729_s3 + $0x90] sm:$0xff]  }
 0x494   : > { %6379 = vmatprep.mubr.msk.bf16.mxu1 %vm851_vm0, %v1800_v61  ;;  %v7005_v61 = vld [vmem:[%s9729_s3 + $0x98] sm:$0xff]  }
 0x495   : > { %6380 = vmatmul.mubr.msk.bf16.vlgmr.msra.gmra.mrb[64].mxu1 %vm851_vm0, %v1801_v59  ;;  %v7003_v59 = vld [vmem:[%s9729_s3 + $0x88] sm:$0xff]  }
 0x496   : > { %v6289_v39 = vpop.f32.mrb[36].mxu0  ;;  %6468 = vmatpush3.bf16.msra.mxu1 %v6994_v47 }
 0x497   : > { %v1429_v15 = vpop.f32.mrb[37].mxu0  ;;  %6469 = vmatprep.subr.bf16.mxu1 %v6995_v46 }
 0x498   : > { %v6290_v37 = vpop.f32.mrb[38].mxu0 }
 0x499   : > { %v1803_v36 = vpack.c.bf16 %v6290_v37, %v6289_v39  ;;  %v1432_v21 = vpop.f32.mrb[39].mxu0  ;;  %v7007_v39 = vld [vmem:[%s9729_s3 + $0xa8] sm:$0xff]   ;;  %v7010_v37 = vld [vmem:[%s9730_s4 + $0x40] sm:$0xff]  }
 0x49a   : > { %v1802_v23 = vpack.c.bf16 %v1432_v21, %v1429_v15  ;;  %6470 = vmatpush3.bf16.msra.mxu1 %v6995_v46  ;;  %v7006_v46 = vld [vmem:[%s9729_s3 + $0xa0] sm:$0xff]   ;;  %v7008_v15 = vld [vmem:[%s9729_s3 + $0xb0] sm:$0xff]   ;;  %6331 = vmatprep.subr.bf16.mxu0 %v7010_v37 }
 0x49b   : > { %6471 = vmatprep.subr.bf16.mxu1 %v6996_v20  ;;  %6332 = vmatpush3.bf16.msra.mxu0 %v7010_v37  ;;  %v7012_v21 = vld [vmem:[%s9730_s4 + $0x50] sm:$0xff]  }
 0x49c   : > { %6383 = vmatprep.mubr.msk.bf16.mxu1 %vm851_vm0, %v1802_v23  ;;  %v7013_v23 = vld [vmem:[%s9730_s4 + $0x58] sm:$0xff]  }
 0x49d   : > { %6384 = vmatmul.mubr.msk.bf16.gmra.mrb[68].mxu1 %vm851_vm0, %v1803_v36  ;;  %v7011_v36 = vld [vmem:[%s9730_s4 + $0x48] sm:$0xff]  }
 0x49e   : > { %v6293_v51 = vpop.f32.mrb[40].mxu0  ;;  %6472 = vmatpush3.bf16.msra.mxu1 %v6996_v20  ;;  %v7009_v20 = vld [vmem:[%s9729_s3 + $0xb8] sm:$0xff]   ;;  %6333 = vmatprep.subr.bf16.mxu0 %v7011_v36 }
 0x49f   : > { %v1445_v40 = vpop.f32.mrb[41].mxu0  ;;  %6473 = vmatprep.subr.bf16.mxu1 %v6997_v41  ;;  %6334 = vmatpush3.bf16.msra.mxu0 %v7011_v36 }
 0x4a0   : > { %v6294_v0 = vpop.f32.mrb[42].mxu0  ;;  %6335 = vmatprep.subr.bf16.mxu0 %v7012_v21 }
 0x4a1   : > { %v1805_v44 = vpack.c.bf16 %v6294_v0, %v6293_v51  ;;  %v1448_v27 = vpop.f32.mrb[43].mxu0  ;;  %v7015_v51 = vld [vmem:[%s9730_s4 + $0x68] sm:$0xff]  }
 0x4a2   : > { %v1804_v42 = vpack.c.bf16 %v1448_v27, %v1445_v40  ;;  %6474 = vmatpush3.bf16.msra.mxu1 %v6997_v41  ;;  %v7014_v41 = vld [vmem:[%s9730_s4 + $0x60] sm:$0xff]   ;;  %v7016_v40 = vld [vmem:[%s9730_s4 + $0x70] sm:$0xff]  }
 0x4a3   : > { %6475 = vmatprep.subr.bf16.mxu1 %v6998_v10  ;;  %6336 = vmatpush3.bf16.msra.mxu0 %v7012_v21 }
 0x4a4   : > { %6387 = vmatprep.mubr.msk.bf16.mxu1 %vm851_vm0, %v1804_v42  ;;  %6337 = vmatprep.subr.bf16.mxu0 %v7013_v23 }
 0x4a5   : > { %6388 = vmatmul.mubr.msk.bf16.gmra.mrb[72].mxu1 %vm851_vm0, %v1805_v44 }
 0x4a6   : > { %v6297_v35 = vpop.f32.mrb[44].mxu0  ;;  %6476 = vmatpush3.bf16.msra.mxu1 %v6998_v10  ;;  %v7017_v10 = vld [vmem:[%s9730_s4 + $0x78] sm:$0xff]  }
 0x4a7   : > { %v1461_v60 = vpop.f32.mrb[45].mxu0  ;;  %6477 = vmatprep.subr.bf16.mxu1 %v6999_v29  ;;  %6338 = vmatpush3.bf16.msra.mxu0 %v7013_v23 }
 0x4a8   : > { %v6298_v45 = vpop.f32.mrb[46].mxu0  ;;  %6339 = vmatprep.subr.bf16.mxu0 %v7014_v41 }
 0x4a9   : > { %v1807_v56 = vpack.c.bf16 %v6298_v45, %v6297_v35  ;;  %v1464_v47 = vpop.f32.mrb[47].mxu0 }
 0x4aa   : > { %v1806_v31 = vpack.c.bf16 %v1464_v47, %v1461_v60  ;;  %6478 = vmatpush3.bf16.msra.mxu1 %v6999_v29 }
 0x4ab   : > { %6479 = vmatprep.subr.bf16.mxu1 %v7000_v43  ;;  %6340 = vmatpush3.bf16.msra.mxu0 %v7014_v41 }
 0x4ac   : > { %6391 = vmatprep.mubr.msk.bf16.mxu1 %vm851_vm0, %v1806_v31  ;;  %6341 = vmatprep.subr.bf16.mxu0 %v7015_v51 }
 0x4ad   : > { %6392 = vmatmul.mubr.msk.bf16.gmra.mrb[76].mxu1 %vm851_vm0, %v1807_v56 }
 0x4ae   : > { %6480 = vmatpush3.bf16.msra.mxu1 %v7000_v43  ;;  %6483 = vmatprep.mubr.bf16.mxu1 %v7631_v6 }
 0x4af   : > { %6481 = vmatprep.subr.bf16.mxu1 %v7001_v8  ;;  %6342 = vmatpush3.bf16.msra.mxu0 %v7015_v51 }
 0x4b0   : > { %6343 = vmatprep.subr.bf16.mxu0 %v7016_v40 }
 0x4b2   : > { %6482 = vmatpush3.bf16.msra.mxu1 %v7001_v8 }
 0x4b3   : > { %6499 = vmatprep.subr.bf16.mxu1 %v7002_v14  ;;  %6344 = vmatpush3.bf16.msra.mxu0 %v7016_v40 }
 0x4b4   : > { %6345 = vmatprep.subr.bf16.mxu0 %v7017_v10 }
 0x4b5   : > { %6484 = vmatmul.mubr.bf16.vlgmr.msra.gmra.mrb[80].mxu1 %v7654_v16 }
 0x4b6   : > { %6500 = vmatpush3.bf16.msra.mxu1 %v7002_v14  ;;  %6487 = vmatprep.mubr.bf16.mxu1 %v7659_v18 }
 0x4b7   : > { %6501 = vmatprep.subr.bf16.mxu1 %v7003_v59  ;;  %6346 = vmatpush3.bf16.msra.mxu0 %v7017_v10 }
 0x4ba   : > { %6502 = vmatpush3.bf16.msra.mxu1 %v7003_v59  ;;  %6348 = vmatmul.mubr.bf16.vlgmr.msra.gmra.mrb[48].mxu0 %v7654_v16 }
 0x4bb   : > { %6503 = vmatprep.subr.bf16.mxu1 %v7004_v30  ;;  %6351 = vmatprep.mubr.bf16.mxu0 %v7659_v18 }
 0x4bd   : > { %6488 = vmatmul.mubr.bf16.gmra.mrb[84].mxu1 %v7670_v24 }
 0x4be   : > { %6504 = vmatpush3.bf16.msra.mxu1 %v7004_v30  ;;  %6491 = vmatprep.mubr.bf16.mxu1 %v7675_v26 }
 0x4bf   : > { %6505 = vmatprep.subr.bf16.mxu1 %v7005_v61 }
 0x4c2   : > { %6506 = vmatpush3.bf16.msra.mxu1 %v7005_v61  ;;  %6352 = vmatmul.mubr.bf16.gmra.mrb[52].mxu0 %v7670_v24 }
 0x4c3   : > { %6507 = vmatprep.subr.bf16.mxu1 %v7006_v46  ;;  %6355 = vmatprep.mubr.bf16.mxu0 %v7675_v26 }
 0x4c5   : > { %6492 = vmatmul.mubr.bf16.gmra.mrb[88].mxu1 %v7686_v32 }
 0x4c6   : > { %6508 = vmatpush3.bf16.msra.mxu1 %v7006_v46  ;;  %6495 = vmatprep.mubr.bf16.mxu1 %v7691_v34 }
 0x4c7   : > { %6509 = vmatprep.subr.bf16.mxu1 %v7007_v39 }
 0x4ca   : > { %6510 = vmatpush3.bf16.msra.mxu1 %v7007_v39  ;;  %6356 = vmatmul.mubr.bf16.gmra.mrb[56].mxu0 %v7686_v32 }
 0x4cb   : > { %6511 = vmatprep.subr.bf16.mxu1 %v7008_v15  ;;  %6359 = vmatprep.mubr.bf16.mxu0 %v7691_v34 }
 0x4cd   : > { %6496 = vmatmul.mubr.bf16.gmra.mrb[92].mxu1 %v7700_v38 }
 0x4ce   : > { %6512 = vmatpush3.bf16.msra.mxu1 %v7008_v15  ;;  %6515 = vmatprep.mubr.bf16.mxu1 %v7631_v6 }
 0x4cf   : > { %6513 = vmatprep.subr.bf16.mxu1 %v7009_v20 }
 0x4d2   : > { %6514 = vmatpush3.bf16.msra.mxu1 %v7009_v20  ;;  %6360 = vmatmul.mubr.bf16.gmra.mrb[60].mxu0 %v7700_v38 }
 0x4d5   : > { %6516 = vmatmul.mubr.bf16.vlgmr.msra.gmra.mrb[96].mxu1 %v7654_v16 }
 0x4d6   : > { %6519 = vmatprep.mubr.bf16.mxu1 %v7659_v18 }
 0x4dd   : > { %6520 = vmatmul.mubr.bf16.gmra.mrb[100].mxu1 %v7670_v24 }
 0x4de   : > { %6523 = vmatprep.mubr.bf16.mxu1 %v7675_v26 }
 0x4e5   : > { %6524 = vmatmul.mubr.bf16.gmra.mrb[104].mxu1 %v7686_v32 }
 0x4e6   : > { %6527 = vmatprep.mubr.bf16.mxu1 %v7691_v34 }
 0x4ed   : > { %6528 = vmatmul.mubr.bf16.gmra.mrb[108].mxu1 %v7700_v38 }
 0x568   : > { %v6381_v0 = vpop.f32.mrb[64].mxu1 }
 0x569   : > { %v1898_v44 = vpop.f32.mrb[65].mxu1  ;;  %v1963_v35 = vmul.f32 0.088388346, %v6381_v0 }
 0x56a   : > { %v1961_v27 = vmul.f32 0.088388346, %v1898_v44  ;;  %v6382_v42 = vpop.f32.mrb[66].mxu1 }
 0x56b   : > { %v1901_v29 = vpop.f32.mrb[67].mxu1  ;;  %v1964_v45 = vmul.f32 0.088388346, %v6382_v42  ;;  %v8249_v31 = vsel %vm7808_vm1, %v1963_v35, -inf }
 0x56c   : > { %v1962_v60 = vmul.f32 0.088388346, %v1901_v29  ;;  %v8239_v43 = vsel %vm7808_vm1, %v1961_v27, -inf }
 0x56d   : > { %1993 = vmax.xlane.f32.xlu0 %v8239_v43  ;;  %v8254_v30 = vsel %vm7808_vm1, %v1964_v45, -inf }
 0x56e   : > { %v8244_v56 = vsel %vm7808_vm1, %v1962_v60, -inf }
 0x56f   : > { %1995 = vmax.xlane.f32.xlu1 %v8244_v56 }
 0x570   : > { %v6385_v47 = vpop.f32.mrb[68].mxu1 }
 0x571   : > { %1997 = vmax.xlane.f32.xlu0 %v8249_v31  ;;  %v1914_v8 = vpop.f32.mrb[69].mxu1  ;;  %v1967_v46 = vmul.f32 0.088388346, %v6385_v47 }
 0x572   : > { %v1965_v14 = vmul.f32 0.088388346, %v1914_v8  ;;  %v6386_v59 = vpop.f32.mrb[70].mxu1 }
 0x573   : > { %1999 = vmax.xlane.f32.xlu1 %v8254_v30  ;;  %v1917_v61 = vpop.f32.mrb[71].mxu1  ;;  %v1968_v20 = vmul.f32 0.088388346, %v6386_v59  ;;  %v8269_v21 = vsel %vm7808_vm1, %v1967_v46, -inf }
 0x574   : > { %v1966_v39 = vmul.f32 0.088388346, %v1917_v61  ;;  %v8259_v15 = vsel %vm7808_vm1, %v1965_v14, -inf }
 0x575   : > { %2001 = vmax.xlane.f32.xlu0 %v8259_v15  ;;  %v8274_v40 = vsel %vm7808_vm1, %v1968_v20, -inf }
 0x576   : > { %v8264_v37 = vsel %vm7808_vm1, %v1966_v39, -inf }
 0x577   : > { %2003 = vmax.xlane.f32.xlu1 %v8264_v37 }
 0x578   : > { %v6389_v36 = vpop.f32.mrb[72].mxu1 }
 0x579   : > { %2005 = vmax.xlane.f32.xlu0 %v8269_v21  ;;  %v1930_v23 = vpop.f32.mrb[73].mxu1  ;;  %v1971_v0 = vmul.f32 0.088388346, %v6389_v36 }
 0x57a   : > { %v1969_v41 = vmul.f32 0.088388346, %v1930_v23  ;;  %v6390_v51 = vpop.f32.mrb[74].mxu1 }
 0x57b   : > { %2007 = vmax.xlane.f32.xlu1 %v8274_v40  ;;  %v1933_v10 = vpop.f32.mrb[75].mxu1  ;;  %v1972_v42 = vmul.f32 0.088388346, %v6390_v51  ;;  %v8289_v60 = vsel %vm7808_vm1, %v1971_v0, -inf }
 0x57c   : > { %v1970_v44 = vmul.f32 0.088388346, %v1933_v10  ;;  %v8279_v27 = vsel %vm7808_vm1, %v1969_v41, -inf }
 0x57d   : > { %2009 = vmax.xlane.f32.xlu0 %v8279_v27  ;;  %v8294_v14 = vsel %vm7808_vm1, %v1972_v42, -inf }
 0x57e   : > { %v8284_v29 = vsel %vm7808_vm1, %v1970_v44, -inf }
 0x57f   : > { %2011 = vmax.xlane.f32.xlu1 %v8284_v29 }
 0x580   : > { %v6393_v35 = vpop.f32.mrb[76].mxu1 }
 0x581   : > { %2013 = vmax.xlane.f32.xlu0 %v8289_v60  ;;  %v1946_v45 = vpop.f32.mrb[77].mxu1  ;;  %v1975_v61 = vmul.f32 0.088388346, %v6393_v35 }
 0x582   : > { %v1973_v47 = vmul.f32 0.088388346, %v1946_v45  ;;  %v6394_v8 = vpop.f32.mrb[78].mxu1 }
 0x583   : > { %2015 = vmax.xlane.f32.xlu1 %v8294_v14  ;;  %v1949_v59 = vpop.f32.mrb[79].mxu1  ;;  %v1976_v20 = vmul.f32 0.088388346, %v6394_v8  ;;  %v8309_v23 = vsel %vm7808_vm1, %v1975_v61, -inf }
 0x584   : > { %v1974_v46 = vmul.f32 0.088388346, %v1949_v59  ;;  %v8299_v39 = vsel %vm7808_vm1, %v1973_v47, -inf }
 0x585   : > { %2017 = vmax.xlane.f32.xlu0 %v8299_v39  ;;  %v8316_v10 = vsel %vm7808_vm1, %v1976_v20, -inf }
 0x586   : > { %v8304_v36 = vsel %vm7808_vm1, %v1974_v46, -inf }
 0x587   : > { %2019 = vmax.xlane.f32.xlu1 %v8304_v36 }
 0x588   : > { %v8311_v41 = vpop.f32.mrb[80].mxu1 }
 0x589   : > { %2021 = vmax.xlane.f32.xlu0 %v8309_v23  ;;  %v2645_v51 = vpop.f32.mrb[81].mxu1 }
 0x58a   : > { %v8318_v0 = vpop.f32.mrb[82].mxu1 }
 0x58b   : > { %2023 = vmax.xlane.f32.xlu1 %v8316_v10  ;;  %v2648_v42 = vpop.f32.mrb[83].mxu1 }
 0x58c   : > { %v3032_v35 = vpack.c.bf16 %v2648_v42, %v2645_v51 }
 0x58e   : > { %6579 = vmatprep.mubr.msk.bf16.mxu1 %vm851_vm0, %v3032_v35 }
 0x590   : > { %v8324_v45 = vpop.f32.mrb[84].mxu1 }
 0x591   : > { %v8326_v47 = vpop.f32.mrb[85].mxu1 }
 0x592   : > { %v8328_v8 = vpop.f32.mrb[86].mxu1 }
 0x593   : > { %v8332_v61 = vpop.f32.mrb[87].mxu1 }
 0x594   : > { %v3034_v46 = vpack.c.bf16 %v8332_v61, %v8326_v47 }
 0x598   : > { %v8336_v20 = vpop.f32.mrb[88].mxu1 }
 0x599   : > { %v8338_v48 = vpop.f32.mrb[89].mxu1 }
 0x59a   : > { %v8340_v51 = vpop.f32.mrb[90].mxu1 }
 0x59b   : > { %v2680_v35 = vpop.f32.mrb[91].mxu1 }
 0x59c   : > { %v3036_v19 = vpack.c.bf16 %v2680_v35, %v8338_v48 }
 0x5a0   : > { %v8345_v13 = vpop.f32.mrb[92].mxu1 }
 0x5a1   : > { %v8347_v28 = vpop.f32.mrb[93].mxu1 }
 0x5a2   : > { %v8349_v4 = vpop.f32.mrb[94].mxu1 }
 0x5a3   : > { %v8353_v61 = vpop.f32.mrb[95].mxu1 }
 0x5a8   : > { %v6517_v63 = vpop.f32.mrb[96].mxu1 }
 0x5a9   : > { %v2807_v54 = vpop.f32.mrb[97].mxu1 }
 0x5aa   : > { %v6518_v33 = vpop.f32.mrb[98].mxu1 }
 0x5ab   : > { %v3041_v42 = vpack.c.bf16 %v6518_v33, %v6517_v63  ;;  %v2810_v59 = vpop.f32.mrb[99].mxu1 }
 0x5ac   : > { %v3040_v48 = vpack.c.bf16 %v2810_v59, %v2807_v54 }
 0x5ad   : > { %v3076_v58 = vsel %vm851_vm0, %v3041_v42, 0 }
 0x5ae   : > { %v3073_v35 = vsel %vm851_vm0, %v3040_v48, 0  ;;  %6891 = vmatprep.subr.msk.bf16.mxu1 %vm851_vm0, %v3040_v48 }
 0x5af   : > { %6564 = vmatpush3.bf16.xpose.msra.mxu1 %v3073_v35 }
 0x5b0   : > { %6892 = vmatprep.subr.msk.bf16.mxu1 %vm851_vm0, %v3041_v42  ;;  %v6521_v44 = vpop.f32.mrb[100].mxu1 }
 0x5b1   : > { %v2823_v47 = vpop.f32.mrb[101].mxu1 }
 0x5b2   : > { %v6522_v50 = vpop.f32.mrb[102].mxu1 }
 0x5b3   : > { %v3043_v38 = vpack.c.bf16 %v6522_v50, %v6521_v44  ;;  %v2826_v34 = vpop.f32.mrb[103].mxu1 }
 0x5b4   : > { %v3042_v32 = vpack.c.bf16 %v2826_v34, %v2823_v47 }
 0x5b5   : > { %v3082_v34 = vsel %vm851_vm0, %v3043_v38, 0 }
 0x5b6   : > { %v3079_v48 = vsel %vm851_vm0, %v3042_v32, 0 }
 0x5b7   : > { %6566 = vmatpush3.bf16.xpose.msra.mxu1 %v3076_v58 }
 0x5b8   : > { %6893 = vmatprep.subr.msk.bf16.mxu1 %vm851_vm0, %v3042_v32  ;;  %v6525_v33 = vpop.f32.mrb[104].mxu1 }
 0x5b9   : > { %v2839_v54 = vpop.f32.mrb[105].mxu1 }
 0x5ba   : > { %v6526_v63 = vpop.f32.mrb[106].mxu1 }
 0x5bb   : > { %v3045_v59 = vpack.c.bf16 %v6526_v63, %v6525_v33  ;;  %v2842_v26 = vpop.f32.mrb[107].mxu1  ;;  %v9763_v33 = vpack.c.bf16 %v8328_v8, %v8324_v45 }
 0x5bc   : > { %v3044_v35 = vpack.c.bf16 %v2842_v26, %v2839_v54 }
 0x5bd   : > { %v3088_v26 = vsel %vm851_vm0, %v3045_v59, 0 }
 0x5be   : > { %v3085_v47 = vsel %vm851_vm0, %v3044_v35, 0 }
 0x5bf   : > { %6568 = vmatpush3.bf16.xpose.msra.mxu1 %v3079_v48 }
 0x5c0   : > { %6894 = vmatprep.subr.msk.bf16.mxu1 %vm851_vm0, %v3043_v38  ;;  %v6529_v24 = vpop.f32.mrb[108].mxu1  ;;  %v9762_v38 = vpack.c.bf16 %v8318_v0, %v8311_v41  ;;  %v9764_v41 = vpack.c.bf16 %v8340_v51, %v8336_v20 }
 0x5c1   : > { %v2855_v50 = vpop.f32.mrb[109].mxu1 }
 0x5c2   : > { %v6530_v44 = vpop.f32.mrb[110].mxu1 }
 0x5c3   : > { %v3047_v18 = vpack.c.bf16 %v6530_v44, %v6529_v24  ;;  %v2858_v42 = vpop.f32.mrb[111].mxu1 }
 0x5c4   : > { %v3046_v58 = vpack.c.bf16 %v2858_v42, %v2855_v50 }
 0x5c5   : > { %v3094_v24 = vsel %vm851_vm0, %v3047_v18, 0 }
 0x5c6   : > { %v3091_v32 = vsel %vm851_vm0, %v3046_v58, 0 }
 0x5c7   : > { %6570 = vmatpush3.bf16.xpose.msra.mxu1 %v3082_v34 }
 0x5c8   : > { %6895 = vmatprep.subr.msk.bf16.mxu1 %vm851_vm0, %v3044_v35 }
 0x5cf   : > { %6572 = vmatpush3.bf16.xpose.msra.mxu1 %v3085_v47 }
 0x5d0   : > { %6896 = vmatprep.subr.msk.bf16.mxu1 %vm851_vm0, %v3045_v59 }
 0x5d7   : > { %6574 = vmatpush3.bf16.xpose.msra.mxu1 %v3088_v26 }
 0x5d8   : > { %6897 = vmatprep.subr.msk.bf16.mxu1 %vm851_vm0, %v3046_v58 }
 0x5df   : > { %6576 = vmatpush3.bf16.xpose.msra.mxu1 %v3091_v32  ;;  %v9766_v32 = vpack.c.bf16 %v8349_v4, %v8345_v13 }
 0x5e0   : > { %6898 = vmatprep.subr.msk.bf16.mxu1 %vm851_vm0, %v3047_v18 }
 0x5e7   : > { %6578 = vmatpush3.bf16.xpose.msra.mxu1 %v3094_v24 }
 0x5ee   : > { %6580 = vmatmul.mubr.msk.bf16.vlgmr.msra.gmra.mrb[112].mxu1 %vm851_vm0, %v9762_v38 }
 0x5ef   : > { %6583 = vmatprep.mubr.msk.bf16.mxu1 %vm851_vm0, %v3034_v46 }
 0x5f6   : > { %6584 = vmatmul.mubr.msk.bf16.gmra.mrb[116].mxu1 %vm851_vm0, %v9763_v33 }
 0x5f7   : > { %6587 = vmatprep.mubr.msk.bf16.mxu1 %vm851_vm0, %v3036_v19  ;;  %v9765_v19 = vpack.c.bf16 %v8353_v61, %v8347_v28 }
 0x5fa   : > { %v1994_v54 = vpop.xlane.xlu0 %1993 }
 0x5fb   : > { %v2025_v63 = vsub.f32 %v8239_v43, %v1994_v54  ;;  %v6349_v43 = vpop.f32.mrb[48].mxu0 }
 0x5fc   : > { %v1996_v59 = vpop.xlane.xlu1 %1995  ;;  %v1737_v46 = vpop.f32.mrb[49].mxu0 }
 0x5fd   : > { %v2041_v18 = vmul.f32 1.442695, %v2025_v63  ;;  %v2026_v48 = vsub.f32 %v8244_v56, %v1996_v59  ;;  %v6350_v44 = vpop.f32.mrb[50].mxu0 }
 0x5fe   : > { %v1998_v35 = vpop.xlane.xlu0 %1997  ;;  %6588 = vmatmul.mubr.msk.bf16.gmra.mrb[120].mxu1 %vm851_vm0, %v9764_v41  ;;  %v2163_v51 = vpack.c.bf16 %v6350_v44, %v6349_v43  ;;  %v1740_v42 = vpop.f32.mrb[51].mxu0 }
 0x5ff   : > { %7122 = vpow2.f32 %v2041_v18  ;;  %v2043_v0 = vmul.f32 1.442695, %v2026_v48  ;;  %v2027_v45 = vsub.f32 %v8249_v31, %v1998_v35  ;;  %6591 = vmatprep.mubr.msk.bf16.mxu1 %vm851_vm0, %v9765_v19  ;;  %v2162_v58 = vpack.c.bf16 %v1740_v42, %v1737_v46  ;;  %v6353_v38 = vpop.f32.mrb[52].mxu0 }
 0x600   : > { %v2000_v8 = vpop.xlane.xlu1 %1999  ;;  %v1753_v33 = vpop.f32.mrb[53].mxu0 }
 0x601   : > { %7124 = vpow2.f32 %v2043_v0  ;;  %v2045_v56 = vmul.f32 1.442695, %v2027_v45  ;;  %v2028_v50 = vsub.f32 %v8254_v30, %v2000_v8  ;;  %6395 = vmatprep.subr.bf16.mxu0 %v2162_v58  ;;  %v6354_v4 = vpop.f32.mrb[54].mxu0 }
 0x602   : > { %v2002_v20 = vpop.xlane.xlu0 %2001  ;;  %6396 = vmatpush3.bf16.msra.mxu0 %v2162_v58  ;;  %v2165_v59 = vpack.c.bf16 %v6354_v4, %v6353_v38  ;;  %v1756_v18 = vpop.f32.mrb[55].mxu0 }
 0x603   : > { %7126 = vpow2.f32 %v2045_v56  ;;  %v2047_v34 = vmul.f32 1.442695, %v2028_v50  ;;  %v2029_v31 = vsub.f32 %v8259_v15, %v2002_v20  ;;  %6397 = vmatprep.subr.bf16.mxu0 %v2163_v51  ;;  %v2164_v41 = vpack.c.bf16 %v1756_v18, %v1753_v33  ;;  %v6357_v56 = vpop.f32.mrb[56].mxu0 }
 0x604   : > { %v2004_v47 = vpop.xlane.xlu1 %2003  ;;  %v1769_v44 = vpop.f32.mrb[57].mxu0 }
 0x605   : > { %7128 = vpow2.f32 %v2047_v34  ;;  %v2049_v28 = vmul.f32 1.442695, %v2029_v31  ;;  %v2030_v61 = vsub.f32 %v8264_v37, %v2004_v47  ;;  %v6358_v42 = vpop.f32.mrb[58].mxu0 }
 0x606   : > { %v2006_v26 = vpop.xlane.xlu0 %2005  ;;  %6592 = vmatmul.mubr.msk.bf16.gmra.mrb[124].mxu1 %vm851_vm0, %v9766_v32  ;;  %6398 = vmatpush3.bf16.msra.mxu0 %v2163_v51  ;;  %v2167_v31 = vpack.c.bf16 %v6358_v42, %v6357_v56  ;;  %v1772_v58 = vpop.f32.mrb[59].mxu0 }
 0x607   : > { %7130 = vpow2.f32 %v2049_v28  ;;  %v2051_v30 = vmul.f32 1.442695, %v2030_v61  ;;  %v2031_v24 = vsub.f32 %v8269_v21, %v2006_v26  ;;  %6663 = vmatprep.mubr.bf16.mxu1 %v7631_v6  ;;  %6399 = vmatprep.subr.bf16.mxu0 %v2164_v41  ;;  %v2166_v61 = vpack.c.bf16 %v1772_v58, %v1769_v44  ;;  %v6361_v33 = vpop.f32.mrb[60].mxu0 }
 0x608   : > { %v2008_v15 = vpop.xlane.xlu1 %2007 }
 0x609   : > { %v8403_v54 = vpop.eup %7122  ;;  %7132 = vpow2.f32 %v2051_v30  ;;  %v2053_v37 = vmul.f32 1.442695, %v2031_v24  ;;  %v2032_v63 = vsub.f32 %v8274_v40, %v2008_v15 }
 0x60a   : > { %v2010_v13 = vpop.xlane.xlu0 %2009  ;;  %2073 = vadd.xlane.f32.xlu0 %v8403_v54  ;;  %6400 = vmatpush3.bf16.msra.mxu0 %v2164_v41 }
 0x60b   : > { %v8407_v21 = vpop.eup %7124  ;;  %7134 = vpow2.f32 %v2053_v37  ;;  %v2055_v48 = vmul.f32 1.442695, %v2032_v63  ;;  %v2033_v35 = vsub.f32 %v8279_v27, %v2010_v13  ;;  %6401 = vmatprep.subr.bf16.mxu0 %v2165_v59  ;;  %v1785_v63 = vpop.f32.mrb[61].mxu0 }
 0x60c   : > { %v2012_v0 = vpop.xlane.xlu1 %2011  ;;  %2075 = vadd.xlane.f32.xlu1 %v8407_v21 }
 0x60d   : > { %v8411_v45 = vpop.eup %7126  ;;  %7136 = vpow2.f32 %v2055_v48  ;;  %v2057_v40 = vmul.f32 1.442695, %v2033_v35  ;;  %v2034_v19 = vsub.f32 %v8284_v29, %v2012_v0 }
 0x60e   : > { %v2014_v43 = vpop.xlane.xlu0 %2013  ;;  %2077 = vadd.xlane.f32.xlu0 %v8411_v45  ;;  %6402 = vmatpush3.bf16.msra.mxu0 %v2165_v59  ;;  %v6362_v59 = vpop.f32.mrb[62].mxu0 }
 0x60f   : > { %v8415_v8 = vpop.eup %7128  ;;  %7138 = vpow2.f32 %v2057_v40  ;;  %v2059_v46 = vmul.f32 1.442695, %v2034_v19  ;;  %v2035_v27 = vsub.f32 %v8289_v60, %v2014_v43  ;;  %6403 = vmatprep.subr.bf16.mxu0 %v2166_v61  ;;  %v2169_v18 = vpack.c.bf16 %v6362_v59, %v6361_v33  ;;  %v1788_v48 = vpop.f32.mrb[63].mxu0 }
 0x610   : > { %v2016_v50 = vpop.xlane.xlu1 %2015  ;;  %2079 = vadd.xlane.f32.xlu1 %v8415_v8  ;;  %v2168_v41 = vpack.c.bf16 %v1788_v48, %v1785_v63 }
 0x611   : > { %v8419_v20 = vpop.eup %7130  ;;  %7140 = vpow2.f32 %v2059_v46  ;;  %v2061_v29 = vmul.f32 1.442695, %v2035_v27  ;;  %v2036_v51 = vsub.f32 %v8294_v14, %v2016_v50 }
 0x612   : > { %2081 = vadd.xlane.f32.xlu0 %v8419_v20  ;;  %v2018_v34 = vpop.xlane.xlu0 %2017  ;;  %6404 = vmatpush3.bf16.msra.mxu0 %v2166_v61 }
 0x613   : > { %v8423_v60 = vpop.eup %7132  ;;  %7142 = vpow2.f32 %v2061_v29  ;;  %v2063_v47 = vmul.f32 1.442695, %v2036_v51  ;;  %v2037_v28 = vsub.f32 %v8299_v39, %v2018_v34  ;;  %6405 = vmatprep.subr.bf16.mxu0 %v2167_v31 }
 0x614   : > { %2083 = vadd.xlane.f32.xlu1 %v8423_v60  ;;  %v2020_v26 = vpop.xlane.xlu1 %2019 }
 0x615   : > { %v8427_v32 = vpop.eup %7134  ;;  %7144 = vpow2.f32 %v2063_v47  ;;  %v2065_v14 = vmul.f32 1.442695, %v2037_v28  ;;  %v2038_v30 = vsub.f32 %v8304_v36, %v2020_v26 }
 0x616   : > { %2085 = vadd.xlane.f32.xlu0 %v8427_v32  ;;  %v2022_v24 = vpop.xlane.xlu0 %2021  ;;  %6406 = vmatpush3.bf16.msra.mxu0 %v2167_v31 }
 0x617   : > { %v8431_v38 = vpop.eup %7136  ;;  %7146 = vpow2.f32 %v2065_v14  ;;  %v2067_v15 = vmul.f32 1.442695, %v2038_v30  ;;  %v2039_v39 = vsub.f32 %v8309_v23, %v2022_v24  ;;  %6407 = vmatprep.subr.bf16.mxu0 %v2168_v41 }
 0x618   : > { %2087 = vadd.xlane.f32.xlu1 %v8431_v38  ;;  %v2024_v37 = vpop.xlane.xlu1 %2023 }
 0x619   : > { %v8435_v4 = vpop.eup %7138  ;;  %7148 = vpow2.f32 %v2067_v15  ;;  %v2069_v36 = vmul.f32 1.442695, %v2039_v39  ;;  %v2040_v13 = vsub.f32 %v8316_v10, %v2024_v37 }
 0x61a   : > { %2089 = vadd.xlane.f32.xlu0 %v8435_v4  ;;  %6408 = vmatpush3.bf16.msra.mxu0 %v2168_v41 }
 0x61b   : > { %v8439_v35 = vpop.eup %7140  ;;  %7150 = vpow2.f32 %v2069_v36  ;;  %v2071_v23 = vmul.f32 1.442695, %v2040_v13  ;;  %6409 = vmatprep.subr.bf16.mxu0 %v2169_v18 }
 0x61c   : > { %2091 = vadd.xlane.f32.xlu1 %v8439_v35 }
 0x61d   : > { %v8442_v0 = vpop.eup %7142  ;;  %7152 = vpow2.f32 %v2071_v23 }
 0x61e   : > { %2093 = vadd.xlane.f32.xlu0 %v8442_v0  ;;  %6410 = vmatpush3.bf16.msra.mxu0 %v2169_v18 }
 0x61f   : > { %v8445_v10 = vpop.eup %7144 }
 0x620   : > { %2095 = vadd.xlane.f32.xlu1 %v8445_v10 }
 0x621   : > { %v8448_v40 = vpop.eup %7146 }
 0x622   : > { %2097 = vadd.xlane.f32.xlu0 %v8448_v40 }
 0x623   : > { %v8451_v19 = vpop.eup %7148 }
 0x624   : > { %2099 = vadd.xlane.f32.xlu1 %v8451_v19 }
 0x625   : > { %v8454_v43 = vpop.eup %7150 }
 0x626   : > { %2101 = vadd.xlane.f32.xlu0 %v8454_v43 }
 0x627   : > { %v8457_v46 = vpop.eup %7152 }
 0x628   : > { %2103 = vadd.xlane.f32.xlu1 %v8457_v46 }
 0x697   : > { %v2074_v27 = vpop.xlane.xlu0 %2073 }
 0x698   : > { %7154 = vrcp.f32 %v2074_v27 }
 0x699   : > { %v2076_v56 = vpop.xlane.xlu1 %2075 }
 0x69a   : > { %7156 = vrcp.f32 %v2076_v56 }
 0x69b   : > { %v2078_v50 = vpop.xlane.xlu0 %2077 }
 0x69c   : > { %7158 = vrcp.f32 %v2078_v50 }
 0x69d   : > { %v2080_v44 = vpop.xlane.xlu1 %2079 }
 0x69e   : > { %7160 = vrcp.f32 %v2080_v44 }
 0x69f   : > { %v2082_v29 = vpop.xlane.xlu0 %2081 }
 0x6a0   : > { %7162 = vrcp.f32 %v2082_v29 }
 0x6a1   : > { %v2084_v51 = vpop.xlane.xlu1 %2083 }
 0x6a2   : > { %v7155_v42 = vpop.eup %7154  ;;  %7164 = vrcp.f32 %v2084_v51 }
 0x6a3   : > { %v2086_v34 = vpop.xlane.xlu0 %2085  ;;  %v2121_v31 = vmul.f32 %v7155_v42, %v8403_v54 }
 0x6a4   : > { %v7157_v58 = vpop.eup %7156  ;;  %7166 = vrcp.f32 %v2086_v34 }
 0x6a5   : > { %v2088_v47 = vpop.xlane.xlu1 %2087  ;;  %v2122_v28 = vmul.f32 %v7157_v58, %v8407_v21  ;;  %5474 = vst [vmem:[%s7998_s26 + $0x80] sm:$0xff] %v2121_v31 }
 0x6a6   : > { %v7159_v61 = vpop.eup %7158  ;;  %7168 = vrcp.f32 %v2088_v47 }
 0x6a7   : > { %v2123_v26 = vmul.f32 %v7159_v61, %v8411_v45  ;;  %v2090_v14 = vpop.xlane.xlu0 %2089  ;;  %5475 = vst [vmem:[%s7998_s26 + $0x88] sm:$0xff] %v2122_v28  ;;  %v2154_v30 = vpack.c.bf16 %v2122_v28, %v2121_v31 }
 0x6a8   : > { %v7161_v24 = vpop.eup %7160  ;;  %7170 = vrcp.f32 %v2090_v14 }
 0x6a9   : > { %5476 = vst [vmem:[%s7998_s26 + $0x90] sm:$0xff] %v2123_v26  ;;  %v2124_v54 = vmul.f32 %v7161_v24, %v8415_v8  ;;  %6411 = vmatprep.mubr.bf16.mxu0 %v2154_v30  ;;  %v2092_v15 = vpop.xlane.xlu1 %2091 }
 0x6aa   : > { %v7163_v39 = vpop.eup %7162  ;;  %7172 = vrcp.f32 %v2092_v15 }
 0x6ab   : > { %5477 = vst [vmem:[%s7998_s26 + $0x98] sm:$0xff] %v2124_v54  ;;  %v2094_v21 = vpop.xlane.xlu0 %2093  ;;  %v2155_v33 = vpack.c.bf16 %v2124_v54, %v2123_v26  ;;  %v2125_v37 = vmul.f32 %v7163_v39, %v8419_v20 }
 0x6ac   : > { %v7165_v45 = vpop.eup %7164  ;;  %7174 = vrcp.f32 %v2094_v21 }
 0x6ad   : > { %v2096_v63 = vpop.xlane.xlu1 %2095  ;;  %6412 = vmatmul.mubr.bf16.vlgmr.msra.gmra.mrb[64].mxu0 %v2155_v33  ;;  %v2126_v36 = vmul.f32 %v7165_v45, %v8423_v60  ;;  %5478 = vst [vmem:[%s7998_s26 + $0xa0] sm:$0xff] %v2125_v37 }
 0x6ae   : > { %v7167_v8 = vpop.eup %7166  ;;  %7176 = vrcp.f32 %v2096_v63 }
 0x6af   : > { %v2098_v13 = vpop.xlane.xlu0 %2097  ;;  %5479 = vst [vmem:[%s7998_s26 + $0xa8] sm:$0xff] %v2126_v36  ;;  %v2156_v59 = vpack.c.bf16 %v2126_v36, %v2125_v37  ;;  %v2127_v18 = vmul.f32 %v7167_v8, %v8427_v32 }
 0x6b0   : > { %v7169_v48 = vpop.eup %7168  ;;  %7178 = vrcp.f32 %v2098_v13 }
 0x6b1   : > { %v2100_v20 = vpop.xlane.xlu1 %2099  ;;  %6415 = vmatprep.mubr.bf16.mxu0 %v2156_v59  ;;  %v2128_v23 = vmul.f32 %v7169_v48, %v8431_v38  ;;  %5480 = vst [vmem:[%s7998_s26 + $0xb0] sm:$0xff] %v2127_v18 }
 0x6b2   : > { %v7171_v41 = vpop.eup %7170  ;;  %7180 = vrcp.f32 %v2100_v20 }
 0x6b3   : > { %v2102_v60 = vpop.xlane.xlu0 %2101  ;;  %5481 = vst [vmem:[%s7998_s26 + $0xb8] sm:$0xff] %v2128_v23  ;;  %v2157_v27 = vpack.c.bf16 %v2128_v23, %v2127_v18  ;;  %v2129_v56 = vmul.f32 %v7171_v41, %v8435_v4 }
 0x6b4   : > { %v7173_v50 = vpop.eup %7172  ;;  %7182 = vrcp.f32 %v2102_v60 }
 0x6b5   : > { %v2104_v32 = vpop.xlane.xlu1 %2103  ;;  %6416 = vmatmul.mubr.bf16.gmra.mrb[68].mxu0 %v2157_v27  ;;  %v2130_v44 = vmul.f32 %v7173_v50, %v8439_v35  ;;  %5482 = vst [vmem:[%s7998_s26 + $0xc0] sm:$0xff] %v2129_v56 }
 0x6b6   : > { %v7175_v29 = vpop.eup %7174  ;;  %7184 = vrcp.f32 %v2104_v32 }
 0x6b7   : > { %5483 = vst [vmem:[%s7998_s26 + $0xc8] sm:$0xff] %v2130_v44  ;;  %v2158_v38 = vpack.c.bf16 %v2130_v44, %v2129_v56  ;;  %v2131_v51 = vmul.f32 %v7175_v29, %v8442_v0 }
 0x6b8   : > { %v7177_v42 = vpop.eup %7176 }
 0x6b9   : > { %6419 = vmatprep.mubr.bf16.mxu0 %v2158_v38  ;;  %v2132_v4 = vmul.f32 %v7177_v42, %v8445_v10  ;;  %5484 = vst [vmem:[%s7998_s26 + $0xd0] sm:$0xff] %v2131_v51 }
 0x6ba   : > { %v7179_v34 = vpop.eup %7178 }
 0x6bb   : > { %5485 = vst [vmem:[%s7998_s26 + $0xd8] sm:$0xff] %v2132_v4  ;;  %v2159_v31 = vpack.c.bf16 %v2132_v4, %v2131_v51  ;;  %v2133_v35 = vmul.f32 %v7179_v34, %v8448_v40 }
 0x6bc   : > { %v7181_v58 = vpop.eup %7180 }
 0x6bd   : > { %6420 = vmatmul.mubr.bf16.gmra.mrb[72].mxu0 %v2159_v31  ;;  %v2134_v47 = vmul.f32 %v7181_v58, %v8451_v19  ;;  %5486 = vst [vmem:[%s7998_s26 + $0xe0] sm:$0xff] %v2133_v35 }
 0x6be   : > { %v7183_v28 = vpop.eup %7182 }
 0x6bf   : > { %5487 = vst [vmem:[%s7998_s26 + $0xe8] sm:$0xff] %v2134_v47  ;;  %v2160_v0 = vpack.c.bf16 %v2134_v47, %v2133_v35  ;;  %v2135_v61 = vmul.f32 %v7183_v28, %v8454_v43 }
 0x6c0   : > { %v7185_v26 = vpop.eup %7184 }
 0x6c1   : > { %6423 = vmatprep.mubr.bf16.mxu0 %v2160_v0  ;;  %v6581_v10 = vpop.f32.mrb[112].mxu1  ;;  %v2136_v14 = vmul.f32 %v7185_v26, %v8457_v46  ;;  %5488 = vst [vmem:[%s7998_s26 + $0xf0] sm:$0xff] %v2135_v61 }
 0x6c2   : > { %v3130_v30 = vpop.f32.mrb[113].mxu1  ;;  %v3195_v24 = vmul.f32 0.088388346, %v6581_v10 }
 0x6c3   : > { %v3193_v40 = vmul.f32 0.088388346, %v3130_v30  ;;  %v6582_v54 = vpop.f32.mrb[114].mxu1  ;;  %5489 = vst [vmem:[%s7998_s26 + $0xf8] sm:$0xff] %v2136_v14  ;;  %v2161_v15 = vpack.c.bf16 %v2136_v14, %v2135_v61 }
 0x6c4   : > { %v3133_v39 = vpop.f32.mrb[115].mxu1  ;;  %v3196_v19 = vmul.f32 0.088388346, %v6582_v54  ;;  %v8503_v46 = vsel %vm7808_vm1, %v3195_v24, -inf  ;;  %v7018_v54 = vld [vmem:[%s9731_s5 + $0x10] sm:$0xff]  }
 0x6c5   : > { %v3194_v21 = vmul.f32 0.088388346, %v3133_v39  ;;  %6424 = vmatmul.mubr.bf16.gmra.mrb[76].mxu0 %v2161_v15  ;;  %v8494_v33 = vsel %vm7808_vm1, %v3193_v40, -inf  ;;  %6427 = vmatprep.subr.bf16.mxu0 %v7018_v54  ;;  %v7019_v15 = vld [vmem:[%s9731_s5 + $0x18] sm:$0xff]   ;;  %v8581_v39 = vld [vmem:[%s9731_s5] sm:$0xff]  }
 0x6c6   : > { %3225 = vmax.xlane.f32.xlu0 %v8494_v33  ;;  %v8508_v45 = vsel %vm7808_vm1, %v3196_v19, -inf  ;;  %6428 = vmatpush3.bf16.msra.mxu0 %v7018_v54 }
 0x6c7   : > { %v8499_v43 = vsel %vm7808_vm1, %v3194_v21, -inf  ;;  %6429 = vmatprep.subr.bf16.mxu0 %v7019_v15 }
 0x6c8   : > { %3227 = vmax.xlane.f32.xlu1 %v8499_v43 }
 0x6c9   : > { %v6585_v37 = vpop.f32.mrb[116].mxu1 }
 0x6ca   : > { %3229 = vmax.xlane.f32.xlu0 %v8503_v46  ;;  %v3146_v63 = vpop.f32.mrb[117].mxu1  ;;  %v3199_v36 = vmul.f32 0.088388346, %v6585_v37  ;;  %6430 = vmatpush3.bf16.msra.mxu0 %v7019_v15 }
 0x6cb   : > { %v3197_v8 = vmul.f32 0.088388346, %v3146_v63  ;;  %v6586_v13 = vpop.f32.mrb[118].mxu1  ;;  %6447 = vmatprep.subr.bf16.mxu0 %v8581_v39 }
 0x6cc   : > { %v3149_v59 = vpop.f32.mrb[119].mxu1  ;;  %3231 = vmax.xlane.f32.xlu1 %v8508_v45  ;;  %v3200_v18 = vmul.f32 0.088388346, %v6586_v13  ;;  %v8523_v41 = vsel %vm7808_vm1, %v3199_v36, -inf }
 0x6cd   : > { %v3198_v48 = vmul.f32 0.088388346, %v3149_v59  ;;  %v8514_v20 = vsel %vm7808_vm1, %v3197_v8, -inf }
 0x6ce   : > { %3233 = vmax.xlane.f32.xlu0 %v8514_v20  ;;  %v8528_v27 = vsel %vm7808_vm1, %v3200_v18, -inf }
 0x6cf   : > { %v8519_v23 = vsel %vm7808_vm1, %v3198_v48, -inf }
 0x6d0   : > { %3235 = vmax.xlane.f32.xlu1 %v8519_v23 }
 0x6d1   : > { %v6589_v60 = vpop.f32.mrb[120].mxu1 }
 0x6d2   : > { %3237 = vmax.xlane.f32.xlu0 %v8523_v41  ;;  %v3162_v56 = vpop.f32.mrb[121].mxu1  ;;  %v3203_v50 = vmul.f32 0.088388346, %v6589_v60 }
 0x6d3   : > { %v3201_v32 = vmul.f32 0.088388346, %v3162_v56  ;;  %v6590_v44 = vpop.f32.mrb[122].mxu1 }
 0x6d4   : > { %v3165_v29 = vpop.f32.mrb[123].mxu1  ;;  %3239 = vmax.xlane.f32.xlu1 %v8528_v27  ;;  %v3204_v38 = vmul.f32 0.088388346, %v6590_v44  ;;  %v8543_v34 = vsel %vm7808_vm1, %v3203_v50, -inf }
 0x6d5   : > { %v3202_v51 = vmul.f32 0.088388346, %v3165_v29  ;;  %v8534_v42 = vsel %vm7808_vm1, %v3201_v32, -inf }
 0x6d6   : > { %3241 = vmax.xlane.f32.xlu0 %v8534_v42  ;;  %v8548_v35 = vsel %vm7808_vm1, %v3204_v38, -inf }
 0x6d7   : > { %v8539_v4 = vsel %vm7808_vm1, %v3202_v51, -inf }
 0x6d8   : > { %3243 = vmax.xlane.f32.xlu1 %v8539_v4 }
 0x6d9   : > { %v6593_v31 = vpop.f32.mrb[124].mxu1 }
 0x6da   : > { %3245 = vmax.xlane.f32.xlu0 %v8543_v34  ;;  %v3178_v58 = vpop.f32.mrb[125].mxu1  ;;  %v3207_v47 = vmul.f32 0.088388346, %v6593_v31 }
 0x6db   : > { %v3205_v28 = vmul.f32 0.088388346, %v3178_v58  ;;  %v6594_v0 = vpop.f32.mrb[126].mxu1 }
 0x6dc   : > { %v3181_v61 = vpop.f32.mrb[127].mxu1  ;;  %3247 = vmax.xlane.f32.xlu1 %v8548_v35  ;;  %v3208_v26 = vmul.f32 0.088388346, %v6594_v0  ;;  %v8563_v24 = vsel %vm7808_vm1, %v3207_v47, -inf }
 0x6dd   : > { %v3206_v10 = vmul.f32 0.088388346, %v3181_v61  ;;  %v8554_v14 = vsel %vm7808_vm1, %v3205_v28, -inf }
 0x6de   : > { %3249 = vmax.xlane.f32.xlu0 %v8554_v14  ;;  %v8568_v40 = vsel %vm7808_vm1, %v3208_v26, -inf }
 0x6df   : > { %v8559_v30 = vsel %vm7808_vm1, %v3206_v10, -inf }
 0x6e0   : > { %3251 = vmax.xlane.f32.xlu1 %v8559_v30 }
 0x6e2   : > { %3253 = vmax.xlane.f32.xlu0 %v8563_v24 }
 0x6e4   : > { %3255 = vmax.xlane.f32.xlu1 %v8568_v40 }
 0x753   : > { %v3226_v19 = vpop.xlane.xlu0 %3225 }
 0x754   : > { %v3257_v21 = vsub.f32 %v8494_v33, %v3226_v19 }
 0x755   : > { %v3228_v37 = vpop.xlane.xlu1 %3227 }
 0x756   : > { %v3273_v63 = vmul.f32 1.442695, %v3257_v21  ;;  %v3258_v36 = vsub.f32 %v8499_v43, %v3228_v37 }
 0x757   : > { %v3230_v8 = vpop.xlane.xlu0 %3229 }
 0x758   : > { %7186 = vpow2.f32 %v3273_v63  ;;  %v3275_v13 = vmul.f32 1.442695, %v3258_v36  ;;  %v3259_v59 = vsub.f32 %v8503_v46, %v3230_v8 }
 0x759   : > { %v3232_v18 = vpop.xlane.xlu1 %3231 }
 0x75a   : > { %7188 = vpow2.f32 %v3275_v13  ;;  %v3277_v48 = vmul.f32 1.442695, %v3259_v59  ;;  %v3260_v60 = vsub.f32 %v8508_v45, %v3232_v18 }
 0x75b   : > { %v3234_v56 = vpop.xlane.xlu0 %3233 }
 0x75c   : > { %7190 = vpow2.f32 %v3277_v48  ;;  %v3279_v50 = vmul.f32 1.442695, %v3260_v60  ;;  %v3261_v32 = vsub.f32 %v8514_v20, %v3234_v56 }
 0x75d   : > { %v3236_v33 = vpop.xlane.xlu1 %3235 }
 0x75e   : > { %7192 = vpow2.f32 %v3279_v50  ;;  %v3281_v44 = vmul.f32 1.442695, %v3261_v32  ;;  %v3262_v43 = vsub.f32 %v8519_v23, %v3236_v33 }
 0x75f   : > { %v3238_v29 = vpop.xlane.xlu0 %3237 }
 0x760   : > { %7194 = vpow2.f32 %v3281_v44  ;;  %v3283_v38 = vmul.f32 1.442695, %v3262_v43  ;;  %v3263_v46 = vsub.f32 %v8523_v41, %v3238_v29 }
 0x761   : > { %v3240_v51 = vpop.xlane.xlu1 %3239 }
 0x762   : > { %v8591_v31 = vpop.eup %7186  ;;  %7196 = vpow2.f32 %v3283_v38  ;;  %v3285_v45 = vmul.f32 1.442695, %v3263_v46  ;;  %v3264_v58 = vsub.f32 %v8528_v27, %v3240_v51 }
 0x763   : > { %v3242_v47 = vpop.xlane.xlu0 %3241  ;;  %3305 = vadd.xlane.f32.xlu0 %v8591_v31 }
 0x764   : > { %v8595_v20 = vpop.eup %7188  ;;  %7198 = vpow2.f32 %v3285_v45  ;;  %v3287_v28 = vmul.f32 1.442695, %v3264_v58  ;;  %v3265_v23 = vsub.f32 %v8534_v42, %v3242_v47 }
 0x765   : > { %3307 = vadd.xlane.f32.xlu1 %v8595_v20  ;;  %v3244_v0 = vpop.xlane.xlu1 %3243 }
 0x766   : > { %v8599_v41 = vpop.eup %7190  ;;  %7200 = vpow2.f32 %v3287_v28  ;;  %v3289_v61 = vmul.f32 1.442695, %v3265_v23  ;;  %v3266_v26 = vsub.f32 %v8539_v4, %v3244_v0  ;;  %v7021_v0 = vld [vmem:[%s9731_s5 + $0x8] sm:$0xff]  }
 0x767   : > { %v3246_v10 = vpop.xlane.xlu0 %3245  ;;  %3309 = vadd.xlane.f32.xlu0 %v8599_v41 }
 0x768   : > { %v8603_v27 = vpop.eup %7192  ;;  %7202 = vpow2.f32 %v3289_v61  ;;  %v3291_v54 = vmul.f32 1.442695, %v3266_v26  ;;  %v3267_v15 = vsub.f32 %v8543_v34, %v3246_v10  ;;  %v7022_v10 = vld [vmem:[%s9730_s4 + $0x80] sm:$0xff]  }
 0x769   : > { %3311 = vadd.xlane.f32.xlu1 %v8603_v27  ;;  %v3248_v42 = vpop.xlane.xlu1 %3247 }
 0x76a   : > { %v8607_v19 = vpop.eup %7194  ;;  %7204 = vpow2.f32 %v3291_v54  ;;  %v3293_v21 = vmul.f32 1.442695, %v3267_v15  ;;  %v3268_v37 = vsub.f32 %v8548_v35, %v3248_v42 }
 0x76b   : > { %3313 = vadd.xlane.f32.xlu0 %v8607_v19  ;;  %v3250_v4 = vpop.xlane.xlu0 %3249 }
 0x76c   : > { %v8611_v63 = vpop.eup %7196  ;;  %7206 = vpow2.f32 %v3293_v21  ;;  %v3295_v36 = vmul.f32 1.442695, %v3268_v37  ;;  %v3269_v8 = vsub.f32 %v8554_v14, %v3250_v4 }
 0x76d   : > { %3315 = vadd.xlane.f32.xlu1 %v8611_v63  ;;  %v3252_v34 = vpop.xlane.xlu1 %3251 }
 0x76e   : > { %v8615_v13 = vpop.eup %7198  ;;  %7208 = vpow2.f32 %v3295_v36  ;;  %v3297_v59 = vmul.f32 1.442695, %v3269_v8  ;;  %v3270_v18 = vsub.f32 %v8559_v30, %v3252_v34 }
 0x76f   : > { %3317 = vadd.xlane.f32.xlu0 %v8615_v13  ;;  %v3254_v35 = vpop.xlane.xlu0 %3253 }
 0x770   : > { %v8619_v48 = vpop.eup %7200  ;;  %7210 = vpow2.f32 %v3297_v59  ;;  %v3299_v60 = vmul.f32 1.442695, %v3270_v18  ;;  %v3271_v56 = vsub.f32 %v8563_v24, %v3254_v35 }
 0x771   : > { %3319 = vadd.xlane.f32.xlu1 %v8619_v48  ;;  %v3256_v14 = vpop.xlane.xlu1 %3255 }
 0x772   : > { %v8623_v50 = vpop.eup %7202  ;;  %7212 = vpow2.f32 %v3299_v60  ;;  %v3301_v32 = vmul.f32 1.442695, %v3271_v56  ;;  %v3272_v33 = vsub.f32 %v8568_v40, %v3256_v14 }
 0x773   : > { %3321 = vadd.xlane.f32.xlu0 %v8623_v50 }
 0x774   : > { %v8627_v30 = vpop.eup %7204  ;;  %7214 = vpow2.f32 %v3301_v32  ;;  %v3303_v44 = vmul.f32 1.442695, %v3272_v33  ;;  %v9767_v32 = vpack.c.bf16 %v8097_v22, %v8091_v17  ;;  %v7023_v33 = vld [vmem:[%s9730_s4 + $0x88] sm:$0xff]   ;;  %v7024_v17 = vld [vmem:[%s9730_s4 + $0x90] sm:$0xff]   ;;  %v7025_v22 = vld [vmem:[%s9730_s4 + $0x98] sm:$0xff]  }
 0x775   : > { %3323 = vadd.xlane.f32.xlu1 %v8627_v30 }
 0x776   : > { %v8630_v43 = vpop.eup %7206  ;;  %7216 = vpow2.f32 %v3303_v44  ;;  %v9768_v44 = vpack.c.bf16 %v8093_v53, %v8089_v49  ;;  %v9770_v49 = vpack.c.bf16 %v8105_v57, %v8101_v55  ;;  %v9771_v53 = vpack.c.bf16 %v8121_v3, %v8115_v1  ;;  %v7028_v1 = vld [vmem:[%s9730_s4 + $0xb0] sm:$0xff]   ;;  %v7029_v3 = vld [vmem:[%s9730_s4 + $0xb8] sm:$0xff]  }
 0x777   : > { %3325 = vadd.xlane.f32.xlu0 %v8630_v43  ;;  %v9772_v55 = vpack.c.bf16 %v8117_v2, %v8113_v25  ;;  %v9773_v57 = vpack.c.bf16 %v8133_v11, %v8127_v5  ;;  %v9774_v25 = vpack.c.bf16 %v8129_v7, %v8125_v62  ;;  %v9775_v2 = vld [vmem:[#allocation11_spill] sm:$0xff]  ;;  %v9776_v5 = vld [vmem:[#allocation12_spill] sm:$0xff]  ;;  %v9777_v11 = vld [vmem:[#allocation13_spill] sm:$0xff] }
 0x778   : > { %v8633_v24 = vpop.eup %7208  ;;  %v9780_v62 = vld [vmem:[#allocation16_spill] sm:$0xff] }
 0x779   : > { %3327 = vadd.xlane.f32.xlu1 %v8633_v24 }
 0x77a   : > { %v8636_v29 = vpop.eup %7210 }
 0x77b   : > { %3329 = vadd.xlane.f32.xlu0 %v8636_v29 }
 0x77c   : > { %v8639_v40 = vpop.eup %7212 }
 0x77d   : > { %3331 = vadd.xlane.f32.xlu1 %v8639_v40 }
 0x77e   : > { %v8642_v38 = vpop.eup %7214 }
 0x77f   : > { %3333 = vadd.xlane.f32.xlu0 %v8642_v38 }
 0x780   : > { %v8645_v46 = vpop.eup %7216  ;;  %v6413_v51 = vpop.f32.mrb[64].mxu0 }
 0x781   : > { %3335 = vadd.xlane.f32.xlu1 %v8645_v46  ;;  %v2204_v45 = vpop.f32.mrb[65].mxu0 }
 0x782   : > { %v6414_v58 = vpop.f32.mrb[66].mxu0 }
 0x783   : > { %v2268_v47 = vpack.c.bf16 %v6414_v58, %v6413_v51  ;;  %v2207_v28 = vpop.f32.mrb[67].mxu0  ;;  %v9769_v51 = vpack.c.bf16 %v8109_v12, %v8103_v9  ;;  %v7026_v9 = vld [vmem:[%s9730_s4 + $0xa0] sm:$0xff]   ;;  %v7027_v12 = vld [vmem:[%s9730_s4 + $0xa8] sm:$0xff]  }
 0x784   : > { %v2267_v23 = vpack.c.bf16 %v2207_v28, %v2204_v45  ;;  %v9778_v45 = vld [vmem:[#allocation14_spill] sm:$0xff]  ;;  %v9779_v58 = vld [vmem:[#allocation15_spill] sm:$0xff] }
 0x786   : > { %6431 = vmatprep.mubr.msk.bf16.mxu0 %vm851_vm0, %v2267_v23 }
 0x787   : > { %6432 = vmatmul.mubr.msk.bf16.vlgmr.msra.gmra.mrb[80].mxu0 %vm851_vm0, %v2268_v47 }
 0x788   : > { %v6417_v61 = vpop.f32.mrb[68].mxu0  ;;  %6448 = vmatpush3.bf16.msra.mxu0 %v8581_v39 }
 0x789   : > { %v2220_v26 = vpop.f32.mrb[69].mxu0  ;;  %6449 = vmatprep.subr.bf16.mxu0 %v7021_v0 }
 0x78a   : > { %v6418_v54 = vpop.f32.mrb[70].mxu0 }
 0x78b   : > { %v2270_v15 = vpack.c.bf16 %v6418_v54, %v6417_v61  ;;  %v2223_v42 = vpop.f32.mrb[71].mxu0 }
 0x78c   : > { %v2269_v21 = vpack.c.bf16 %v2223_v42, %v2220_v26  ;;  %6450 = vmatpush3.bf16.msra.mxu0 %v7021_v0 }
 0x78d   : > { %6531 = vmatprep.subr.bf16.mxu0 %v7022_v10 }
 0x78e   : > { %6435 = vmatprep.mubr.msk.bf16.mxu0 %vm851_vm0, %v2269_v21 }
 0x78f   : > { %6436 = vmatmul.mubr.msk.bf16.gmra.mrb[84].mxu0 %vm851_vm0, %v2270_v15 }
 0x790   : > { %v6421_v37 = vpop.f32.mrb[72].mxu0 }
 0x791   : > { %v2236_v4 = vpop.f32.mrb[73].mxu0 }
 0x792   : > { %v6422_v36 = vpop.f32.mrb[74].mxu0 }
 0x793   : > { %v2272_v39 = vpack.c.bf16 %v6422_v36, %v6421_v37  ;;  %v2239_v8 = vpop.f32.mrb[75].mxu0 }
 0x794   : > { %v2271_v34 = vpack.c.bf16 %v2239_v8, %v2236_v4 }
 0x796   : > { %6439 = vmatprep.mubr.msk.bf16.mxu0 %vm851_vm0, %v2271_v34 }
 0x797   : > { %6440 = vmatmul.mubr.msk.bf16.gmra.mrb[88].mxu0 %vm851_vm0, %v2272_v39 }
 0x798   : > { %v6425_v59 = vpop.f32.mrb[76].mxu0 }
 0x799   : > { %v2252_v18 = vpop.f32.mrb[77].mxu0 }
 0x79a   : > { %v6426_v35 = vpop.f32.mrb[78].mxu0 }
 0x79b   : > { %v2274_v60 = vpack.c.bf16 %v6426_v35, %v6425_v59  ;;  %v2255_v56 = vpop.f32.mrb[79].mxu0 }
 0x79c   : > { %v2273_v14 = vpack.c.bf16 %v2255_v56, %v2252_v18 }
 0x79e   : > { %6443 = vmatprep.mubr.msk.bf16.mxu0 %vm851_vm0, %v2273_v14 }
 0x79f   : > { %6444 = vmatmul.mubr.msk.bf16.gmra.mrb[92].mxu0 %vm851_vm0, %v2274_v60 }
 0x7a0   : > { %6451 = vmatprep.mubr.msk.bf16.mxu0 %vm851_vm0, %v9767_v32 }
 0x7a7   : > { %6452 = vmatmul.mubr.msk.bf16.vlgmr.msra.gmra.mrb[80].mxu0 %vm851_vm0, %v9768_v44 }
 0x7a8   : > { %6455 = vmatprep.mubr.msk.bf16.mxu0 %vm851_vm0, %v9769_v51  ;;  %6532 = vmatpush3.bf16.msra.mxu0 %v7022_v10 }
 0x7a9   : > { %6533 = vmatprep.subr.bf16.mxu0 %v7023_v33 }
 0x7ac   : > { %6534 = vmatpush3.bf16.msra.mxu0 %v7023_v33 }
 0x7ad   : > { %6535 = vmatprep.subr.bf16.mxu0 %v7024_v17 }
 0x7af   : > { %6456 = vmatmul.mubr.msk.bf16.gmra.mrb[84].mxu0 %vm851_vm0, %v9770_v49 }
 0x7b0   : > { %6459 = vmatprep.mubr.msk.bf16.mxu0 %vm851_vm0, %v9771_v53  ;;  %6536 = vmatpush3.bf16.msra.mxu0 %v7024_v17 }
 0x7b1   : > { %6537 = vmatprep.subr.bf16.mxu0 %v7025_v22 }
 0x7b4   : > { %6538 = vmatpush3.bf16.msra.mxu0 %v7025_v22 }
 0x7b5   : > { %6539 = vmatprep.subr.bf16.mxu0 %v7026_v9 }
 0x7b7   : > { %6460 = vmatmul.mubr.msk.bf16.gmra.mrb[88].mxu0 %vm851_vm0, %v9772_v55 }
 0x7b8   : > { %6463 = vmatprep.mubr.msk.bf16.mxu0 %vm851_vm0, %v9773_v57  ;;  %6540 = vmatpush3.bf16.msra.mxu0 %v7026_v9 }
 0x7b9   : > { %6541 = vmatprep.subr.bf16.mxu0 %v7027_v12 }
 0x7bc   : > { %6542 = vmatpush3.bf16.msra.mxu0 %v7027_v12 }
 0x7bd   : > { %6543 = vmatprep.subr.bf16.mxu0 %v7028_v1 }
 0x7bf   : > { %6464 = vmatmul.mubr.msk.bf16.gmra.mrb[92].mxu0 %vm851_vm0, %v9774_v25 }
 0x7c0   : > { %6544 = vmatpush3.bf16.msra.mxu0 %v7028_v1  ;;  %6547 = vmatprep.mubr.bf16.mxu0 %v7631_v6 }
 0x7c1   : > { %6545 = vmatprep.subr.bf16.mxu0 %v7029_v3 }
 0x7c4   : > { %6546 = vmatpush3.bf16.msra.mxu0 %v7029_v3 }
 0x7c7   : > { %6548 = vmatmul.mubr.bf16.vlgmr.msra.gmra.mrb[96].mxu0 %v7654_v16 }
 0x7c8   : > { %6551 = vmatprep.mubr.bf16.mxu0 %v9775_v2 }
 0x7cf   : > { %6552 = vmatmul.mubr.bf16.gmra.mrb[100].mxu0 %v9776_v5 }
 0x7d0   : > { %6555 = vmatprep.mubr.bf16.mxu0 %v9777_v11 }
 0x7d7   : > { %6556 = vmatmul.mubr.bf16.gmra.mrb[104].mxu0 %v9778_v45 }
 0x7d8   : > { %6559 = vmatprep.mubr.bf16.mxu0 %v9779_v58 }
 0x7df   : > { %6560 = vmatmul.mubr.bf16.gmra.mrb[108].mxu0 %v9780_v62 }
 0x7f0   : > { %v3306_v7 = vpop.xlane.xlu0 %3305 }
 0x7f1   : > { %7218 = vrcp.f32 %v3306_v7 }
 0x7f2   : > { %v3308_v47 = vpop.xlane.xlu1 %3307 }
 0x7f3   : > { %7220 = vrcp.f32 %v3308_v47 }
 0x7f4   : > { %v3310_v28 = vpop.xlane.xlu0 %3309 }
 0x7f5   : > { %7222 = vrcp.f32 %v3310_v28 }
 0x7f6   : > { %v3312_v23 = vpop.xlane.xlu1 %3311 }
 0x7f7   : > { %7224 = vrcp.f32 %v3312_v23 }
 0x7f8   : > { %v3314_v0 = vpop.xlane.xlu0 %3313 }
 0x7f9   : > { %7226 = vrcp.f32 %v3314_v0 }
 0x7fa   : > { %v3316_v61 = vpop.xlane.xlu1 %3315 }
 0x7fb   : > { %v7219_v26 = vpop.eup %7218  ;;  %7228 = vrcp.f32 %v3316_v61 }
 0x7fc   : > { %v3318_v10 = vpop.xlane.xlu0 %3317  ;;  %v3353_v54 = vmul.f32 %v7219_v26, %v8591_v31 }
 0x7fd   : > { %v7221_v15 = vpop.eup %7220  ;;  %7230 = vrcp.f32 %v3318_v10 }
 0x7fe   : > { %v3320_v42 = vpop.xlane.xlu1 %3319  ;;  %v3354_v21 = vmul.f32 %v7221_v15, %v8595_v20  ;;  %5594 = vst [vmem:[%s7998_s26 + $0x100] sm:$0xff] %v3353_v54 }
 0x7ff   : > { %v7223_v37 = vpop.eup %7222  ;;  %7232 = vrcp.f32 %v3320_v42 }
 0x800   : > { %v8728_v4 = vmul.f32 %v7223_v37, %v8599_v41  ;;  %v3322_v36 = vpop.xlane.xlu0 %3321  ;;  %5595 = vst [vmem:[%s7998_s26 + $0x108] sm:$0xff] %v3354_v21  ;;  %v3386_v39 = vpack.c.bf16 %v3354_v21, %v3353_v54 }
 0x801   : > { %v7225_v8 = vpop.eup %7224  ;;  %7234 = vrcp.f32 %v3322_v36 }
 0x802   : > { %5596 = vst [vmem:[%s7998_s26 + $0x110] sm:$0xff] %v8728_v4  ;;  %v8734_v31 = vmul.f32 %v7225_v8, %v8603_v27  ;;  %v3324_v34 = vpop.xlane.xlu1 %3323  ;;  %6611 = vmatprep.mubr.bf16.mxu0 %v3386_v39 }
 0x803   : > { %v7227_v20 = vpop.eup %7226  ;;  %7236 = vrcp.f32 %v3324_v34 }
 0x804   : > { %5597 = vst [vmem:[%s7998_s26 + $0x118] sm:$0xff] %v8734_v31  ;;  %v3326_v41 = vpop.xlane.xlu0 %3325  ;;  %v3387_v59 = vpack.c.bf16 %v8734_v31, %v8728_v4  ;;  %v8741_v18 = vmul.f32 %v7227_v20, %v8607_v19  ;;  %v7032_v4 = vld [vmem:[%s9729_s3 + $0xc0] sm:$0xff]  }
 0x805   : > { %v7229_v35 = vpop.eup %7228  ;;  %7238 = vrcp.f32 %v3326_v41  ;;  %v7040_v31 = vld [vmem:[%s9728_s2 + $0xc0] sm:$0xff]  }
 0x806   : > { %v3328_v60 = vpop.xlane.xlu1 %3327  ;;  %v8744_v27 = vmul.f32 %v7229_v35, %v8611_v63  ;;  %5598 = vst [vmem:[%s7998_s26 + $0x120] sm:$0xff] %v8741_v18  ;;  %6647 = vmatprep.subr.bf16.mxu1 %v7040_v31 }
 0x807   : > { %v7231_v56 = vpop.eup %7230  ;;  %7240 = vrcp.f32 %v3328_v60  ;;  %6648 = vmatpush3.bf16.msra.mxu1 %v7040_v31 }
 0x808   : > { %v3330_v14 = vpop.xlane.xlu0 %3329  ;;  %5599 = vst [vmem:[%s7998_s26 + $0x128] sm:$0xff] %v8744_v27  ;;  %v3388_v32 = vpack.c.bf16 %v8744_v27, %v8741_v18  ;;  %v8753_v19 = vmul.f32 %v7231_v56, %v8615_v13  ;;  %v7042_v18 = vld [vmem:[%s9728_s2 + $0xd0] sm:$0xff]   ;;  %v7043_v27 = vld [vmem:[%s9728_s2 + $0xd8] sm:$0xff]  }
 0x809   : > { %v7233_v33 = vpop.eup %7232  ;;  %7242 = vrcp.f32 %v3330_v14 }
 0x80a   : > { %v3332_v44 = vpop.xlane.xlu1 %3331  ;;  %v8756_v63 = vmul.f32 %v7233_v33, %v8619_v48  ;;  %5600 = vst [vmem:[%s7998_s26 + $0x130] sm:$0xff] %v8753_v19 }
 0x80b   : > { %v7235_v51 = vpop.eup %7234  ;;  %7244 = vrcp.f32 %v3332_v44 }
 0x80c   : > { %v3334_v17 = vpop.xlane.xlu0 %3333  ;;  %5601 = vst [vmem:[%s7998_s26 + $0x138] sm:$0xff] %v8756_v63  ;;  %v3389_v13 = vpack.c.bf16 %v8756_v63, %v8753_v19  ;;  %v8765_v22 = vmul.f32 %v7235_v51, %v8623_v50  ;;  %v7030_v51 = vld [vmem:[%s9731_s5 + $0x20] sm:$0xff]   ;;  %v7045_v19 = vld [vmem:[%s9728_s2 + $0xe8] sm:$0xff]   ;;  %v7046_v63 = vld [vmem:[%s9728_s2 + $0xf0] sm:$0xff]  }
 0x80d   : > { %v7237_v49 = vpop.eup %7236  ;;  %7246 = vrcp.f32 %v3334_v17  ;;  %v7031_v17 = vld [vmem:[%s9731_s5 + $0x28] sm:$0xff]  }
 0x80e   : > { %v3336_v53 = vpop.xlane.xlu1 %3335  ;;  %v8768_v48 = vmul.f32 %v7237_v49, %v8627_v30  ;;  %5602 = vst [vmem:[%s7998_s26 + $0x140] sm:$0xff] %v8765_v22 }
 0x80f   : > { %v7239_v9 = vpop.eup %7238  ;;  %7248 = vrcp.f32 %v3336_v53 }
 0x810   : > { %5603 = vst [vmem:[%s7998_s26 + $0x148] sm:$0xff] %v8768_v48  ;;  %v3390_v12 = vpack.c.bf16 %v8768_v48, %v8765_v22  ;;  %v8777_v50 = vmul.f32 %v7239_v9, %v8630_v43 }
 0x811   : > { %v7241_v55 = vpop.eup %7240 }
 0x812   : > { %v8780_v57 = vmul.f32 %v7241_v55, %v8633_v24  ;;  %5604 = vst [vmem:[%s7998_s26 + $0x150] sm:$0xff] %v8777_v50 }
 0x813   : > { %v7243_v30 = vpop.eup %7242 }
 0x814   : > { %5605 = vst [vmem:[%s7998_s26 + $0x158] sm:$0xff] %v8780_v57  ;;  %v3391_v1 = vpack.c.bf16 %v8780_v57, %v8777_v50  ;;  %v8789_v3 = vmul.f32 %v7243_v30, %v8636_v29  ;;  %v7033_v50 = vld [vmem:[%s9729_s3 + $0xc8] sm:$0xff]   ;;  %v7034_v30 = vld [vmem:[%s9729_s3 + $0xd0] sm:$0xff]  }
 0x815   : > { %v7245_v25 = vpop.eup %7244 }
 0x816   : > { %v3366_v43 = vmul.f32 %v7245_v25, %v8639_v40  ;;  %5606 = vst [vmem:[%s7998_s26 + $0x160] sm:$0xff] %v8789_v3 }
 0x817   : > { %v7247_v7 = vpop.eup %7246 }
 0x818   : > { %5607 = vst [vmem:[%s7998_s26 + $0x168] sm:$0xff] %v3366_v43  ;;  %v3392_v24 = vpack.c.bf16 %v3366_v43, %v8789_v3  ;;  %v3367_v47 = vmul.f32 %v7247_v7, %v8642_v38  ;;  %v7035_v7 = vld [vmem:[%s9729_s3 + $0xd8] sm:$0xff]  }
 0x819   : > { %v7249_v28 = vpop.eup %7248 }
 0x81a   : > { %v3368_v23 = vmul.f32 %v7249_v28, %v8645_v46  ;;  %5608 = vst [vmem:[%s7998_s26 + $0x170] sm:$0xff] %v3367_v47  ;;  %v7036_v28 = vld [vmem:[%s9729_s3 + $0xe0] sm:$0xff]  }
 0x81c   : > { %5609 = vst [vmem:[%s7998_s26 + $0x178] sm:$0xff] %v3368_v23  ;;  %v3393_v0 = vpack.c.bf16 %v3368_v23, %v3367_v47 }
 0x89a   : > { %v6549_v61 = vpop.f32.mrb[96].mxu0 }
 0x89b   : > { %v2969_v29 = vpop.f32.mrb[97].mxu0 }
 0x89c   : > { %v6550_v26 = vpop.f32.mrb[98].mxu0 }
 0x89d   : > { %v3395_v10 = vpack.c.bf16 %v6550_v26, %v6549_v61  ;;  %v2972_v54 = vpop.f32.mrb[99].mxu0  ;;  %v7037_v26 = vld [vmem:[%s9729_s3 + $0xe8] sm:$0xff]  }
 0x89e   : > { %v3394_v40 = vpack.c.bf16 %v2972_v54, %v2969_v29 }
 0x8a0   : > { %6595 = vmatprep.subr.bf16.mxu0 %v3394_v40 }
 0x8a1   : > { %6596 = vmatpush3.bf16.msra.mxu0 %v3394_v40  ;;  %v7038_v40 = vld [vmem:[%s9729_s3 + $0xf0] sm:$0xff]  }
 0x8a2   : > { %v6553_v15 = vpop.f32.mrb[100].mxu0  ;;  %6597 = vmatprep.subr.bf16.mxu0 %v3395_v10 }
 0x8a3   : > { %v2985_v42 = vpop.f32.mrb[101].mxu0 }
 0x8a4   : > { %v6554_v21 = vpop.f32.mrb[102].mxu0 }
 0x8a5   : > { %v3397_v37 = vpack.c.bf16 %v6554_v21, %v6553_v15  ;;  %v2988_v38 = vpop.f32.mrb[103].mxu0  ;;  %6598 = vmatpush3.bf16.msra.mxu0 %v3395_v10 }
 0x8a6   : > { %v3396_v36 = vpack.c.bf16 %v2988_v38, %v2985_v42  ;;  %v7039_v38 = vld [vmem:[%s9729_s3 + $0xf8] sm:$0xff]  }
 0x8a8   : > { %6599 = vmatprep.subr.bf16.mxu0 %v3396_v36 }
 0x8a9   : > { %6600 = vmatpush3.bf16.msra.mxu0 %v3396_v36 }
 0x8aa   : > { %v6557_v46 = vpop.f32.mrb[104].mxu0  ;;  %6601 = vmatprep.subr.bf16.mxu0 %v3397_v37 }
 0x8ab   : > { %v3001_v39 = vpop.f32.mrb[105].mxu0 }
 0x8ac   : > { %v6558_v8 = vpop.f32.mrb[106].mxu0 }
 0x8ad   : > { %v3399_v34 = vpack.c.bf16 %v6558_v8, %v6557_v46  ;;  %v3004_v20 = vpop.f32.mrb[107].mxu0  ;;  %6602 = vmatpush3.bf16.msra.mxu0 %v3397_v37 }
 0x8ae   : > { %v3398_v41 = vpack.c.bf16 %v3004_v20, %v3001_v39 }
 0x8b0   : > { %6603 = vmatprep.subr.bf16.mxu0 %v3398_v41 }
 0x8b1   : > { %6604 = vmatpush3.bf16.msra.mxu0 %v3398_v41 }
 0x8b2   : > { %v6561_v35 = vpop.f32.mrb[108].mxu0  ;;  %6605 = vmatprep.subr.bf16.mxu0 %v3399_v34 }
 0x8b3   : > { %v3017_v60 = vpop.f32.mrb[109].mxu0 }
 0x8b4   : > { %v6562_v56 = vpop.f32.mrb[110].mxu0 }
 0x8b5   : > { %v3401_v14 = vpack.c.bf16 %v6562_v56, %v6561_v35  ;;  %v3020_v33 = vpop.f32.mrb[111].mxu0  ;;  %6606 = vmatpush3.bf16.msra.mxu0 %v3399_v34 }
 0x8b6   : > { %v3400_v44 = vpack.c.bf16 %v3020_v33, %v3017_v60 }
 0x8b8   : > { %6607 = vmatprep.subr.bf16.mxu0 %v3400_v44 }
 0x8b9   : > { %6608 = vmatpush3.bf16.msra.mxu0 %v3400_v44 }
 0x8ba   : > { %6609 = vmatprep.subr.bf16.mxu0 %v3401_v14 }
 0x8bd   : > { %6610 = vmatpush3.bf16.msra.mxu0 %v3401_v14 }
 0x8be   : > { %6627 = vmatprep.subr.bf16.mxu0 %v7030_v51 }
 0x8c0   : > { %6612 = vmatmul.mubr.bf16.vlgmr.msra.gmra.mrb[112].mxu0 %v3387_v59  ;;  %v7041_v59 = vld [vmem:[%s9728_s2 + $0xc8] sm:$0xff]  }
 0x8c1   : > { %6615 = vmatprep.mubr.bf16.mxu0 %v3388_v32  ;;  %6628 = vmatpush3.bf16.msra.mxu0 %v7030_v51  ;;  %v7044_v32 = vld [vmem:[%s9728_s2 + $0xe0] sm:$0xff]  }
 0x8c2   : > { %6629 = vmatprep.subr.bf16.mxu0 %v7031_v17  ;;  %6649 = vmatprep.subr.bf16.mxu1 %v7041_v59 }
 0x8c3   : > { %6650 = vmatpush3.bf16.msra.mxu1 %v7041_v59 }
 0x8c4   : > { %6651 = vmatprep.subr.bf16.mxu1 %v7042_v18 }
 0x8c5   : > { %6630 = vmatpush3.bf16.msra.mxu0 %v7031_v17 }
 0x8c6   : > { %6679 = vmatprep.subr.bf16.mxu0 %v7032_v4 }
 0x8c7   : > { %6652 = vmatpush3.bf16.msra.mxu1 %v7042_v18 }
 0x8c8   : > { %6616 = vmatmul.mubr.bf16.gmra.mrb[116].mxu0 %v3389_v13  ;;  %6653 = vmatprep.subr.bf16.mxu1 %v7043_v27  ;;  %v7047_v13 = vld [vmem:[%s9728_s2 + $0xf8] sm:$0xff]  }
 0x8c9   : > { %6619 = vmatprep.mubr.bf16.mxu0 %v3390_v12 }
 0x8cb   : > { %6654 = vmatpush3.bf16.msra.mxu1 %v7043_v27 }
 0x8cc   : > { %6655 = vmatprep.subr.bf16.mxu1 %v7044_v32 }
 0x8cf   : > { %6656 = vmatpush3.bf16.msra.mxu1 %v7044_v32 }
 0x8d0   : > { %6620 = vmatmul.mubr.bf16.gmra.mrb[120].mxu0 %v3391_v1  ;;  %6657 = vmatprep.subr.bf16.mxu1 %v7045_v19 }
 0x8d1   : > { %6623 = vmatprep.mubr.bf16.mxu0 %v3392_v24 }
 0x8d3   : > { %6658 = vmatpush3.bf16.msra.mxu1 %v7045_v19 }
 0x8d4   : > { %6659 = vmatprep.subr.bf16.mxu1 %v7046_v63 }
 0x8d7   : > { %6660 = vmatpush3.bf16.msra.mxu1 %v7046_v63 }
 0x8d8   : > { %6624 = vmatmul.mubr.bf16.gmra.mrb[124].mxu0 %v3393_v0  ;;  %6661 = vmatprep.subr.bf16.mxu1 %v7047_v13 }
 0x8db   : > { %6662 = vmatpush3.bf16.msra.mxu1 %v7047_v13 }
 0x8de   : > { %6664 = vmatmul.mubr.bf16.vlgmr.msra.gmra.mrb[128].mxu1 %v7654_v16 }
 0x8df   : > { %6667 = vmatprep.mubr.bf16.mxu1 %v9775_v2 }
 0x8e6   : > { %6668 = vmatmul.mubr.bf16.gmra.mrb[132].mxu1 %v9776_v5 }
 0x8e7   : > { %6671 = vmatprep.mubr.bf16.mxu1 %v9777_v11 }
 0x8ee   : > { %6672 = vmatmul.mubr.bf16.gmra.mrb[136].mxu1 %v9778_v45 }
 0x8ef   : > { %6675 = vmatprep.mubr.bf16.mxu1 %v9779_v58 }
 0x8f6   : > { %6676 = vmatmul.mubr.bf16.gmra.mrb[140].mxu1 %v9780_v62 }
 0x8f7   : > { %6727 = vmatprep.mubr.bf16.mxu1 %v7631_v6 }
 0x993   : > { %v6613_v22 = vpop.f32.mrb[112].mxu0 }
 0x994   : > { %v3436_v49 = vpop.f32.mrb[113].mxu0 }
 0x995   : > { %v6614_v53 = vpop.f32.mrb[114].mxu0 }
 0x996   : > { %v3500_v48 = vpack.c.bf16 %v6614_v53, %v6613_v22  ;;  %v3439_v9 = vpop.f32.mrb[115].mxu0 }
 0x997   : > { %v3499_v12 = vpack.c.bf16 %v3439_v9, %v3436_v49 }
 0x999   : > { %6631 = vmatprep.mubr.msk.bf16.mxu0 %vm851_vm0, %v3499_v12 }
 0x99a   : > { %6632 = vmatmul.mubr.msk.bf16.vlgmr.msra.gmra.mrb[80].mxu0 %vm851_vm0, %v3500_v48 }
 0x99b   : > { %v6617_v55 = vpop.f32.mrb[116].mxu0  ;;  %6680 = vmatpush3.bf16.msra.mxu0 %v7032_v4 }
 0x99c   : > { %v3452_v57 = vpop.f32.mrb[117].mxu0  ;;  %6681 = vmatprep.subr.bf16.mxu0 %v7033_v50 }
 0x99d   : > { %v6618_v1 = vpop.f32.mrb[118].mxu0 }
 0x99e   : > { %v3502_v3 = vpack.c.bf16 %v6618_v1, %v6617_v55  ;;  %v3455_v25 = vpop.f32.mrb[119].mxu0 }
 0x99f   : > { %v3501_v43 = vpack.c.bf16 %v3455_v25, %v3452_v57  ;;  %6682 = vmatpush3.bf16.msra.mxu0 %v7033_v50 }
 0x9a0   : > { %6683 = vmatprep.subr.bf16.mxu0 %v7034_v30 }
 0x9a1   : > { %6635 = vmatprep.mubr.msk.bf16.mxu0 %vm851_vm0, %v3501_v43 }
 0x9a2   : > { %6636 = vmatmul.mubr.msk.bf16.gmra.mrb[84].mxu0 %vm851_vm0, %v3502_v3 }
 0x9a3   : > { %v6621_v24 = vpop.f32.mrb[120].mxu0  ;;  %6684 = vmatpush3.bf16.msra.mxu0 %v7034_v30 }
 0x9a4   : > { %v3468_v47 = vpop.f32.mrb[121].mxu0  ;;  %6685 = vmatprep.subr.bf16.mxu0 %v7035_v7 }
 0x9a5   : > { %v6622_v23 = vpop.f32.mrb[122].mxu0 }
 0x9a6   : > { %v3504_v0 = vpack.c.bf16 %v6622_v23, %v6621_v24  ;;  %v3471_v61 = vpop.f32.mrb[123].mxu0 }
 0x9a7   : > { %v3503_v29 = vpack.c.bf16 %v3471_v61, %v3468_v47  ;;  %6686 = vmatpush3.bf16.msra.mxu0 %v7035_v7 }
 0x9a8   : > { %6687 = vmatprep.subr.bf16.mxu0 %v7036_v28 }
 0x9a9   : > { %6639 = vmatprep.mubr.msk.bf16.mxu0 %vm851_vm0, %v3503_v29 }
 0x9aa   : > { %6640 = vmatmul.mubr.msk.bf16.gmra.mrb[88].mxu0 %vm851_vm0, %v3504_v0 }
 0x9ab   : > { %v6625_v10 = vpop.f32.mrb[124].mxu0  ;;  %6688 = vmatpush3.bf16.msra.mxu0 %v7036_v28 }
 0x9ac   : > { %v3484_v54 = vpop.f32.mrb[125].mxu0  ;;  %6689 = vmatprep.subr.bf16.mxu0 %v7037_v26 }
 0x9ad   : > { %v6626_v15 = vpop.f32.mrb[126].mxu0 }
 0x9ae   : > { %v3506_v42 = vpack.c.bf16 %v6626_v15, %v6625_v10  ;;  %v3487_v21 = vpop.f32.mrb[127].mxu0 }
 0x9af   : > { %v3505_v37 = vpack.c.bf16 %v3487_v21, %v3484_v54  ;;  %6690 = vmatpush3.bf16.msra.mxu0 %v7037_v26 }
 0x9b0   : > { %6691 = vmatprep.subr.bf16.mxu0 %v7038_v40 }
 0x9b1   : > { %6643 = vmatprep.mubr.msk.bf16.mxu0 %vm851_vm0, %v3505_v37  ;;  %v8893_v36 = vpop.f32.mrb[128].mxu1 }
 0x9b2   : > { %6644 = vmatmul.mubr.msk.bf16.gmra.mrb[92].mxu0 %vm851_vm0, %v3506_v42  ;;  %v3760_v46 = vpop.f32.mrb[129].mxu1 }
 0x9b3   : > { %6692 = vmatpush3.bf16.msra.mxu0 %v7038_v40  ;;  %6695 = vmatprep.mubr.bf16.mxu0 %v7631_v6  ;;  %v8895_v6 = vpop.f32.mrb[130].mxu1 }
 0x9b4   : > { %6693 = vmatprep.subr.bf16.mxu0 %v7039_v38  ;;  %v4148_v39 = vpack.c.bf16 %v8895_v6, %v8893_v36  ;;  %v3763_v8 = vpop.f32.mrb[131].mxu1  ;;  %v7048_v36 = vld [vmem:[%s9730_s4 + $0xc0] sm:$0xff]   ;;  %v7050_v6 = vld [vmem:[%s9730_s4 + $0xd0] sm:$0xff]  }
 0x9b5   : > { %v4147_v34 = vpack.c.bf16 %v3763_v8, %v3760_v46  ;;  %v7049_v46 = vld [vmem:[%s9730_s4 + $0xc8] sm:$0xff]   ;;  %6711 = vmatprep.subr.bf16.mxu1 %v7048_v36  ;;  %v7052_v8 = vld [vmem:[%s9730_s4 + $0xe0] sm:$0xff]  }
 0x9b6   : > { %6712 = vmatpush3.bf16.msra.mxu1 %v7048_v36 }
 0x9b7   : > { %6694 = vmatpush3.bf16.msra.mxu0 %v7039_v38  ;;  %6713 = vmatprep.subr.bf16.mxu1 %v7049_v46 }
 0x9b9   : > { %v8899_v20 = vpop.f32.mrb[132].mxu1 }
 0x9ba   : > { %6696 = vmatmul.mubr.bf16.vlgmr.msra.gmra.mrb[128].mxu0 %v7654_v16  ;;  %v8901_v41 = vpop.f32.mrb[133].mxu1  ;;  %6714 = vmatpush3.bf16.msra.mxu1 %v7049_v46 }
 0x9bb   : > { %6699 = vmatprep.mubr.bf16.mxu0 %v9775_v2  ;;  %v8904_v35 = vpop.f32.mrb[134].mxu1  ;;  %6715 = vmatprep.subr.bf16.mxu1 %v7050_v6 }
 0x9bc   : > { %v4150_v60 = vpack.c.bf16 %v8904_v35, %v8899_v20  ;;  %v8908_v56 = vpop.f32.mrb[135].mxu1  ;;  %v7054_v20 = vld [vmem:[%s9730_s4 + $0xf0] sm:$0xff]  }
 0x9bd   : > { %v4149_v14 = vpack.c.bf16 %v8908_v56, %v8901_v41  ;;  %v7055_v41 = vld [vmem:[%s9730_s4 + $0xf8] sm:$0xff]  }
 0x9be   : > { %6716 = vmatpush3.bf16.msra.mxu1 %v7050_v6 }
 0x9c1   : > { %v8912_v33 = vpop.f32.mrb[136].mxu1 }
 0x9c2   : > { %6700 = vmatmul.mubr.bf16.gmra.mrb[132].mxu0 %v9776_v5  ;;  %v8914_v44 = vpop.f32.mrb[137].mxu1 }
 0x9c3   : > { %6703 = vmatprep.mubr.bf16.mxu0 %v9777_v11  ;;  %v8916_v51 = vpop.f32.mrb[138].mxu1 }
 0x9c4   : > { %v4152_v17 = vpack.c.bf16 %v8916_v51, %v8912_v33  ;;  %v3795_v4 = vpop.f32.mrb[139].mxu1 }
 0x9c5   : > { %v4151_v31 = vpack.c.bf16 %v3795_v4, %v8914_v44 }
 0x9c9   : > { %v6677_v59 = vpop.f32.mrb[140].mxu1 }
 0x9ca   : > { %6704 = vmatmul.mubr.bf16.gmra.mrb[136].mxu0 %v9778_v45  ;;  %v3808_v18 = vpop.f32.mrb[141].mxu1 }
 0x9cb   : > { %6707 = vmatprep.mubr.bf16.mxu0 %v9779_v58  ;;  %v6678_v27 = vpop.f32.mrb[142].mxu1 }
 0x9cc   : > { %v4154_v32 = vpack.c.bf16 %v6678_v27, %v6677_v59  ;;  %v3811_v19 = vpop.f32.mrb[143].mxu1 }
 0x9cd   : > { %v4153_v63 = vpack.c.bf16 %v3811_v19, %v3808_v18 }
 0x9d2   : > { %6708 = vmatmul.mubr.bf16.gmra.mrb[140].mxu0 %v9780_v62 }
 0x9d3   : > { %6759 = vmatprep.mubr.msk.bf16.mxu0 %vm851_vm0, %v4147_v34  ;;  %v7053_v34 = vld [vmem:[%s9730_s4 + $0xe8] sm:$0xff]  }
 0xa8d   : > { %v6697_v13 = vpop.f32.mrb[128].mxu0 }
 0xa8e   : > { %v3922_v22 = vpop.f32.mrb[129].mxu0 }
 0xa8f   : > { %v6698_v49 = vpop.f32.mrb[130].mxu0 }
 0xa90   : > { %v4156_v53 = vpack.c.bf16 %v6698_v49, %v6697_v13  ;;  %v3925_v48 = vpop.f32.mrb[131].mxu0 }
 0xa91   : > { %v4155_v9 = vpack.c.bf16 %v3925_v48, %v3922_v22 }
 0xa92   : > { %v4191_v25 = vsel %vm851_vm0, %v4156_v53, 0 }
 0xa93   : > { %v4188_v12 = vsel %vm851_vm0, %v4155_v9, 0  ;;  %6899 = vmatprep.subr.msk.bf16.mxu0 %vm851_vm0, %v4155_v9 }
 0xa94   : > { %6744 = vmatpush3.bf16.xpose.msra.mxu0 %v4188_v12 }
 0xa95   : > { %6900 = vmatprep.subr.msk.bf16.mxu0 %vm851_vm0, %v4156_v53  ;;  %v6701_v50 = vpop.f32.mrb[132].mxu0 }
 0xa96   : > { %v3938_v55 = vpop.f32.mrb[133].mxu0 }
 0xa97   : > { %v6702_v57 = vpop.f32.mrb[134].mxu0 }
 0xa98   : > { %v4158_v30 = vpack.c.bf16 %v6702_v57, %v6701_v50  ;;  %v3941_v1 = vpop.f32.mrb[135].mxu0 }
 0xa99   : > { %v4157_v3 = vpack.c.bf16 %v3941_v1, %v3938_v55 }
 0xa9a   : > { %v4197_v15 = vsel %vm851_vm0, %v4158_v30, 0 }
 0xa9b   : > { %v4194_v0 = vsel %vm851_vm0, %v4157_v3, 0 }
 0xa9c   : > { %6746 = vmatpush3.bf16.xpose.msra.mxu0 %v4191_v25 }
 0xa9d   : > { %6901 = vmatprep.subr.msk.bf16.mxu0 %vm851_vm0, %v4157_v3  ;;  %v6705_v43 = vpop.f32.mrb[136].mxu0 }
 0xa9e   : > { %v3954_v7 = vpop.f32.mrb[137].mxu0 }
 0xa9f   : > { %v6706_v24 = vpop.f32.mrb[138].mxu0 }
 0xaa0   : > { %v4160_v47 = vpack.c.bf16 %v6706_v24, %v6705_v43  ;;  %v3957_v28 = vpop.f32.mrb[139].mxu0 }
 0xaa1   : > { %v4159_v23 = vpack.c.bf16 %v3957_v28, %v3954_v7 }
 0xaa2   : > { %v4203_v21 = vsel %vm851_vm0, %v4160_v47, 0 }
 0xaa3   : > { %v4200_v42 = vsel %vm851_vm0, %v4159_v23, 0 }
 0xaa4   : > { %6748 = vmatpush3.bf16.xpose.msra.mxu0 %v4194_v0 }
 0xaa5   : > { %6902 = vmatprep.subr.msk.bf16.mxu0 %vm851_vm0, %v4158_v30  ;;  %v6709_v61 = vpop.f32.mrb[140].mxu0 }
 0xaa6   : > { %v3970_v29 = vpop.f32.mrb[141].mxu0 }
 0xaa7   : > { %v6710_v26 = vpop.f32.mrb[142].mxu0 }
 0xaa8   : > { %v4162_v10 = vpack.c.bf16 %v6710_v26, %v6709_v61  ;;  %v3973_v54 = vpop.f32.mrb[143].mxu0 }
 0xaa9   : > { %v4161_v40 = vpack.c.bf16 %v3973_v54, %v3970_v29 }
 0xaaa   : > { %v4209_v38 = vsel %vm851_vm0, %v4162_v10, 0 }
 0xaab   : > { %v4206_v37 = vsel %vm851_vm0, %v4161_v40, 0 }
 0xaac   : > { %6750 = vmatpush3.bf16.xpose.msra.mxu0 %v4197_v15 }
 0xaad   : > { %6903 = vmatprep.subr.msk.bf16.mxu0 %vm851_vm0, %v4159_v23 }
 0xab4   : > { %6752 = vmatpush3.bf16.xpose.msra.mxu0 %v4200_v42 }
 0xab5   : > { %6904 = vmatprep.subr.msk.bf16.mxu0 %vm851_vm0, %v4160_v47 }
 0xabc   : > { %6754 = vmatpush3.bf16.xpose.msra.mxu0 %v4203_v21 }
 0xabd   : > { %6905 = vmatprep.subr.msk.bf16.mxu0 %vm851_vm0, %v4161_v40 }
 0xac4   : > { %6756 = vmatpush3.bf16.xpose.msra.mxu0 %v4206_v37 }
 0xac5   : > { %6906 = vmatprep.subr.msk.bf16.mxu0 %vm851_vm0, %v4162_v10 }
 0xacc   : > { %6758 = vmatpush3.bf16.xpose.msra.mxu0 %v4209_v38 }
 0xad3   : > { %6760 = vmatmul.mubr.msk.bf16.vlgmr.msra.gmra.mrb[144].mxu0 %vm851_vm0, %v4148_v39  ;;  %v7051_v39 = vld [vmem:[%s9730_s4 + $0xd8] sm:$0xff]  }
 0xad4   : > { %6763 = vmatprep.mubr.msk.bf16.mxu0 %vm851_vm0, %v4149_v14  ;;  %6717 = vmatprep.subr.bf16.mxu1 %v7051_v39 }
 0xad5   : > { %6718 = vmatpush3.bf16.msra.mxu1 %v7051_v39 }
 0xad6   : > { %6719 = vmatprep.subr.bf16.mxu1 %v7052_v8 }
 0xad9   : > { %6720 = vmatpush3.bf16.msra.mxu1 %v7052_v8 }
 0xada   : > { %6721 = vmatprep.subr.bf16.mxu1 %v7053_v34 }
 0xadb   : > { %6764 = vmatmul.mubr.msk.bf16.gmra.mrb[148].mxu0 %vm851_vm0, %v4150_v60 }
 0xadc   : > { %6767 = vmatprep.mubr.msk.bf16.mxu0 %vm851_vm0, %v4151_v31 }
 0xadd   : > { %6722 = vmatpush3.bf16.msra.mxu1 %v7053_v34 }
 0xade   : > { %6723 = vmatprep.subr.bf16.mxu1 %v7054_v20 }
 0xae1   : > { %6724 = vmatpush3.bf16.msra.mxu1 %v7054_v20 }
 0xae2   : > { %6725 = vmatprep.subr.bf16.mxu1 %v7055_v41 }
 0xae3   : > { %6768 = vmatmul.mubr.msk.bf16.gmra.mrb[152].mxu0 %vm851_vm0, %v4152_v17 }
 0xae4   : > { %6771 = vmatprep.mubr.msk.bf16.mxu0 %vm851_vm0, %v4153_v63 }
 0xae5   : > { %6726 = vmatpush3.bf16.msra.mxu1 %v7055_v41 }
 0xae8   : > { %6728 = vmatmul.mubr.bf16.vlgmr.msra.gmra.mrb[144].mxu1 %v7654_v16 }
 0xae9   : > { %6731 = vmatprep.mubr.bf16.mxu1 %v9775_v2 }
 0xaeb   : > { %6772 = vmatmul.mubr.msk.bf16.gmra.mrb[156].mxu0 %vm851_vm0, %v4154_v32 }
 0xaf0   : > { %6732 = vmatmul.mubr.bf16.gmra.mrb[148].mxu1 %v9776_v5 }
 0xaf1   : > { %6735 = vmatprep.mubr.bf16.mxu1 %v9777_v11 }
 0xaf8   : > { %6736 = vmatmul.mubr.bf16.gmra.mrb[152].mxu1 %v9778_v45 }
 0xaf9   : > { %6739 = vmatprep.mubr.bf16.mxu1 %v9779_v58 }
 0xb00   : > { %6740 = vmatmul.mubr.bf16.gmra.mrb[156].mxu1 %v9780_v62 }
 0xba6   : > { %v6761_v35 = vpop.f32.mrb[144].mxu0 }
 0xba7   : > { %v4245_v60 = vpop.f32.mrb[145].mxu0  ;;  %v4310_v44 = vmul.f32 0.088388346, %v6761_v35 }
 0xba8   : > { %v4308_v56 = vmul.f32 0.088388346, %v4245_v60  ;;  %v6762_v14 = vpop.f32.mrb[146].mxu0 }
 0xba9   : > { %v4248_v33 = vpop.f32.mrb[147].mxu0  ;;  %v4311_v2 = vmul.f32 0.088388346, %v6762_v14  ;;  %v8987_v45 = vsel %vm7808_vm1, %v4310_v44, -inf }
 0xbaa   : > { %v4309_v51 = vmul.f32 0.088388346, %v4248_v33  ;;  %v4324_v16 = vsel %vm7808_vm1, %v4308_v56, -inf }
 0xbab   : > { %4340 = vmax.xlane.f32.xlu0 %v4324_v16  ;;  %v8992_v4 = vsel %vm7808_vm1, %v4311_v2, -inf }
 0xbac   : > { %v4325_v5 = vsel %vm7808_vm1, %v4309_v51, -inf }
 0xbad   : > { %4342 = vmax.xlane.f32.xlu1 %v4325_v5 }
 0xbae   : > { %v6765_v11 = vpop.f32.mrb[148].mxu0 }
 0xbaf   : > { %4344 = vmax.xlane.f32.xlu0 %v8987_v45  ;;  %v4261_v58 = vpop.f32.mrb[149].mxu0  ;;  %v4314_v59 = vmul.f32 0.088388346, %v6765_v11 }
 0xbb0   : > { %v4312_v62 = vmul.f32 0.088388346, %v4261_v58  ;;  %v6766_v17 = vpop.f32.mrb[150].mxu0 }
 0xbb1   : > { %4346 = vmax.xlane.f32.xlu1 %v8992_v4  ;;  %v4264_v31 = vpop.f32.mrb[151].mxu0  ;;  %v4315_v32 = vmul.f32 0.088388346, %v6766_v17  ;;  %v9007_v13 = vsel %vm7808_vm1, %v4314_v59, -inf }
 0xbb2   : > { %v4313_v18 = vmul.f32 0.088388346, %v4264_v31  ;;  %v8997_v27 = vsel %vm7808_vm1, %v4312_v62, -inf }
 0xbb3   : > { %4348 = vmax.xlane.f32.xlu0 %v8997_v27  ;;  %v9012_v48 = vsel %vm7808_vm1, %v4315_v32, -inf }
 0xbb4   : > { %v9002_v19 = vsel %vm7808_vm1, %v4313_v18, -inf }
 0xbb5   : > { %4350 = vmax.xlane.f32.xlu1 %v9002_v19 }
 0xbb6   : > { %v6769_v63 = vpop.f32.mrb[152].mxu0 }
 0xbb7   : > { %4352 = vmax.xlane.f32.xlu0 %v9007_v13  ;;  %v4277_v22 = vpop.f32.mrb[153].mxu0  ;;  %v4318_v12 = vmul.f32 0.088388346, %v6769_v63 }
 0xbb8   : > { %v4316_v49 = vmul.f32 0.088388346, %v4277_v22  ;;  %v6770_v53 = vpop.f32.mrb[154].mxu0 }
 0xbb9   : > { %4354 = vmax.xlane.f32.xlu1 %v9012_v48  ;;  %v4280_v9 = vpop.f32.mrb[155].mxu0  ;;  %v4319_v57 = vmul.f32 0.088388346, %v6770_v53  ;;  %v9027_v3 = vsel %vm7808_vm1, %v4318_v12, -inf }
 0xbba   : > { %v4317_v50 = vmul.f32 0.088388346, %v4280_v9  ;;  %v9017_v55 = vsel %vm7808_vm1, %v4316_v49, -inf }
 0xbbb   : > { %4356 = vmax.xlane.f32.xlu0 %v9017_v55  ;;  %v9032_v24 = vsel %vm7808_vm1, %v4319_v57, -inf  ;;  %v6729_v46 = vpop.f32.mrb[144].mxu1 }
 0xbbc   : > { %v9022_v30 = vsel %vm7808_vm1, %v4317_v50, -inf  ;;  %v4084_v39 = vpop.f32.mrb[145].mxu1 }
 0xbbd   : > { %4358 = vmax.xlane.f32.xlu1 %v9022_v30  ;;  %v6730_v34 = vpop.f32.mrb[146].mxu1 }
 0xbbe   : > { %v6773_v1 = vpop.f32.mrb[156].mxu0  ;;  %v4510_v41 = vpack.c.bf16 %v6730_v34, %v6729_v46  ;;  %v4087_v35 = vpop.f32.mrb[147].mxu1 }
 0xbbf   : > { %4360 = vmax.xlane.f32.xlu0 %v9027_v3  ;;  %v4293_v25 = vpop.f32.mrb[157].mxu0  ;;  %v4322_v28 = vmul.f32 0.088388346, %v6773_v1  ;;  %v4509_v14 = vpack.c.bf16 %v4087_v35, %v4084_v39 }
 0xbc0   : > { %v4320_v43 = vmul.f32 0.088388346, %v4293_v25  ;;  %v6774_v7 = vpop.f32.mrb[158].mxu0 }
 0xbc1   : > { %4362 = vmax.xlane.f32.xlu1 %v9032_v24  ;;  %v4296_v47 = vpop.f32.mrb[159].mxu0  ;;  %v4323_v61 = vmul.f32 0.088388346, %v6774_v7  ;;  %v9047_v26 = vsel %vm7808_vm1, %v4322_v28, -inf  ;;  %6775 = vmatprep.subr.bf16.mxu1 %v4509_v14 }
 0xbc2   : > { %v4321_v23 = vmul.f32 0.088388346, %v4296_v47  ;;  %v9037_v0 = vsel %vm7808_vm1, %v4320_v43, -inf  ;;  %6776 = vmatpush3.bf16.msra.mxu1 %v4509_v14 }
 0xbc3   : > { %4364 = vmax.xlane.f32.xlu0 %v9037_v0  ;;  %v9052_v10 = vsel %vm7808_vm1, %v4323_v61, -inf  ;;  %v6733_v11 = vpop.f32.mrb[148].mxu1  ;;  %6777 = vmatprep.subr.bf16.mxu1 %v4510_v41 }
 0xbc4   : > { %v9042_v29 = vsel %vm7808_vm1, %v4321_v23, -inf  ;;  %v4100_v58 = vpop.f32.mrb[149].mxu1 }
 0xbc5   : > { %4366 = vmax.xlane.f32.xlu1 %v9042_v29  ;;  %v6734_v31 = vpop.f32.mrb[150].mxu1 }
 0xbc6   : > { %v4512_v18 = vpack.c.bf16 %v6734_v31, %v6733_v11  ;;  %6778 = vmatpush3.bf16.msra.mxu1 %v4510_v41 }
 0xbc7   : > { %4368 = vmax.xlane.f32.xlu0 %v9047_v26 }
 0xbc9   : > { %4370 = vmax.xlane.f32.xlu1 %v9052_v10 }
 0xc38   : > { %v4341_v54 = vpop.xlane.xlu0 %4340 }
 0xc39   : > { %v4372_v40 = vsub.f32 %v4324_v16, %v4341_v54 }
 0xc3a   : > { %v4343_v15 = vpop.xlane.xlu1 %4342 }
 0xc3b   : > { %v4388_v42 = vmul.f32 1.442695, %v4372_v40  ;;  %v4373_v21 = vsub.f32 %v4325_v5, %v4343_v15 }
 0xc3c   : > { %v4345_v37 = vpop.xlane.xlu0 %4344 }
 0xc3d   : > { %7250 = vpow2.f32 %v4388_v42  ;;  %v4390_v38 = vmul.f32 1.442695, %v4373_v21  ;;  %v4374_v36 = vsub.f32 %v8987_v45, %v4345_v37 }
 0xc3e   : > { %v4347_v6 = vpop.xlane.xlu1 %4346 }
 0xc3f   : > { %7252 = vpow2.f32 %v4390_v38  ;;  %v4392_v8 = vmul.f32 1.442695, %v4374_v36  ;;  %v4375_v52 = vsub.f32 %v8992_v4, %v4347_v6 }
 0xc40   : > { %v4349_v20 = vpop.xlane.xlu0 %4348 }
 0xc41   : > { %7254 = vpow2.f32 %v4392_v8  ;;  %v4394_v60 = vmul.f32 1.442695, %v4375_v52  ;;  %v4376_v56 = vsub.f32 %v8997_v27, %v4349_v20  ;;  %v4103_v27 = vpop.f32.mrb[151].mxu1 }
 0xc42   : > { %v4351_v33 = vpop.xlane.xlu1 %4350  ;;  %v6737_v57 = vpop.f32.mrb[152].mxu1 }
 0xc43   : > { %7256 = vpow2.f32 %v4394_v60  ;;  %v4396_v44 = vmul.f32 1.442695, %v4376_v56  ;;  %v4377_v51 = vsub.f32 %v9002_v19, %v4351_v33  ;;  %v4116_v25 = vpop.f32.mrb[153].mxu1 }
 0xc44   : > { %v4353_v16 = vpop.xlane.xlu0 %4352  ;;  %v6738_v47 = vpop.f32.mrb[154].mxu1 }
 0xc45   : > { %7258 = vpow2.f32 %v4396_v44  ;;  %v4398_v2 = vmul.f32 1.442695, %v4377_v51  ;;  %v4378_v5 = vsub.f32 %v9007_v13, %v4353_v16  ;;  %v4511_v13 = vpack.c.bf16 %v4103_v27, %v4100_v58  ;;  %v4119_v61 = vpop.f32.mrb[155].mxu1 }
 0xc46   : > { %v4355_v45 = vpop.xlane.xlu1 %4354  ;;  %v4514_v23 = vpack.c.bf16 %v6738_v47, %v6737_v57  ;;  %v4513_v15 = vpack.c.bf16 %v4119_v61, %v4116_v25  ;;  %v6741_v6 = vpop.f32.mrb[156].mxu1 }
 0xc47   : > { %v9060_v62 = vpop.eup %7250  ;;  %7260 = vpow2.f32 %v4398_v2  ;;  %v4400_v17 = vmul.f32 1.442695, %v4378_v5  ;;  %v4379_v4 = vsub.f32 %v9012_v48, %v4355_v45  ;;  %6779 = vmatprep.subr.bf16.mxu1 %v4511_v13  ;;  %v4132_v8 = vpop.f32.mrb[157].mxu1  ;;  %v7056_v2 = vld [vmem:[%s9731_s5 + $0x30] sm:$0xff]   ;;  %v7057_v5 = vld [vmem:[%s9731_s5 + $0x38] sm:$0xff]  }
 0xc48   : > { %v4357_v59 = vpop.xlane.xlu0 %4356  ;;  %4420 = vadd.xlane.f32.xlu0 %v9060_v62  ;;  %6780 = vmatpush3.bf16.msra.mxu1 %v4511_v13  ;;  %v6742_v20 = vpop.f32.mrb[158].mxu1 }
 0xc49   : > { %v9064_v32 = vpop.eup %7252  ;;  %7262 = vpow2.f32 %v4400_v17  ;;  %v4402_v19 = vmul.f32 1.442695, %v4379_v4  ;;  %v4380_v63 = vsub.f32 %v9017_v55, %v4357_v59  ;;  %6781 = vmatprep.subr.bf16.mxu1 %v4512_v18  ;;  %v4516_v41 = vpack.c.bf16 %v6742_v20, %v6741_v6  ;;  %v4135_v35 = vpop.f32.mrb[159].mxu1  ;;  %6807 = vmatprep.subr.bf16.mxu0 %v7056_v2 }
 0xc4a   : > { %v4359_v22 = vpop.xlane.xlu1 %4358  ;;  %4422 = vadd.xlane.f32.xlu1 %v9064_v32  ;;  %v4515_v56 = vpack.c.bf16 %v4135_v35, %v4132_v8  ;;  %6808 = vmatpush3.bf16.msra.mxu0 %v7056_v2 }
 0xc4b   : > { %v9068_v49 = vpop.eup %7254  ;;  %7264 = vpow2.f32 %v4402_v19  ;;  %v4404_v53 = vmul.f32 1.442695, %v4380_v63  ;;  %v4381_v48 = vsub.f32 %v9022_v30, %v4359_v22  ;;  %6809 = vmatprep.subr.bf16.mxu0 %v7057_v5 }
 0xc4c   : > { %v4361_v9 = vpop.xlane.xlu0 %4360  ;;  %4424 = vadd.xlane.f32.xlu0 %v9068_v49  ;;  %6782 = vmatpush3.bf16.msra.mxu1 %v4512_v18 }
 0xc4d   : > { %v9072_v12 = vpop.eup %7256  ;;  %7266 = vpow2.f32 %v4404_v53  ;;  %v4406_v50 = vmul.f32 1.442695, %v4381_v48  ;;  %v4382_v55 = vsub.f32 %v9027_v3, %v4361_v9  ;;  %6783 = vmatprep.subr.bf16.mxu1 %v4513_v15 }
 0xc4e   : > { %v4363_v1 = vpop.xlane.xlu1 %4362  ;;  %4426 = vadd.xlane.f32.xlu1 %v9072_v12  ;;  %6810 = vmatpush3.bf16.msra.mxu0 %v7057_v5 }
 0xc4f   : > { %v9076_v43 = vpop.eup %7258  ;;  %7268 = vpow2.f32 %v4406_v50  ;;  %v4408_v30 = vmul.f32 1.442695, %v4382_v55  ;;  %v4383_v7 = vsub.f32 %v9032_v24, %v4363_v1 }
 0xc50   : > { %4428 = vadd.xlane.f32.xlu0 %v9076_v43  ;;  %v4365_v28 = vpop.xlane.xlu0 %4364  ;;  %6784 = vmatpush3.bf16.msra.mxu1 %v4513_v15 }
 0xc51   : > { %v9080_v3 = vpop.eup %7260  ;;  %7270 = vpow2.f32 %v4408_v30  ;;  %v4410_v54 = vmul.f32 1.442695, %v4383_v7  ;;  %v4384_v40 = vsub.f32 %v9037_v0, %v4365_v28  ;;  %6785 = vmatprep.subr.bf16.mxu1 %v4514_v23 }
 0xc52   : > { %4430 = vadd.xlane.f32.xlu1 %v9080_v3  ;;  %v4367_v42 = vpop.xlane.xlu1 %4366 }
 0xc53   : > { %v9084_v21 = vpop.eup %7262  ;;  %7272 = vpow2.f32 %v4410_v54  ;;  %v4412_v24 = vmul.f32 1.442695, %v4384_v40  ;;  %v4385_v37 = vsub.f32 %v9042_v29, %v4367_v42 }
 0xc54   : > { %4432 = vadd.xlane.f32.xlu0 %v9084_v21  ;;  %v4369_v38 = vpop.xlane.xlu0 %4368  ;;  %6786 = vmatpush3.bf16.msra.mxu1 %v4514_v23 }
 0xc55   : > { %v9088_v36 = vpop.eup %7264  ;;  %7274 = vpow2.f32 %v4412_v24  ;;  %v4414_v46 = vmul.f32 1.442695, %v4385_v37  ;;  %v4386_v0 = vsub.f32 %v9047_v26, %v4369_v38  ;;  %6787 = vmatprep.subr.bf16.mxu1 %v4515_v56 }
 0xc56   : > { %4434 = vadd.xlane.f32.xlu1 %v9088_v36  ;;  %v4371_v39 = vpop.xlane.xlu1 %4370 }
 0xc57   : > { %v9092_v52 = vpop.eup %7266  ;;  %7276 = vpow2.f32 %v4414_v46  ;;  %v4416_v29 = vmul.f32 1.442695, %v4386_v0  ;;  %v4387_v34 = vsub.f32 %v9052_v10, %v4371_v39 }
 0xc58   : > { %4436 = vadd.xlane.f32.xlu0 %v9092_v52  ;;  %6788 = vmatpush3.bf16.msra.mxu1 %v4515_v56 }
 0xc59   : > { %v9096_v60 = vpop.eup %7268  ;;  %7278 = vpow2.f32 %v4416_v29  ;;  %v4418_v26 = vmul.f32 1.442695, %v4387_v34  ;;  %6789 = vmatprep.subr.bf16.mxu1 %v4516_v41 }
 0xc5a   : > { %4438 = vadd.xlane.f32.xlu1 %v9096_v60 }
 0xc5b   : > { %v9099_v14 = vpop.eup %7270  ;;  %7280 = vpow2.f32 %v4418_v26 }
 0xc5c   : > { %4440 = vadd.xlane.f32.xlu0 %v9099_v14  ;;  %6790 = vmatpush3.bf16.msra.mxu1 %v4516_v41 }
 0xc5d   : > { %v9102_v10 = vpop.eup %7272 }
 0xc5e   : > { %4442 = vadd.xlane.f32.xlu1 %v9102_v10 }
 0xc5f   : > { %v9105_v33 = vpop.eup %7274 }
 0xc60   : > { %4444 = vadd.xlane.f32.xlu0 %v9105_v33 }
 0xc61   : > { %v9108_v44 = vpop.eup %7276 }
 0xc62   : > { %4446 = vadd.xlane.f32.xlu1 %v9108_v44 }
 0xc63   : > { %v9111_v51 = vpop.eup %7278 }
 0xc64   : > { %4448 = vadd.xlane.f32.xlu0 %v9111_v51 }
 0xc65   : > { %v9114_v16 = vpop.eup %7280 }
 0xc66   : > { %4450 = vadd.xlane.f32.xlu1 %v9114_v16 }
 0xcd5   : > { %v4421_v11 = vpop.xlane.xlu0 %4420 }
 0xcd6   : > { %7282 = vrcp.f32 %v4421_v11 }
 0xcd7   : > { %v4423_v45 = vpop.xlane.xlu1 %4422 }
 0xcd8   : > { %7284 = vrcp.f32 %v4423_v45 }
 0xcd9   : > { %v4425_v58 = vpop.xlane.xlu0 %4424 }
 0xcda   : > { %7286 = vrcp.f32 %v4425_v58 }
 0xcdb   : > { %v4427_v17 = vpop.xlane.xlu1 %4426 }
 0xcdc   : > { %7288 = vrcp.f32 %v4427_v17 }
 0xcdd   : > { %v4429_v4 = vpop.xlane.xlu0 %4428 }
 0xcde   : > { %7290 = vrcp.f32 %v4429_v4 }
 0xcdf   : > { %v4431_v31 = vpop.xlane.xlu1 %4430 }
 0xce0   : > { %v7283_v59 = vpop.eup %7282  ;;  %7292 = vrcp.f32 %v4431_v31 }
 0xce1   : > { %v4433_v18 = vpop.xlane.xlu0 %4432  ;;  %v4468_v27 = vmul.f32 %v7283_v59, %v9060_v62 }
 0xce2   : > { %v7285_v19 = vpop.eup %7284  ;;  %7294 = vrcp.f32 %v4433_v18 }
 0xce3   : > { %v4435_v63 = vpop.xlane.xlu1 %4434  ;;  %v4469_v13 = vmul.f32 %v7285_v19, %v9064_v32  ;;  %5704 = vst [vmem:[%s7998_s26 + $0x180] sm:$0xff] %v4468_v27 }
 0xce4   : > { %v7287_v22 = vpop.eup %7286  ;;  %7296 = vrcp.f32 %v4435_v63 }
 0xce5   : > { %v4470_v53 = vmul.f32 %v7287_v22, %v9068_v49  ;;  %v4437_v48 = vpop.xlane.xlu0 %4436  ;;  %5705 = vst [vmem:[%s7998_s26 + $0x188] sm:$0xff] %v4469_v13  ;;  %v4501_v9 = vpack.c.bf16 %v4469_v13, %v4468_v27 }
 0xce6   : > { %v7289_v50 = vpop.eup %7288  ;;  %7298 = vrcp.f32 %v4437_v48 }
 0xce7   : > { %5706 = vst [vmem:[%s7998_s26 + $0x190] sm:$0xff] %v4470_v53  ;;  %v4471_v62 = vmul.f32 %v7289_v50, %v9072_v12  ;;  %6791 = vmatprep.mubr.bf16.mxu1 %v4501_v9  ;;  %v4439_v55 = vpop.xlane.xlu1 %4438 }
 0xce8   : > { %v7291_v57 = vpop.eup %7290  ;;  %7300 = vrcp.f32 %v4439_v55 }
 0xce9   : > { %5707 = vst [vmem:[%s7998_s26 + $0x198] sm:$0xff] %v4471_v62  ;;  %v4441_v32 = vpop.xlane.xlu0 %4440  ;;  %v4502_v1 = vpack.c.bf16 %v4471_v62, %v4470_v53  ;;  %v4472_v25 = vmul.f32 %v7291_v57, %v9076_v43  ;;  %v7378_v62 = vld [vmem:[%s7624_s18 + $0x10] sm:$0xff] }
 0xcea   : > { %v7293_v49 = vpop.eup %7292  ;;  %7302 = vrcp.f32 %v4441_v32 }
 0xceb   : > { %6792 = vmatmul.mubr.bf16.vlgmr.msra.gmra.mrb[160].mxu1 %v4502_v1  ;;  %v4443_v30 = vpop.xlane.xlu1 %4442  ;;  %v4473_v7 = vmul.f32 %v7293_v49, %v9080_v3  ;;  %5708 = vst [vmem:[%s7998_s26 + $0x1a0] sm:$0xff] %v4472_v25  ;;  %v7379_v1 = vld [vmem:[%s7624_s18 + $0x18] sm:$0xff] }
 0xcec   : > { %v7295_v12 = vpop.eup %7294  ;;  %7304 = vrcp.f32 %v4443_v30  ;;  %v7380_v30 = vld [vmem:[%s7624_s18] sm:$0xff] }
 0xced   : > { %v4445_v47 = vpop.xlane.xlu0 %4444  ;;  %5709 = vst [vmem:[%s7998_s26 + $0x1a8] sm:$0xff] %v4473_v7  ;;  %v4503_v28 = vpack.c.bf16 %v4473_v7, %v4472_v25  ;;  %v4474_v23 = vmul.f32 %v7295_v12, %v9084_v21  ;;  %v7381_v12 = vld [vmem:[%s7624_s18 + $0x8] sm:$0xff] }
 0xcee   : > { %v7297_v61 = vpop.eup %7296  ;;  %7306 = vrcp.f32 %v4445_v47 }
 0xcef   : > { %6795 = vmatprep.mubr.bf16.mxu1 %v4503_v28  ;;  %v4447_v43 = vpop.xlane.xlu1 %4446  ;;  %v4475_v54 = vmul.f32 %v7297_v61, %v9088_v36  ;;  %5710 = vst [vmem:[%s7998_s26 + $0x1b0] sm:$0xff] %v4474_v23 }
 0xcf0   : > { %v7299_v40 = vpop.eup %7298  ;;  %7308 = vrcp.f32 %v4447_v43 }
 0xcf1   : > { %v4449_v3 = vpop.xlane.xlu0 %4448  ;;  %5711 = vst [vmem:[%s7998_s26 + $0x1b8] sm:$0xff] %v4475_v54  ;;  %v4504_v15 = vpack.c.bf16 %v4475_v54, %v4474_v23  ;;  %v4476_v42 = vmul.f32 %v7299_v40, %v9092_v52  ;;  %v7382_v23 = vld [vmem:[%s7624_s18 + $0x30] sm:$0xff]  ;;  %v7383_v40 = vld [vmem:[%s7624_s18 + $0x38] sm:$0xff] }
 0xcf2   : > { %v7301_v24 = vpop.eup %7300  ;;  %7310 = vrcp.f32 %v4449_v3 }
 0xcf3   : > { %6796 = vmatmul.mubr.bf16.gmra.mrb[164].mxu1 %v4504_v15  ;;  %v4451_v21 = vpop.xlane.xlu1 %4450  ;;  %v4477_v37 = vmul.f32 %v7301_v24, %v9096_v60  ;;  %5712 = vst [vmem:[%s7998_s26 + $0x1c0] sm:$0xff] %v4476_v42 }
 0xcf4   : > { %v7303_v38 = vpop.eup %7302  ;;  %7312 = vrcp.f32 %v4451_v21  ;;  %v7385_v21 = vld [vmem:[%s7624_s18 + $0x28] sm:$0xff] }
 0xcf5   : > { %5713 = vst [vmem:[%s7998_s26 + $0x1c8] sm:$0xff] %v4477_v37  ;;  %v4505_v36 = vpack.c.bf16 %v4477_v37, %v4476_v42  ;;  %v4478_v46 = vmul.f32 %v7303_v38, %v9099_v14  ;;  %v7384_v42 = vld [vmem:[%s7624_s18 + $0x20] sm:$0xff] }
 0xcf6   : > { %v7305_v0 = vpop.eup %7304 }
 0xcf7   : > { %6799 = vmatprep.mubr.bf16.mxu1 %v4505_v36  ;;  %v4479_v6 = vmul.f32 %v7305_v0, %v9102_v10  ;;  %5714 = vst [vmem:[%s7998_s26 + $0x1d0] sm:$0xff] %v4478_v46  ;;  %v7386_v36 = vld [vmem:[%s7624_s18 + $0x50] sm:$0xff] }
 0xcf8   : > { %v7307_v39 = vpop.eup %7306 }
 0xcf9   : > { %5715 = vst [vmem:[%s7998_s26 + $0x1d8] sm:$0xff] %v4479_v6  ;;  %v4506_v8 = vpack.c.bf16 %v4479_v6, %v4478_v46  ;;  %v4480_v52 = vmul.f32 %v7307_v39, %v9105_v33  ;;  %v7387_v39 = vld [vmem:[%s7624_s18 + $0x58] sm:$0xff] }
 0xcfa   : > { %v7309_v29 = vpop.eup %7308 }
 0xcfb   : > { %6800 = vmatmul.mubr.bf16.gmra.mrb[168].mxu1 %v4506_v8  ;;  %v4481_v34 = vmul.f32 %v7309_v29, %v9108_v44  ;;  %5716 = vst [vmem:[%s7998_s26 + $0x1e0] sm:$0xff] %v4480_v52  ;;  %v7388_v29 = vld [vmem:[%s7624_s18 + $0x40] sm:$0xff] }
 0xcfc   : > { %v7311_v20 = vpop.eup %7310 }
 0xcfd   : > { %5717 = vst [vmem:[%s7998_s26 + $0x1e8] sm:$0xff] %v4481_v34  ;;  %v4507_v41 = vpack.c.bf16 %v4481_v34, %v4480_v52  ;;  %v4482_v35 = vmul.f32 %v7311_v20, %v9111_v51  ;;  %v7389_v20 = vld [vmem:[%s7624_s18 + $0x48] sm:$0xff] }
 0xcfe   : > { %v7313_v60 = vpop.eup %7312 }
 0xcff   : > { %6803 = vmatprep.mubr.bf16.mxu1 %v4507_v41  ;;  %v4483_v26 = vmul.f32 %v7313_v60, %v9114_v16  ;;  %5718 = vst [vmem:[%s7998_s26 + $0x1f0] sm:$0xff] %v4482_v35 }
 0xd01   : > { %5719 = vst [vmem:[%s7998_s26 + $0x1f8] sm:$0xff] %v4483_v26  ;;  %v4508_v56 = vpack.c.bf16 %v4483_v26, %v4482_v35  ;;  %v7390_v26 = vld [vmem:[%s7624_s18 + $0x60] sm:$0xff] }
 0xd03   : > { %6804 = vmatmul.mubr.bf16.gmra.mrb[172].mxu1 %v4508_v56 }
 0xdbe   : > { %v6793_v14 = vpop.f32.mrb[160].mxu1 }
 0xdbf   : > { %v4551_v10 = vpop.f32.mrb[161].mxu1 }
 0xdc0   : > { %v6794_v33 = vpop.f32.mrb[162].mxu1 }
 0xdc1   : > { %v4615_v2 = vpack.c.bf16 %v6794_v33, %v6793_v14  ;;  %v4554_v5 = vpop.f32.mrb[163].mxu1  ;;  %v7391_v33 = vld [vmem:[%s7624_s18 + $0x68] sm:$0xff] }
 0xdc2   : > { %v4614_v44 = vpack.c.bf16 %v4554_v5, %v4551_v10  ;;  %v7392_v5 = vld [vmem:[%s7624_s18 + $0x70] sm:$0xff] }
 0xdc4   : > { %6811 = vmatprep.mubr.msk.bf16.mxu0 %vm851_vm0, %v4614_v44 }
 0xdc5   : > { %6812 = vmatmul.mubr.msk.bf16.vlgmr.msra.gmra.mrb[80].mxu0 %vm851_vm0, %v4615_v2 }
 0xdc6   : > { %v6797_v11 = vpop.f32.mrb[164].mxu1 }
 0xdc7   : > { %v4567_v51 = vpop.f32.mrb[165].mxu1 }
 0xdc8   : > { %v6798_v45 = vpop.f32.mrb[166].mxu1 }
 0xdc9   : > { %v4617_v58 = vpack.c.bf16 %v6798_v45, %v6797_v11  ;;  %v4570_v17 = vpop.f32.mrb[167].mxu1  ;;  %v7393_v11 = vld [vmem:[%s7624_s18 + $0x78] sm:$0xff]  ;;  %s5746_s18 = sshll.u32 %s7583_s17, 13 }
 0xdca   : > { %v4616_v16 = vpack.c.bf16 %v4570_v17, %v4567_v51  ;;  %s9311_s10 = scalar_lea.hbm %s9735_s9, %s5746_s18 }
 0xdcc   : > { %6815 = vmatprep.mubr.msk.bf16.mxu0 %vm851_vm0, %v4616_v16 }
 0xdcd   : > { %6816 = vmatmul.mubr.msk.bf16.gmra.mrb[84].mxu0 %vm851_vm0, %v4617_v58 }
 0xdce   : > { %v6801_v4 = vpop.f32.mrb[168].mxu1 }
 0xdcf   : > { %v4583_v31 = vpop.f32.mrb[169].mxu1 }
 0xdd0   : > { %v6802_v59 = vpop.f32.mrb[170].mxu1 }
 0xdd1   : > { %v4619_v18 = vpack.c.bf16 %v6802_v59, %v6801_v4  ;;  %v4586_v27 = vpop.f32.mrb[171].mxu1 }
 0xdd2   : > { %v4618_v19 = vpack.c.bf16 %v4586_v27, %v4583_v31 }
 0xdd4   : > { %6819 = vmatprep.mubr.msk.bf16.mxu0 %vm851_vm0, %v4618_v19 }
 0xdd5   : > { %6820 = vmatmul.mubr.msk.bf16.gmra.mrb[88].mxu0 %vm851_vm0, %v4619_v18 }
 0xdd6   : > { %v6805_v63 = vpop.f32.mrb[172].mxu1 }
 0xdd7   : > { %v4599_v13 = vpop.f32.mrb[173].mxu1 }
 0xdd8   : > { %v6806_v22 = vpop.f32.mrb[174].mxu1 }
 0xdd9   : > { %v4621_v53 = vpack.c.bf16 %v6806_v22, %v6805_v63  ;;  %v4602_v48 = vpop.f32.mrb[175].mxu1 }
 0xdda   : > { %v4620_v9 = vpack.c.bf16 %v4602_v48, %v4599_v13 }
 0xddc   : > { %6823 = vmatprep.mubr.msk.bf16.mxu0 %vm851_vm0, %v4620_v9 }
 0xddd   : > { %6824 = vmatmul.mubr.msk.bf16.gmra.mrb[92].mxu0 %vm851_vm0, %v4621_v53 }
 0xe98   : > { %v6813_v50 = vpop.f32.mrb[80].mxu0 }
 0xe99   : > { %v9164_v55 = vadd.f32 %v7378_v62, %v6813_v50  ;;  %v4697_v57 = vpop.f32.mrb[81].mxu0 }
 0xe9a   : > { %v6814_v32 = vpop.f32.mrb[82].mxu0  ;;  %v9171_v7 = vadd.f32 %v7380_v30, %v4697_v57 }
 0xe9b   : > { %v9167_v25 = vadd.f32 %v7379_v1, %v6814_v32  ;;  %4796 = vadd.xlane.f32.xlu0 %v9164_v55  ;;  %v4700_v49 = vpop.f32.mrb[83].mxu0 }
 0xe9c   : > { %v9175_v47 = vadd.f32 %v7381_v12, %v4700_v49 }
 0xe9d   : > { %4798 = vadd.xlane.f32.xlu1 %v9167_v25 }
 0xe9f   : > { %4792 = vadd.xlane.f32.xlu0 %v9171_v7 }
 0xea0   : > { %v6817_v28 = vpop.f32.mrb[84].mxu0 }
 0xea1   : > { %v9179_v61 = vadd.f32 %v7382_v23, %v6817_v28  ;;  %4794 = vadd.xlane.f32.xlu1 %v9175_v47  ;;  %v4713_v43 = vpop.f32.mrb[85].mxu0 }
 0xea2   : > { %v6818_v54 = vpop.f32.mrb[86].mxu0  ;;  %v9187_v24 = vadd.f32 %v7384_v42, %v4713_v43 }
 0xea3   : > { %v9183_v3 = vadd.f32 %v7383_v40, %v6818_v54  ;;  %4804 = vadd.xlane.f32.xlu0 %v9179_v61  ;;  %v4716_v15 = vpop.f32.mrb[87].mxu0 }
 0xea4   : > { %v9191_v37 = vadd.f32 %v7385_v21, %v4716_v15 }
 0xea5   : > { %4806 = vadd.xlane.f32.xlu1 %v9183_v3 }
 0xea7   : > { %4800 = vadd.xlane.f32.xlu0 %v9187_v24 }
 0xea8   : > { %v6821_v38 = vpop.f32.mrb[88].mxu0 }
 0xea9   : > { %v9195_v46 = vadd.f32 %v7386_v36, %v6821_v38  ;;  %4802 = vadd.xlane.f32.xlu1 %v9191_v37  ;;  %v4729_v0 = vpop.f32.mrb[89].mxu0 }
 0xeaa   : > { %v6822_v6 = vpop.f32.mrb[90].mxu0  ;;  %v9203_v34 = vadd.f32 %v7388_v29, %v4729_v0 }
 0xeab   : > { %v9199_v8 = vadd.f32 %v7387_v39, %v6822_v6  ;;  %4812 = vadd.xlane.f32.xlu0 %v9195_v46  ;;  %v4732_v52 = vpop.f32.mrb[91].mxu0 }
 0xeac   : > { %v9207_v41 = vadd.f32 %v7389_v20, %v4732_v52 }
 0xead   : > { %4814 = vadd.xlane.f32.xlu1 %v9199_v8 }
 0xeaf   : > { %4808 = vadd.xlane.f32.xlu0 %v9203_v34 }
 0xeb0   : > { %v6825_v35 = vpop.f32.mrb[92].mxu0 }
 0xeb1   : > { %4810 = vadd.xlane.f32.xlu1 %v9207_v41  ;;  %v4745_v60 = vpop.f32.mrb[93].mxu0  ;;  %v9219_v44 = vadd.f32 %v7392_v5, %v6825_v35 }
 0xeb2   : > { %v9212_v56 = vadd.f32 %v7390_v26, %v4745_v60  ;;  %v6826_v14 = vpop.f32.mrb[94].mxu0 }
 0xeb3   : > { %v4748_v10 = vpop.f32.mrb[95].mxu0  ;;  %v9223_v51 = vadd.f32 %v7393_v11, %v6826_v14 }
 0xeb4   : > { %v9215_v2 = vadd.f32 %v7391_v33, %v4748_v10  ;;  %4816 = vadd.xlane.f32.xlu0 %v9212_v56 }
 0xeb6   : > { %4818 = vadd.xlane.f32.xlu1 %v9215_v2 }
 0xeb8   : > { %4820 = vadd.xlane.f32.xlu0 %v9219_v44 }
 0xeba   : > { %4822 = vadd.xlane.f32.xlu1 %v9223_v51 }
 0xf28   : > { %v4797_v45 = vpop.xlane.xlu0 %4796 }
 0xf29   : > { %v4827_v58 = vmul.f32 0.0078125, %v4797_v45 }
 0xf2a   : > { %v4799_v17 = vpop.xlane.xlu1 %4798 }
 0xf2b   : > { %v9228_v16 = vsub.f32 %v9164_v55, %v4827_v58  ;;  %v4828_v4 = vmul.f32 0.0078125, %v4799_v17 }
 0xf2c   : > { %v4793_v31 = vpop.xlane.xlu0 %4792 }
 0xf2d   : > { %v9231_v59 = vsub.f32 %v9167_v25, %v4828_v4  ;;  %v4825_v18 = vmul.f32 0.0078125, %v4793_v31  ;;  %v4859_v27 = vmul.f32 %v9228_v16, %v9228_v16 }
 0xf2e   : > { %v4795_v19 = vpop.xlane.xlu1 %4794 }
 0xf2f   : > { %v9236_v63 = vsub.f32 %v9171_v7, %v4825_v18  ;;  %v4826_v13 = vmul.f32 0.0078125, %v4795_v19  ;;  %4877 = vadd.xlane.f32.xlu0 %v4859_v27  ;;  %v4860_v22 = vmul.f32 %v9231_v59, %v9231_v59 }
 0xf30   : > { %v4805_v53 = vpop.xlane.xlu0 %4804 }
 0xf31   : > { %v9241_v48 = vsub.f32 %v9175_v47, %v4826_v13  ;;  %v4831_v9 = vmul.f32 0.0078125, %v4805_v53  ;;  %4879 = vadd.xlane.f32.xlu1 %v4860_v22  ;;  %v4857_v50 = vmul.f32 %v9236_v63, %v9236_v63 }
 0xf32   : > { %v4807_v62 = vpop.xlane.xlu1 %4806 }
 0xf33   : > { %v9246_v55 = vsub.f32 %v9179_v61, %v4831_v9  ;;  %v4832_v57 = vmul.f32 0.0078125, %v4807_v62  ;;  %4873 = vadd.xlane.f32.xlu0 %v4857_v50  ;;  %v4858_v32 = vmul.f32 %v9241_v48, %v9241_v48 }
 0xf34   : > { %v4801_v1 = vpop.xlane.xlu0 %4800 }
 0xf35   : > { %v9251_v25 = vsub.f32 %v9183_v3, %v4832_v57  ;;  %v4829_v49 = vmul.f32 0.0078125, %v4801_v1  ;;  %4875 = vadd.xlane.f32.xlu1 %v4858_v32  ;;  %v4863_v30 = vmul.f32 %v9246_v55, %v9246_v55 }
 0xf36   : > { %v4803_v7 = vpop.xlane.xlu1 %4802 }
 0xf37   : > { %v9256_v12 = vsub.f32 %v9187_v24, %v4829_v49  ;;  %v4830_v47 = vmul.f32 0.0078125, %v4803_v7  ;;  %4885 = vadd.xlane.f32.xlu0 %v4863_v30  ;;  %v4864_v28 = vmul.f32 %v9251_v25, %v9251_v25 }
 0xf38   : > { %v4813_v23 = vpop.xlane.xlu0 %4812 }
 0xf39   : > { %v9261_v61 = vsub.f32 %v9191_v37, %v4830_v47  ;;  %v4835_v43 = vmul.f32 0.0078125, %v4813_v23  ;;  %4887 = vadd.xlane.f32.xlu1 %v4864_v28  ;;  %v4861_v54 = vmul.f32 %v9256_v12, %v9256_v12 }
 0xf3a   : > { %v4815_v40 = vpop.xlane.xlu1 %4814 }
 0xf3b   : > { %v9266_v3 = vsub.f32 %v9195_v46, %v4835_v43  ;;  %v4836_v15 = vmul.f32 0.0078125, %v4815_v40  ;;  %4881 = vadd.xlane.f32.xlu0 %v4861_v54  ;;  %v4862_v42 = vmul.f32 %v9261_v61, %v9261_v61 }
 0xf3c   : > { %v4809_v24 = vpop.xlane.xlu0 %4808 }
 0xf3d   : > { %v9271_v21 = vsub.f32 %v9199_v8, %v4836_v15  ;;  %v4833_v37 = vmul.f32 0.0078125, %v4809_v24  ;;  %4883 = vadd.xlane.f32.xlu1 %v4862_v42  ;;  %v4867_v38 = vmul.f32 %v9266_v3, %v9266_v3 }
 0xf3e   : > { %v4811_v36 = vpop.xlane.xlu1 %4810 }
 0xf3f   : > { %v9276_v0 = vsub.f32 %v9203_v34, %v4833_v37  ;;  %v4834_v46 = vmul.f32 0.0078125, %v4811_v36  ;;  %4893 = vadd.xlane.f32.xlu0 %v4867_v38  ;;  %v4868_v6 = vmul.f32 %v9271_v21, %v9271_v21 }
 0xf41   : > { %v9281_v39 = vsub.f32 %v9207_v41, %v4834_v46  ;;  %v4817_v52 = vpop.xlane.xlu0 %4816  ;;  %4895 = vadd.xlane.f32.xlu1 %v4868_v6  ;;  %v4865_v8 = vmul.f32 %v9276_v0, %v9276_v0 }
 0xf42   : > { %v4837_v29 = vmul.f32 0.0078125, %v4817_v52 }
 0xf43   : > { %4889 = vadd.xlane.f32.xlu0 %v4865_v8  ;;  %v4819_v20 = vpop.xlane.xlu1 %4818  ;;  %v4866_v34 = vmul.f32 %v9281_v39, %v9281_v39 }
 0xf44   : > { %v9288_v35 = vsub.f32 %v9212_v56, %v4837_v29  ;;  %v4838_v60 = vmul.f32 0.0078125, %v4819_v20 }
 0xf45   : > { %v4821_v26 = vpop.xlane.xlu0 %4820  ;;  %4891 = vadd.xlane.f32.xlu1 %v4866_v34 }
 0xf46   : > { %v9291_v41 = vsub.f32 %v9215_v2, %v4838_v60  ;;  %v4839_v14 = vmul.f32 0.0078125, %v4821_v26  ;;  %v4869_v10 = vmul.f32 %v9288_v35, %v9288_v35 }
 0xf47   : > { %v4823_v33 = vpop.xlane.xlu1 %4822 }
 0xf48   : > { %v9296_v5 = vsub.f32 %v9219_v44, %v4839_v14  ;;  %v4840_v11 = vmul.f32 0.0078125, %v4823_v33  ;;  %4897 = vadd.xlane.f32.xlu0 %v4869_v10  ;;  %v4870_v56 = vmul.f32 %v9291_v41, %v9291_v41 }
 0xf4a   : > { %v9301_v45 = vsub.f32 %v9223_v51, %v4840_v11  ;;  %4899 = vadd.xlane.f32.xlu1 %v4870_v56  ;;  %v4871_v2 = vmul.f32 %v9296_v5, %v9296_v5 }
 0xf4c   : > { %4901 = vadd.xlane.f32.xlu0 %v4871_v2  ;;  %v4872_v58 = vmul.f32 %v9301_v45, %v9301_v45 }
 0xf4e   : > { %4903 = vadd.xlane.f32.xlu1 %v4872_v58 }
 0xf4f   : > { %7419 = shalt.err (!%p7416_p8)
}
 0xf50   : > { %s7420_s26 = scalar_lea.hbm %s9311_s10, 8192  ;;  %s7424_s29 = scalar_lea.hbm %s9735_s9, 16384 }
 0xf51   : > { %p7421_p9 = scmp.ne.s32.totalorder %s9311_s10, %s7420_s26  ;;  %p7425_p0 = scmp.lt.u32.totalorder %s9311_s10, %s9735_s9 }
 0xf52   : > { %p7426_p1 = scmp.lt.u32.totalorder %s7424_s29, %s7420_s26  ;;  %p7428_p3 = scmp.lt.u32.totalorder %s7420_s26, %s9311_s10 }
 0xf53   : > { %p7422_p12 = pnand %p7421_p9, %p7600_p10 }
 0xf54   : > { %p7427_p2 = por %p7426_p1, %p7425_p0 }
 0xf55   : > { %p7423_p13 = pneg %p7422_p12 }
 0xf56   : > { %p7429_p4 = por %p7428_p3, %p7427_p2 }
 0xf58   : > { %p7430_p5 = pnand %p7429_p4, %p7423_p13 }
 0xf5a   : > { %7433 = shalt.err (!%p7430_p5)
}
 0xf5b   : > { %s7506_s13 = smov 128   ;;  %s7507_s25 = smov 8   ;;  %v9781_v4 = vlaneseq }
 0xf5c   : > { %6908 = dma.vmem_to_hbm [thread:$0]  (%p7600_p10), %s9314_s11, 8192, %s9311_s10, %s5231_s12, %s7506_s13, %s7506_s13, %s7507_s25  }
 0xf5d   : > { %v9344_v31 = vshrl.u32 %v9781_v4, 7  ;;  %s5358_s26 = sshll.u32 %s7994_s21, 7  ;;  %s5745_s18 = sshll.u32 %s7583_s17, 11 }
 0xf5e   : > { %s9529_s28 = scalar_lea.vmem [#allocation4], %s5358_s26  ;;  %s9677_s10 = scalar_lea.hbm %s9734_s8, %s5745_s18 }
 0xf5f   : > { %v9353_v22 = vadd.s32 16, %v9344_v31  ;;  %v9358_v50 = vadd.s32 24, %v9344_v31  ;;  %v9361_v62 = vadd.s32 8, %v9344_v31  ;;  %v9364_v57 = vadd.s32 48, %v9344_v31  ;;  %s5244_s29 = sshll.u32 %s9529_s28, 4  ;;  %s5226_s11 = scalar_lea.sflag [#allocation5], %s7994_s21  ;;  %s9679_s29 = int_to_ptr.vmem [resolvable:$true] %s5244_s29 }
 0xf60   : > { %v9370_v1 = vadd.s32 56, %v9344_v31  ;;  %v9373_v30 = vadd.s32 32, %v9344_v31  ;;  %v9376_v7 = vadd.s32 40, %v9344_v31  ;;  %v9380_v47 = vadd.s32 80, %v9344_v31  ;;  %s7434_s17 = scalar_lea.vmem %s9679_s29, 2048  ;;  %s7508_s12 = smov [#allocation4]  }
 0xf61   : > { %v9383_v28 = vadd.s32 88, %v9344_v31  ;;  %p7435_p6 = scmp.ne.s32.totalorder %s9679_s29, %s7434_s17  ;;  %s7438_s27 = sshll.u32 %s7508_s12, 4  ;;  %s7439_s27 = int_to_ptr.vmem [resolvable:$false] %s7438_s27 }
 0xf62   : > { %s7440_s26 = scalar_lea.vmem %s7439_s27, 4096  ;;  %p7441_p9 = scmp.lt.s32.totalorder %s9679_s29, %s7439_s27 }
 0xf63   : > { %p7436_p7 = pnand %p7435_p6, %p7600_p10  ;;  %p7442_p12 = scmp.lt.s32.totalorder %s7440_s26, %s7434_s17 }
 0xf65   : > { %p7437_p8 = pneg %p7436_p7  ;;  %p7443_p13 = por %p7442_p12, %p7441_p9 }
 0xf67   : > { %p7444_p0 = pnand %p7443_p13, %p7437_p8 }
 0xfbc   : > { %v4878_v44 = vpop.xlane.xlu0 %4877 }
 0xfbd   : > { %v4908_v51 = vmul.f32 0.007874016, %v4878_v44 }
 0xfbe   : > { %v4880_v17 = vpop.xlane.xlu1 %4879 }
 0xfbf   : > { %7314 = vrsqrt.f32 %v4908_v51  ;;  %v9346_v18 = vmul.f32 0.007874016, %v4880_v17  ;;  %vm4938_vm2 = vcmp.eq.f32.partialorder %v4908_v51, inf  ;;  %vm4940_vm3 = vcmp.eq.f32.partialorder %v4908_v51, 0.0 }
 0xfc0   : > { %v4874_v27 = vpop.xlane.xlu0 %4873  ;;  %v4941_v23 = vand.u32 2147483648, %v4908_v51 }
 0xfc1   : > { %v9348_v19 = vmul.f32 0.007874016, %v4874_v27  ;;  %7316 = vrsqrt.f32 %v9346_v18  ;;  %vm4945_vm4 = vcmp.eq.f32.partialorder %v9346_v18, inf  ;;  %vm4947_vm5 = vcmp.eq.f32.partialorder %v9346_v18, 0.0 }
 0xfc2   : > { %v4876_v13 = vpop.xlane.xlu1 %4875  ;;  %v4948_v15 = vand.u32 2147483648, %v9346_v18 }
 0xfc3   : > { %7318 = vrsqrt.f32 %v9348_v19  ;;  %v9355_v53 = vmul.f32 0.007874016, %v4876_v13  ;;  %vm4924_vm6 = vcmp.eq.f32.partialorder %v9348_v19, inf  ;;  %vm4926_vm7 = vcmp.eq.f32.partialorder %v9348_v19, 0.0 }
 0xfc4   : > { %v4886_v9 = vpop.xlane.xlu0 %4885  ;;  %v4927_v37 = vand.u32 2147483648, %v9348_v19 }
 0xfc5   : > { %v9366_v32 = vmul.f32 0.007874016, %v4886_v9  ;;  %7320 = vrsqrt.f32 %v9355_v53  ;;  %vm4931_vm8 = vcmp.eq.f32.partialorder %v9355_v53, inf  ;;  %vm4933_vm9 = vcmp.eq.f32.partialorder %v9355_v53, 0.0 }
 0xfc6   : > { %v4888_v49 = vpop.xlane.xlu1 %4887  ;;  %v4934_v36 = vand.u32 2147483648, %v9355_v53 }
 0xfc7   : > { %7322 = vrsqrt.f32 %v9366_v32  ;;  %v9386_v43 = vmul.f32 0.007874016, %v4888_v49  ;;  %vm4966_vm10 = vcmp.eq.f32.partialorder %v9366_v32, inf  ;;  %vm4968_vm11 = vcmp.eq.f32.partialorder %v9366_v32, 0.0 }
 0xfc8   : > { %v4882_v54 = vpop.xlane.xlu0 %4881  ;;  %v4969_v60 = vand.u32 2147483648, %v9366_v32 }
 0xfc9   : > { %v7315_v40 = vpop.eup %7314  ;;  %v9391_v42 = vmul.f32 0.007874016, %v4882_v54  ;;  %7324 = vrsqrt.f32 %v9386_v43  ;;  %vm4973_vm12 = vcmp.eq.f32.partialorder %v9386_v43, inf  ;;  %vm4975_vm13 = vcmp.eq.f32.partialorder %v9386_v43, 0.0 }
 0xfca   : > { %v4937_v24 = vmul.f32 %v7315_v40, %v4908_v51  ;;  %v4884_v38 = vpop.xlane.xlu1 %4883  ;;  %v4976_v56 = vand.u32 2147483648, %v9386_v43 }
 0xfcb   : > { %7326 = vrsqrt.f32 %v9391_v42  ;;  %v7317_v46 = vpop.eup %7316  ;;  %v9403_v52 = vmul.f32 0.007874016, %v4884_v38  ;;  %vm4952_vm14 = vcmp.eq.f32.partialorder %v9391_v42, inf  ;;  %vm4954_vm15 = vcmp.eq.f32.partialorder %v9391_v42, 0.0 }
 0xfcc   : > { %v4939_v6 = vsel %vm4938_vm2, %v4908_v51, %v4937_v24  ;;  %v4894_v8 = vpop.xlane.xlu0 %4893  ;;  %v4944_v34 = vmul.f32 %v7317_v46, %v9346_v18  ;;  %v4955_v49 = vand.u32 2147483648, %v9391_v42 }
 0xfcd   : > { %v7319_v29 = vpop.eup %7318  ;;  %v4942_v20 = vsel %vm4940_vm3, %v4941_v23, %v4939_v6  ;;  %v9408_v26 = vmul.f32 0.007874016, %v4894_v8  ;;  %7328 = vrsqrt.f32 %v9403_v52  ;;  %vm4959_vm0 = vcmp.eq.f32.partialorder %v9403_v52, inf }
 0xfce   : > { %v5036_v14 = vadd.f32 0.001, %v4942_v20  ;;  %v4923_v10 = vmul.f32 %v7319_v29, %v9348_v19  ;;  %v4896_v33 = vpop.xlane.xlu1 %4895  ;;  %v4946_v11 = vsel %vm4945_vm4, %v9346_v18, %v4944_v34  ;;  %vm4961_vm1 = vcmp.eq.f32.partialorder %v9403_v52, 0.0  ;;  %v9782_v29 = vld [vmem:[#allocation17_spill] sm:$0xff] }
 0xfcf   : > { %7330 = vrsqrt.f32 %v9408_v26  ;;  %v7321_v2 = vpop.eup %7320  ;;  %v4949_v58 = vsel %vm4947_vm5, %v4948_v15, %v4946_v11  ;;  %v9431_v23 = vmul.f32 0.007874016, %v4896_v33  ;;  %vm5147_vm2 = vcmp.lt.s32.totalorder %v9353_v22, %v9782_v29 }
 0xfd0   : > { %7332 = vrcp.f32 %v5036_v14  ;;  %v4925_v44 = vsel %vm4924_vm6, %v9348_v19, %v4923_v10  ;;  %v5037_v17 = vadd.f32 0.001, %v4949_v58  ;;  %v4930_v27 = vmul.f32 %v7321_v2, %v9355_v53  ;;  %v4890_v13 = vpop.xlane.xlu0 %4889 }
 0xfd1   : > { %v7323_v51 = vpop.eup %7322  ;;  %v4928_v4 = vsel %vm4926_vm7, %v4927_v37, %v4925_v44  ;;  %v9443_v37 = vmul.f32 0.007874016, %v4890_v13  ;;  %v4962_v20 = vand.u32 2147483648, %v9403_v52  ;;  %vm4994_vm3 = vcmp.eq.f32.partialorder %v9408_v26, inf }
 0xfd2   : > { %v5034_v9 = vadd.f32 0.001, %v4928_v4  ;;  %v4965_v18 = vmul.f32 %v7323_v51, %v9366_v32  ;;  %7334 = vrcp.f32 %v5037_v17  ;;  %v4932_v54 = vsel %vm4931_vm8, %v9355_v53, %v4930_v27  ;;  %v4892_v19 = vpop.xlane.xlu1 %4891 }
 0xfd3   : > { %v7325_v40 = vpop.eup %7324  ;;  %v4935_v15 = vsel %vm4933_vm9, %v4934_v36, %v4932_v54  ;;  %v9453_v34 = vmul.f32 0.007874016, %v4892_v19  ;;  %vm4996_vm4 = vcmp.eq.f32.partialorder %v9408_v26, 0.0  ;;  %v4997_v33 = vand.u32 2147483648, %v9408_v26 }
 0xfd4   : > { %7336 = vrcp.f32 %v5034_v9  ;;  %v4967_v24 = vsel %vm4966_vm10, %v9366_v32, %v4965_v18  ;;  %v5035_v46 = vadd.f32 0.001, %v4935_v15  ;;  %v4972_v8 = vmul.f32 %v7325_v40, %v9386_v43  ;;  %v9490_v9 = vld [vmem:[%s9733_s7] ss:$0 sm:$0xff] }
 0xfd5   : > { %v7327_v38 = vpop.eup %7326  ;;  %v4970_v6 = vsel %vm4968_vm11, %v4969_v60, %v4967_v24  ;;  %7338 = vrsqrt.f32 %v9431_v23  ;;  %vm5148_vm5 = vcmp.lt.s32.totalorder %v9358_v50, %v9782_v29  ;;  %vm5145_vm6 = vcmp.lt.s32.totalorder %v9344_v31, %v9782_v29 }
 0xfd6   : > { %v5040_v53 = vadd.f32 0.001, %v4970_v6  ;;  %v4951_v36 = vmul.f32 %v7327_v38, %v9391_v42  ;;  %7340 = vrcp.f32 %v5035_v46  ;;  %v4974_v32 = vsel %vm4973_vm12, %v9386_v43, %v4972_v8 }
 0xfd7   : > { %v7329_v60 = vpop.eup %7328  ;;  %v4977_v14 = vsel %vm4975_vm13, %v4976_v56, %v4974_v32  ;;  %v9475_v56 = vld [vmem:[%s9732_s6] ss:$0 sm:$0xff]  ;;  %vm5001_vm7 = vcmp.eq.f32.partialorder %v9431_v23, inf  ;;  %vm5003_vm8 = vcmp.eq.f32.partialorder %v9431_v23, 0.0  ;;  %v4900_v13 = vpop.xlane.xlu1 %4899  ;;  %vm5146_vm9 = vcmp.lt.s32.totalorder %v9361_v62, %v9782_v29 }
 0xfd8   : > { %7342 = vrcp.f32 %v5040_v53  ;;  %v4953_v10 = vsel %vm4952_vm14, %v9391_v42, %v4951_v36  ;;  %v5041_v2 = vadd.f32 0.001, %v4977_v14  ;;  %v4958_v44 = vmul.f32 %v7329_v60, %v9403_v52  ;;  %v4898_v42 = vpop.xlane.xlu0 %4897 }
 0xfd9   : > { %v7331_v11 = vpop.eup %7330  ;;  %v4956_v58 = vsel %vm4954_vm15, %v4955_v49, %v4953_v10  ;;  %7344 = vrsqrt.f32 %v9443_v37  ;;  %v5004_v49 = vand.u32 2147483648, %v9431_v23  ;;  %vm4980_vm10 = vcmp.eq.f32.partialorder %v9443_v37, inf }
 0xfda   : > { %v7333_v43 = vpop.eup %7332  ;;  %v5038_v51 = vadd.f32 0.001, %v4956_v58  ;;  %v4993_v17 = vmul.f32 %v7331_v11, %v9408_v26  ;;  %7346 = vrsqrt.f32 %v9453_v34  ;;  %v4960_v27 = vsel %vm4959_vm0, %v9403_v52, %v4958_v44 }
 0xfdb   : > { %v5068_v4 = vmul.f32 %v7333_v43, %v9228_v16  ;;  %7348 = vrcp.f32 %v5041_v2  ;;  %v4963_v18 = vsel %vm4961_vm1, %v4962_v20, %v4960_v27  ;;  %v9505_v52 = vmul.f32 0.007874016, %v4898_v42 }
 0xfdc   : > { %7350 = vrcp.f32 %v5038_v51  ;;  %v4995_v16 = vsel %vm4994_vm3, %v9408_v26, %v4993_v17  ;;  %v7335_v54 = vpop.eup %7334  ;;  %v5039_v40 = vadd.f32 0.001, %v4963_v18  ;;  %vm5151_vm11 = vcmp.lt.s32.totalorder %v9364_v57, %v9782_v29  ;;  %v4902_v11 = vpop.xlane.xlu0 %4901 }
 0xfdd   : > { %v5091_v19 = vmul.f32 %v9475_v56, %v5068_v4  ;;  %v4998_v15 = vsel %vm4996_vm4, %v4997_v33, %v4995_v16  ;;  %v5069_v38 = vmul.f32 %v7335_v54, %v9231_v59  ;;  %vm4982_vm12 = vcmp.eq.f32.partialorder %v9443_v37, 0.0 }
 0xfde   : > { %v7337_v24 = vpop.eup %7336  ;;  %v5044_v46 = vadd.f32 0.001, %v4998_v15  ;;  %v9511_v6 = vmul.f32 0.007874016, %v4900_v13  ;;  %7352 = vrcp.f32 %v5039_v40  ;;  %v4983_v36 = vand.u32 2147483648, %v9443_v37 }
 0xfdf   : > { %v7339_v8 = vpop.eup %7338  ;;  %v5114_v26 = vadd.f32 %v9490_v9, %v5091_v19  ;;  %v5066_v53 = vmul.f32 %v7337_v24, %v9236_v63  ;;  %v5092_v20 = vmul.f32 %v9475_v56, %v5069_v38  ;;  %vm4987_vm13 = vcmp.eq.f32.partialorder %v9453_v34, inf }
 0xfe0   : > { %7354 = vrcp.f32 %v5044_v46  ;;  %v5000_v59 = vmul.f32 %v7339_v8, %v9431_v23  ;;  %v7341_v32 = vpop.eup %7340  ;;  %vm5152_vm14 = vcmp.lt.s32.totalorder %v9370_v1, %v9782_v29  ;;  %vm4989_vm15 = vcmp.eq.f32.partialorder %v9453_v34, 0.0 }
 0xfe1   : > { %v5195_v60 = vsel %vm5147_vm2, %v5114_v26, 0.0  ;;  %v5089_v14 = vmul.f32 %v9475_v56, %v5066_v53  ;;  %7356 = vrsqrt.f32 %v9505_v52  ;;  %v5115_v10 = vadd.f32 %v9490_v9, %v5092_v20 }
 0xfe2   : > { %v7343_v63 = vpop.eup %7342  ;;  %5211 = vst [vmem:[%s9529_s28 + $0x10] sm:$0xff] %v5195_v60  ;;  %v5067_v22 = vmul.f32 %v7341_v32, %v9241_v48  ;;  %vm5149_vm0 = vcmp.lt.s32.totalorder %v9373_v30, %v9782_v29  ;;  %v5002_v33 = vsel %vm5001_vm7, %v9431_v23, %v5000_v59  ;;  %7358 = vrsqrt.f32 %v9511_v6 }
 0xfe3   : > { %v7345_v2 = vpop.eup %7344  ;;  %v5112_v58 = vadd.f32 %v9490_v9, %v5089_v14  ;;  %v5072_v44 = vmul.f32 %v7343_v63, %v9246_v55  ;;  %v5005_v48 = vsel %vm5003_vm8, %v5004_v49, %v5002_v33  ;;  %v4990_v43 = vand.u32 2147483648, %v9453_v34  ;;  %v4904_v14 = vpop.xlane.xlu1 %4903 }
 0xfe4   : > { %v7347_v51 = vpop.eup %7346  ;;  %v5196_v17 = vsel %vm5148_vm5, %v5115_v10, 0.0  ;;  %v5090_v42 = vmul.f32 %v9475_v56, %v5067_v22  ;;  %v5045_v4 = vadd.f32 0.001, %v5005_v48  ;;  %v4979_v27 = vmul.f32 %v7345_v2, %v9443_v37 }
 0xfe5   : > { %v7349_v13 = vpop.eup %7348  ;;  %5212 = vst [vmem:[%s9529_s28 + $0x18] sm:$0xff] %v5196_v17  ;;  %v5193_v55 = vsel %vm5145_vm6, %v5112_v58, 0.0  ;;  %v5095_v23 = vmul.f32 %v9475_v56, %v5072_v44  ;;  %vm5150_vm1 = vcmp.lt.s32.totalorder %v9376_v7, %v9782_v29  ;;  %v4986_v18 = vmul.f32 %v7347_v51, %v9453_v34 }
 0xfe6   : > { %v9558_v50 = vmul.f32 0.007874016, %v4902_v11  ;;  %v7351_v16 = vpop.eup %7350  ;;  %5209 = vst [vmem:[%s9529_s28] sm:$0xff] %v5193_v55  ;;  %v5113_v49 = vadd.f32 %v9490_v9, %v5090_v42  ;;  %v5073_v54 = vmul.f32 %v7349_v13, %v9251_v25  ;;  %vm5155_vm2 = vcmp.lt.s32.totalorder %v9380_v47, %v9782_v29 }
 0xfe7   : > { %7360 = vrcp.f32 %v5045_v4  ;;  %v4981_v19 = vsel %vm4980_vm10, %v9443_v37, %v4979_v27  ;;  %v5118_v40 = vadd.f32 %v9490_v9, %v5095_v23  ;;  %v5070_v15 = vmul.f32 %v7351_v16, %v9256_v12 }
 0xfe8   : > { %v4984_v24 = vsel %vm4982_vm12, %v4983_v36, %v4981_v19  ;;  %v4988_v25 = vsel %vm4987_vm13, %v9453_v34, %v4986_v18  ;;  %v5194_v38 = vsel %vm5146_vm9, %v5113_v49, 0.0  ;;  %v5096_v46 = vmul.f32 %v9475_v56, %v5073_v54  ;;  %v7353_v53 = vpop.eup %7352 }
 0xfe9   : > { %v5042_v8 = vadd.f32 0.001, %v4984_v24  ;;  %v4991_v26 = vsel %vm4989_vm15, %v4990_v43, %v4988_v25  ;;  %5210 = vst [vmem:[%s9529_s28 + $0x8] sm:$0xff] %v5194_v38  ;;  %v5199_v12 = vsel %vm5151_vm11, %v5118_v40, 0.0  ;;  %v5093_v37 = vmul.f32 %v9475_v56, %v5070_v15 }
 0xfea   : > { %v5043_v36 = vadd.f32 0.001, %v4991_v26  ;;  %vm5008_vm3 = vcmp.eq.f32.partialorder %v9505_v52, inf  ;;  %v7355_v20 = vpop.eup %7354  ;;  %5215 = vst [vmem:[%s9529_s28 + $0x30] sm:$0xff] %v5199_v12  ;;  %v5119_v62 = vadd.f32 %v9490_v9, %v5096_v46  ;;  %v5071_v59 = vmul.f32 %v7353_v53, %v9261_v61 }
 0xfeb   : > { %7362 = vrcp.f32 %v5042_v8  ;;  %vm5010_vm4 = vcmp.eq.f32.partialorder %v9505_v52, 0.0  ;;  %v7357_v34 = vpop.eup %7356  ;;  %v5116_v57 = vadd.f32 %v9490_v9, %v5093_v37  ;;  %v5076_v32 = vmul.f32 %v7355_v20, %v9266_v3 }
 0xfec   : > { %7364 = vrcp.f32 %v5043_v36  ;;  %v5011_v60 = vand.u32 2147483648, %v9505_v52  ;;  %v7359_v63 = vpop.eup %7358  ;;  %v5200_v10 = vsel %vm5152_vm14, %v5119_v62, 0.0  ;;  %v5094_v61 = vmul.f32 %v9475_v56, %v5071_v59 }
 0xfed   : > { %v5007_v22 = vmul.f32 %v7357_v34, %v9505_v52  ;;  %7366 = vrsqrt.f32 %v9558_v50  ;;  %5216 = vst [vmem:[%s9529_s28 + $0x38] sm:$0xff] %v5200_v10  ;;  %v5197_v3 = vsel %vm5149_vm0, %v5116_v57, 0.0  ;;  %v5099_v33 = vmul.f32 %v9475_v56, %v5076_v32 }
 0xfee   : > { %v5014_v11 = vmul.f32 %v7359_v63, %v9511_v6  ;;  %vm5015_vm5 = vcmp.eq.f32.partialorder %v9511_v6, inf  ;;  %5213 = vst [vmem:[%s9529_s28 + $0x20] sm:$0xff] %v5197_v3  ;;  %v5117_v1 = vadd.f32 %v9490_v9, %v5094_v61  ;;  %v5018_v58 = vand.u32 2147483648, %v9511_v6 }
 0xfef   : > { %v5009_v2 = vsel %vm5008_vm3, %v9505_v52, %v5007_v22  ;;  %v4921_v44 = vmul.f32 0.007874016, %v4904_v14  ;;  %v5122_v30 = vadd.f32 %v9490_v9, %v5099_v33  ;;  %vm5017_vm6 = vcmp.eq.f32.partialorder %v9511_v6, 0.0 }
 0xff0   : > { %v5012_v48 = vsel %vm5010_vm4, %v5011_v60, %v5009_v2  ;;  %v5016_v43 = vsel %vm5015_vm5, %v9511_v6, %v5014_v11  ;;  %v5198_v17 = vsel %vm5150_vm1, %v5117_v1, 0.0  ;;  %vm5156_vm7 = vcmp.lt.s32.totalorder %v9383_v28, %v9782_v29 }
 0xff1   : > { %v7361_v51 = vpop.eup %7360  ;;  %v5046_v42 = vadd.f32 0.001, %v5012_v48  ;;  %v5019_v4 = vsel %vm5017_vm6, %v5018_v58, %v5016_v43  ;;  %7368 = vrsqrt.f32 %v4921_v44  ;;  %5214 = vst [vmem:[%s9529_s28 + $0x28] sm:$0xff] %v5198_v17  ;;  %v5203_v27 = vsel %vm5155_vm2, %v5122_v30, 0.0 }
 0xff2   : > { %v5077_v52 = vmul.f32 %v7361_v51, %v9271_v21  ;;  %v5047_v13 = vadd.f32 0.001, %v5019_v4  ;;  %5219 = vst [vmem:[%s9529_s28 + $0x50] sm:$0xff] %v5203_v27  ;;  %v5137_v7 = vadd.s32 64, %v9344_v31  ;;  %v5138_v21 = vadd.s32 72, %v9344_v31 }
 0xff3   : > { %7370 = vrcp.f32 %v5046_v42  ;;  %vm5022_vm9 = vcmp.eq.f32.partialorder %v9558_v50, inf  ;;  %vm5024_vm11 = vcmp.eq.f32.partialorder %v9558_v50, 0.0  ;;  %v5141_v8 = vadd.s32 96, %v9344_v31 }
 0xff4   : > { %v5100_v6 = vmul.f32 %v9475_v56, %v5077_v52  ;;  %7372 = vrcp.f32 %v5047_v13  ;;  %vm5153_vm8 = vcmp.lt.s32.totalorder %v5137_v7, %v9782_v29  ;;  %vm5154_vm10 = vcmp.lt.s32.totalorder %v5138_v21, %v9782_v29 }
 0xff5   : > { %v7363_v55 = vpop.eup %7362  ;;  %v5142_v36 = vadd.s32 104, %v9344_v31  ;;  %vm5029_vm12 = vcmp.eq.f32.partialorder %v4921_v44, inf  ;;  %v5032_v20 = vand.u32 2147483648, %v4921_v44  ;;  %vm5031_vm13 = vcmp.eq.f32.partialorder %v4921_v44, 0.0 }
 0xff6   : > { %v7365_v23 = vpop.eup %7364  ;;  %v5123_v18 = vadd.f32 %v9490_v9, %v5100_v6  ;;  %v5074_v47 = vmul.f32 %v7363_v55, %v9276_v0  ;;  %v5025_v0 = vand.u32 2147483648, %v9558_v50  ;;  %vm5157_vm14 = vcmp.lt.s32.totalorder %v5141_v8, %v9782_v29 }
 0xff7   : > { %v7367_v16 = vpop.eup %7366  ;;  %v5075_v49 = vmul.f32 %v7365_v23, %v9281_v39  ;;  %vm5158_vm15 = vcmp.lt.s32.totalorder %v5142_v36, %v9782_v29  ;;  %v5143_v22 = vadd.s32 112, %v9344_v31  ;;  %v5144_v1 = vadd.s32 120, %v9344_v31 }
 0xff8   : > { %v5204_v54 = vsel %vm5156_vm7, %v5123_v18, 0.0  ;;  %v5097_v19 = vmul.f32 %v9475_v56, %v5074_v47  ;;  %v5021_v40 = vmul.f32 %v7367_v16, %v9558_v50 }
 0xff9   : > { %5220 = vst [vmem:[%s9529_s28 + $0x58] sm:$0xff] %v5204_v54  ;;  %v5098_v28 = vmul.f32 %v9475_v56, %v5075_v49  ;;  %vm5159_vm0 = vcmp.lt.s32.totalorder %v5143_v22, %v9782_v29  ;;  %vm5160_vm1 = vcmp.lt.s32.totalorder %v5144_v1, %v9782_v29 }
 0xffa   : > { %v5120_v15 = vadd.f32 %v9490_v9, %v5097_v19  ;;  %v5023_v39 = vsel %vm5022_vm9, %v9558_v50, %v5021_v40 }
 0xffb   : > { %v7369_v24 = vpop.eup %7368  ;;  %v5121_v25 = vadd.f32 %v9490_v9, %v5098_v28  ;;  %v5026_v38 = vsel %vm5024_vm11, %v5025_v0, %v5023_v39 }
 0xffc   : > { %v5201_v46 = vsel %vm5153_vm8, %v5120_v15, 0.0  ;;  %v5048_v26 = vadd.f32 0.001, %v5026_v38  ;;  %v5028_v53 = vmul.f32 %v7369_v24, %v4921_v44 }
 0xffd   : > { %v7371_v12 = vpop.eup %7370  ;;  %5217 = vst [vmem:[%s9529_s28 + $0x40] sm:$0xff] %v5201_v46  ;;  %v5202_v37 = vsel %vm5154_vm10, %v5121_v25, 0.0 }
 0xffe   : > { %v7373_v62 = vpop.eup %7372  ;;  %5218 = vst [vmem:[%s9529_s28 + $0x48] sm:$0xff] %v5202_v37  ;;  %v5078_v50 = vmul.f32 %v7371_v12, %v9288_v35  ;;  %7374 = vrcp.f32 %v5048_v26  ;;  %v5030_v59 = vsel %vm5029_vm12, %v4921_v44, %v5028_v53 }
 0xfff   : > { %v5079_v34 = vmul.f32 %v7373_v62, %v9291_v41  ;;  %v5033_v57 = vsel %vm5031_vm13, %v5032_v20, %v5030_v59 }
0x1000   : > { %v5101_v32 = vmul.f32 %v9475_v56, %v5078_v50  ;;  %v5049_v60 = vadd.f32 0.001, %v5033_v57 }
0x1001   : > { %v5102_v14 = vmul.f32 %v9475_v56, %v5079_v34 }
0x1002   : > { %v5124_v63 = vadd.f32 %v9490_v9, %v5101_v32  ;;  %7376 = vrcp.f32 %v5049_v60 }
0x1003   : > { %v5125_v35 = vadd.f32 %v9490_v9, %v5102_v14 }
0x1004   : > { %v5205_v10 = vsel %vm5157_vm14, %v5124_v63, 0.0 }
0x1005   : > { %5221 = vst [vmem:[%s9529_s28 + $0x60] sm:$0xff] %v5205_v10  ;;  %v5206_v41 = vsel %vm5158_vm15, %v5125_v35, 0.0 }
0x1006   : > { %5222 = vst [vmem:[%s9529_s28 + $0x68] sm:$0xff] %v5206_v41 }
0x1008   : > { %v7375_v61 = vpop.eup %7374 }
0x1009   : > { %v5080_v3 = vmul.f32 %v7375_v61, %v9296_v5 }
0x100b   : > { %v5103_v33 = vmul.f32 %v9475_v56, %v5080_v3 }
0x100c   : > { %v7377_v11 = vpop.eup %7376 }
0x100d   : > { %v5126_v2 = vadd.f32 %v9490_v9, %v5103_v33  ;;  %v5081_v58 = vmul.f32 %v7377_v11, %v9301_v45 }
0x100f   : > { %v5207_v44 = vsel %vm5159_vm0, %v5126_v2, 0.0  ;;  %v5104_v30 = vmul.f32 %v9475_v56, %v5081_v58 }
0x1010   : > { %5223 = vst [vmem:[%s9529_s28 + $0x70] sm:$0xff] %v5207_v44 }
0x1011   : > { %v5127_v5 = vadd.f32 %v9490_v9, %v5104_v30 }
0x1013   : > { %v5208_v45 = vsel %vm5160_vm1, %v5127_v5, 0.0 }
0x1014   : > { %5224 = vst [vmem:[%s9529_s28 + $0x78] sm:$0xff] %v5208_v45 }
0x1015   : > { %7447 = shalt.err (!%p7444_p0)
}
0x1016   : > { %s7448_s28 = scalar_lea.hbm %s9677_s10, 2048  ;;  %s7452_s20 = scalar_lea.hbm %s9734_s8, 4096 }
0x1017   : > { %p7449_p1 = scmp.ne.s32.totalorder %s9677_s10, %s7448_s28  ;;  %p7453_p4 = scmp.lt.u32.totalorder %s9677_s10, %s9734_s8 }
0x1018   : > { %p7454_p5 = scmp.lt.u32.totalorder %s7452_s20, %s7448_s28  ;;  %p7456_p7 = scmp.lt.u32.totalorder %s7448_s28, %s9677_s10 }
0x1019   : > { %p7450_p2 = pnand %p7449_p1, %p7600_p10 }
0x101a   : > { %p7455_p6 = por %p7454_p5, %p7453_p4 }
0x101b   : > { %p7451_p3 = pneg %p7450_p2 }
0x101c   : > { %p7457_p8 = por %p7456_p7, %p7455_p6 }
0x101e   : > { %p7458_p9 = pnand %p7457_p8, %p7451_p3 }
0x1020   : > { %7461 = shalt.err (!%p7458_p9)
}
0x1021   : > { %6907 = dma.vmem_to_hbm [thread:$0]  (%p7600_p10), %s9679_s29, 2048, %s9677_s10, %s5226_s11, %s7506_s13, %s7506_s13, %s7507_s25  }
0x1022 PF: > { %p6918_p12 = scmp.ge.s32.totalorder %s7502_s16, 2  ;;  %s5275_s17 = sand.u32 1, %s7490_s14  }
0x1023   : > { %s5276_s26 = scalar_lea.sflag [#allocation5], %s5275_s17 }
0x1024   : > { %p6912_p13 = pnand %p6918_p12, %p7604_p11 }
0x1026   : > { %7481 = dma.done.wait (!%p6912_p13), %s5276_s26, 2048  }
0x1027   : > { %7483 = vsyncadd (!%p6912_p13), %s5276_s26, 4294965248  ;;  %s5285_s23 = scalar_lea.sflag [#allocation7], %s5275_s17 }
0x1028   : > { %7485 = dma.done.wait (!%p6912_p13), %s5285_s23, 8192  }
0x1029   : > { %7487 = vsyncadd (!%p6912_p13), %s5285_s23, 4294959104  ;;  %p29_p10 = scmp.ge.s32.totalorder %s7587_s19, 4   ;;  %s9783_s14 = smov %s7494_s0 }
0x102a   : > { %s9784_s0 = smov %s7498_s15  ;;  %s9785_s15 = smov %s7598_s22 }
0x102b   : > { %s9786_s16 = smov %s7587_s19  ;;  %31 = sbr.rel (!%p29_p10) target bundleno = 20 (0x14), region = 115 }
0x1032   :  { %5290 = vsyncpa [#allocation5], 1 }
0x1033   :  { %5292 = vsyncpa [#allocation5 + $0x1], 1 }
0x1034   :  { %5293 = vsyncpa [#allocation7], 1 }
0x1035   :  { %5295 = vsyncpa [#allocation7 + $0x1], 1 }

</bundles_post_ra>
